<compile_context>
chip_gen: v7x
topology: tpu7x:2x2x1
jax: 0.10.0
libtpu: 0.0.40
codegen_flags: <defaults>
</compile_context>

<pallas_src>
import functools

import jax
import jax.numpy as jnp
from jax.experimental import pallas as pl
from jax.experimental.pallas import tpu as pltpu

_NEG_SLOPE = 0.2
_EPS = 1e-5


def _round_up(x, m):
    return ((x + m - 1) // m) * m


@functools.lru_cache(maxsize=1)
def _vmem_limit_bytes():
    """Generation-aware VMEM budget (<= ~40 MiB on v7x, larger on v5e/v6e)."""
    cap = 128 * 1024 * 1024
    try:
        cap = int(getattr(pltpu.get_tpu_info(), "vmem_capacity_bytes", cap))
    except Exception:
        pass
    return max(32 * 1024 * 1024, min(int(cap * 0.6), 100 * 1024 * 1024))


def _pick_tn(n):
    """Channel-tile size: lane-aligned multiple of 128 when possible, else full N."""
    if n % 256 == 0:
        return 256
    if n % 128 == 0:
        return 128
    return n


# ----------------------------------------------------------------------------
# Fused kernel: conv (P shifted matmuls) + [bias | InstanceNorm] + LeakyReLU.
# grid = (B, N_tiles); all accumulation happens inside one grid step.
# ----------------------------------------------------------------------------
def _fused_conv_kernel(x_ref, w_ref, aux_ref, o_ref, *, offsets, inv_count, do_norm):
    """
    x_ref   : (Lx, K)     bf16  flattened padded activation image (VMEM resident)
    w_ref   : (P, K, tn)  bf16  per-kernel-position weight matrices
    aux_ref : (1, tn) f32 conv bias             (do_norm=False)
              (M, 1)  f32 valid-column mask      (do_norm=True; bias cancels in IN)
    o_ref   : (M, tn)     bf16  flattened output rows (incl. wrap-around garbage cols)
    """
    m_full = o_ref.shape[0]

    acc = None
    for p, off in enumerate(offsets):            # statically unrolled: P = 4 or 16
        xs = x_ref[pl.ds(off, m_full), :]        # contiguous shifted window (M, K)
        part = jnp.dot(xs, w_ref[p], preferred_element_type=jnp.float32)
        acc = part if acc is None else acc + part

    if do_norm:
        # InstanceNorm2d(affine=False): per-channel stats over *valid* columns only.
        yv = acc * aux_ref[...]                                   # zero garbage cols
        mean = jnp.sum(yv, axis=0, keepdims=True) * inv_count
        mean_sq = jnp.sum(yv * yv, axis=0, keepdims=True) * inv_count
        var = jnp.maximum(mean_sq - mean * mean, 0.0)             # biased, one-pass
        y = (acc - mean) * jax.lax.rsqrt(var + _EPS)
    else:
        y = acc + aux_ref[...]                                    # conv bias
    y = jnp.maximum(y, _NEG_SLOPE * y)                            # LeakyReLU(0.2)
    o_ref[...] = y.astype(o_ref.dtype)


def _fused_conv_pallas(x_flat, w_eff, aux, *, offsets, m_full, tn, do_norm, inv_count):
    B, Lx, K = x_flat.shape
    P, _, N = w_eff.shape
    assert N % tn == 0, (N, tn)
    assert max(offsets) + m_full <= Lx, (offsets, m_full, Lx)
    n_tiles = N // tn

    kernel = functools.partial(_fused_conv_kernel, offsets=offsets,
                               inv_count=inv_count, do_norm=do_norm)
    if do_norm:
        aux_spec = pl.BlockSpec((m_full, 1), lambda bi, ni: (0, 0))
    else:
        aux_spec = pl.BlockSpec((1, tn), lambda bi, ni: (0, ni))

    flops = 2 * B * m_full * K * P * N
    bytes_accessed = (2 * B * Lx * K + 2 * P * K * N + 2 * B * m_full * N
                      + 4 * int(aux.size))

    return pl.pallas_call(
        kernel,
        out_shape=jax.ShapeDtypeStruct((B, m_full, N), jnp.bfloat16),
        grid=(B, n_tiles),
        in_specs=[
            pl.BlockSpec((None, Lx, K), lambda bi, ni: (bi, 0, 0)),   # resident across ni
            pl.BlockSpec((P, K, tn), lambda bi, ni: (0, 0, ni)),
            aux_spec,
        ],
        out_specs=pl.BlockSpec((None, m_full, tn), lambda bi, ni: (bi, 0, ni)),
        compiler_params=pltpu.CompilerParams(
            dimension_semantics=("parallel", "parallel"),
            vmem_limit_bytes=_vmem_limit_bytes()),
        cost_estimate=pl.CostEstimate(
            flops=flops,
            transcendentals=B * N if do_norm else 0,
            bytes_accessed=bytes_accessed),
    )(x_flat, w_eff, aux)


# ----------------------------------------------------------------------------
# Per-layer wrapper: pad (+ space-to-depth for stride 2), flatten, call kernel.
# All wrapper ops are layout plumbing that XLA fuses into a single copy.
# ----------------------------------------------------------------------------
def _conv4x4_fused(x_nhwc, w_hwio, bias, *, stride, do_norm):
    """Fused Conv2d(k=4, stride in {1,2}, pad=1) [+ InstanceNorm] + LeakyReLU(0.2)."""
    B, H, W, C = x_nhwc.shape
    N = w_hwio.shape[-1]
    xp = jnp.pad(x_nhwc, ((0, 0), (1, 1), (1, 1), (0, 0)))
    Hp, Wp = H + 2, W + 2

    if stride == 2:
        # Space-to-depth: stride-2 4x4 conv == stride-1 2x2 conv over (H/2, W/2, 4C).
        assert Hp % 2 == 0 and Wp % 2 == 0, (
            "stride-2 layers need even input spatial dims")
        Hs, Ws = Hp // 2, Wp // 2
        x_eff = (xp.reshape(B, Hs, 2, Ws, 2, C)
                 .transpose(0, 1, 3, 2, 4, 5)
                 .reshape(B, Hs, Ws, 4 * C))
        w_eff = (w_hwio.reshape(2, 2, 2, 2, C, N)
                 .transpose(0, 2, 1, 3, 4, 5)
                 .reshape(4, 4 * C, N))
        kh = kw = 2
        Heff, Weff = Hs, Ws
    else:
        x_eff = xp
        w_eff = w_hwio.reshape(16, C, N)
        kh = kw = 4
        Heff, Weff = Hp, Wp

    Ho, Wo = Heff - kh + 1, Weff - kw + 1
    K = x_eff.shape[-1]
    m_full = Ho * Weff                       # includes (kw-1) wrap-around cols per row
    offsets = tuple(a * Weff + b for a in range(kh) for b in range(kw))

    lx = _round_up(Heff * Weff + (kw - 1), 8)
    x_flat = x_eff.reshape(B, Heff * Weff, K)
    x_flat = jnp.pad(x_flat, ((0, 0), (0, lx - Heff * Weff), (0, 0)))
    x_flat = x_flat.astype(jnp.bfloat16)
    w_eff = w_eff.astype(jnp.bfloat16)

    tn = _pick_tn(N)
    if do_norm:
        # Conv bias cancels exactly under InstanceNorm(affine=False) -> skipped.
        col = jnp.arange(m_full, dtype=jnp.int32) % Weff
        aux = (col < Wo).astype(jnp.float32).reshape(m_full, 1)
        inv_count = 1.0 / float(Ho * Wo)
    else:
        aux = bias.reshape(1, N).astype(jnp.float32)
        inv_count = 1.0

    out = _fused_conv_pallas(x_flat, w_eff, aux, offsets=offsets, m_full=m_full,
                             tn=tn, do_norm=do_norm, inv_count=inv_count)
    # Drop the wrap-around garbage columns and restore NHWC.
    return out.reshape(B, Ho, Weff, N)[:, :, :Wo, :]


def _final_conv_xla(x_nhwc, w, b):
    """Final 4x4 stride-1 pad-1 conv with C_out=1, left to XLA (lane-sparse)."""
    y = jax.lax.conv_general_dilated(
        x_nhwc.astype(jnp.bfloat16),
        w.astype(jnp.bfloat16),
        window_strides=(1, 1),
        padding=((1, 1), (1, 1)),
        dimension_numbers=("NHWC", "HWIO", "NHWC"),
        preferred_element_type=jnp.float32,
    )
    return y + b.reshape(1, 1, 1, -1)


# ----------------------------------------------------------------------------
# Discriminator forward (mirrors the PyTorch nn.Sequential exactly)
# ----------------------------------------------------------------------------
def make_params(key, input_nc, ndf):
    """Weights stored as [kh, kw, C_in, C_out]; biases as [1, C_out]."""
    kw = 4
    chans = [(input_nc, ndf),
             (ndf, ndf * 2),
             (ndf * 2, ndf * 4),
             (ndf * 4, ndf * 8),
             (ndf * 8, 1)]
    params = []
    for (cin, cout) in chans:
        key, kw_key, kb_key = jax.random.split(key, 3)
        fan_in = cin * kw * kw
        bound = 1.0 / jnp.sqrt(fan_in)
        w = jax.random.uniform(kw_key, (kw, kw, cin, cout), jnp.float32, -bound, bound)
        b = jax.random.uniform(kb_key, (1, cout), jnp.float32, -bound, bound)
        params.append((w, b))
    return params


_LAYER_CFG = [(2, False), (2, True), (2, True), (1, True)]   # (stride, has_instance_norm)


def discriminator_forward(x_nchw, params, use_sigmoid=False):
    """x_nchw: [B, C, H, W] float32 -> [B, 1, H', W'] float32."""
    x = jnp.transpose(x_nchw, (0, 2, 3, 1)).astype(jnp.bfloat16)   # NCHW -> NHWC bf16
    for (w, b), (stride, do_norm) in zip(params[:4], _LAYER_CFG):
        x = _conv4x4_fused(x, w, b, stride=stride, do_norm=do_norm)
    w5, b5 = params[4]
    y = _final_conv_xla(x, w5, b5)
    if use_sigmoid:
        y = jax.nn.sigmoid(y)
    return jnp.transpose(y, (0, 3, 1, 2))                          # NHWC -> NCHW


# ----------------------------------------------------------------------------
# Pure-XLA reference (same bf16 operand / f32 accumulate structure) for checking.
# ----------------------------------------------------------------------------
def _instance_norm_ref(y):
    mean = jnp.mean(y, axis=(1, 2), keepdims=True)
    var = jnp.mean(jnp.square(y - mean), axis=(1, 2), keepdims=True)
    return (y - mean) * jax.lax.rsqrt(var + _EPS)


def reference_forward(x_nchw, params, use_sigmoid=False):
    x = jnp.transpose(x_nchw, (0, 2, 3, 1)).astype(jnp.bfloat16)
    for (w, b), (stride, do_norm) in zip(params[:4], _LAYER_CFG):
        y = jax.lax.conv_general_dilated(
            x, w.astype(jnp.bfloat16), (stride, stride), ((1, 1), (1, 1)),
            dimension_numbers=("NHWC", "HWIO", "NHWC"),
            preferred_element_type=jnp.float32)
        if do_norm:
            y = _instance_norm_ref(y)
        else:
            y = y + b.reshape(1, 1, 1, -1)
        y = jnp.maximum(y, _NEG_SLOPE * y)
        x = y.astype(jnp.bfloat16)
    w5, b5 = params[4]
    y = _final_conv_xla(x, w5, b5)
    if use_sigmoid:
        y = jax.nn.sigmoid(y)
    return jnp.transpose(y, (0, 3, 1, 2))


if __name__ == "__main__":
    # 32x32 is the smallest spatial size that survives 3 stride-2 + 2 stride-1
    # 4x4/pad-1 convs; batch=2, input_nc=4, ndf=8 keeps the demo tiny.
    B, C_IN, H, W = 2, 4, 32, 32
    NDF = 8

    key = jax.random.PRNGKey(0)
    key, xk = jax.random.split(key)
    x = jax.random.normal(xk, (B, C_IN, H, W), jnp.float32)

    params = make_params(key, C_IN, NDF)

    fwd = jax.jit(lambda inp: discriminator_forward(inp, params, use_sigmoid=False))
    out = fwd(x)
    jax.block_until_ready(out)

    # Expected PatchGAN output for 32x32 input: [2, 1, 2, 2]
    assert out.shape == (B, 1, 2, 2), out.shape
    assert out.dtype == jnp.float32, out.dtype

    # Numerical check against a pure-XLA reference with the same precision policy.
    ref = jax.jit(lambda inp: reference_forward(inp, params, use_sigmoid=False))(x)
    jax.block_until_ready(ref)
    err = float(jnp.max(jnp.abs(out - ref)))
    scale = float(jnp.max(jnp.abs(ref)))
    assert err <= 5e-2 * max(1.0, scale), f"mismatch vs XLA reference: {err} (scale {scale})"

    print("KERNEL_OK")
</pallas_src>

<mosaic_0001>
module attributes {stable_mosaic.version = 11 : i64} {
  func.func @_fused_conv_kernel(%arg0: i32, %arg1: i32, %arg2: memref<1x296x16xbf16, #tpu.memory_space<vmem>>, %arg3: memref<4x16x8xbf16, #tpu.memory_space<vmem>>, %arg4: memref<1x8xf32, #tpu.memory_space<vmem>>, %arg5: memref<1x272x8xbf16, #tpu.memory_space<vmem>>) attributes {dimension_semantics = [#tpu.dimension_semantics<parallel>, #tpu.dimension_semantics<parallel>], iteration_bounds = array<i64: 2, 1>, scalar_prefetch = 0 : i64, scratch_operands = 0 : i64, tpu.core_type = #tpu.core_type<tc>, window_params = [{transform_indices = @transform_0, window_bounds = array<i64: 1, 296, 16>}, {transform_indices = @transform_1, window_bounds = array<i64: 4, 16, 8>}, {transform_indices = @transform_2, window_bounds = array<i64: 1, 8>}, {transform_indices = @transform_3, window_bounds = array<i64: 1, 272, 8>}]} {
    %c0 = arith.constant 0 : index
    %c0_0 = arith.constant 0 : index
    %c0_1 = arith.constant 0 : index
    %0 = vector.load %arg2[%c0, %c0_0, %c0_1] : memref<1x296x16xbf16, #tpu.memory_space<vmem>>, vector<1x272x16xbf16>
    %1 = vector.shape_cast %0 : vector<1x272x16xbf16> to vector<272x16xbf16>
    %c0_2 = arith.constant 0 : index
    %c0_3 = arith.constant 0 : index
    %c0_4 = arith.constant 0 : index
    %2 = vector.load %arg3[%c0_2, %c0_3, %c0_4] : memref<4x16x8xbf16, #tpu.memory_space<vmem>>, vector<1x16x8xbf16>
    %3 = vector.shape_cast %2 : vector<1x16x8xbf16> to vector<16x8xbf16>
    %cst = arith.constant dense<0.000000e+00> : vector<272x8xf32>
    %4 = tpu.matmul %1, %3, %cst {dimension_numbers = #tpu.dot_dimension_numbers<[1], [0], [0], [1], [0, 0, 1, 1], [], []>} : vector<272x16xbf16>, vector<16x8xbf16>, vector<272x8xf32> -> vector<272x8xf32>
    %c0_5 = arith.constant 0 : index
    %c1 = arith.constant 1 : index
    %c0_6 = arith.constant 0 : index
    %5 = vector.load %arg2[%c0_5, %c1, %c0_6] : memref<1x296x16xbf16, #tpu.memory_space<vmem>>, vector<1x272x16xbf16>
    %6 = vector.shape_cast %5 : vector<1x272x16xbf16> to vector<272x16xbf16>
    %c1_7 = arith.constant 1 : index
    %c0_8 = arith.constant 0 : index
    %c0_9 = arith.constant 0 : index
    %7 = vector.load %arg3[%c1_7, %c0_8, %c0_9] : memref<4x16x8xbf16, #tpu.memory_space<vmem>>, vector<1x16x8xbf16>
    %8 = vector.shape_cast %7 : vector<1x16x8xbf16> to vector<16x8xbf16>
    %cst_10 = arith.constant dense<0.000000e+00> : vector<272x8xf32>
    %9 = tpu.matmul %6, %8, %cst_10 {dimension_numbers = #tpu.dot_dimension_numbers<[1], [0], [0], [1], [0, 0, 1, 1], [], []>} : vector<272x16xbf16>, vector<16x8xbf16>, vector<272x8xf32> -> vector<272x8xf32>
    %10 = arith.addf %4, %9 : vector<272x8xf32>
    %c0_11 = arith.constant 0 : index
    %c17 = arith.constant 17 : index
    %c0_12 = arith.constant 0 : index
    %11 = vector.load %arg2[%c0_11, %c17, %c0_12] : memref<1x296x16xbf16, #tpu.memory_space<vmem>>, vector<1x272x16xbf16>
    %12 = vector.shape_cast %11 : vector<1x272x16xbf16> to vector<272x16xbf16>
    %c2 = arith.constant 2 : index
    %c0_13 = arith.constant 0 : index
    %c0_14 = arith.constant 0 : index
    %13 = vector.load %arg3[%c2, %c0_13, %c0_14] : memref<4x16x8xbf16, #tpu.memory_space<vmem>>, vector<1x16x8xbf16>
    %14 = vector.shape_cast %13 : vector<1x16x8xbf16> to vector<16x8xbf16>
    %cst_15 = arith.constant dense<0.000000e+00> : vector<272x8xf32>
    %15 = tpu.matmul %12, %14, %cst_15 {dimension_numbers = #tpu.dot_dimension_numbers<[1], [0], [0], [1], [0, 0, 1, 1], [], []>} : vector<272x16xbf16>, vector<16x8xbf16>, vector<272x8xf32> -> vector<272x8xf32>
    %16 = arith.addf %10, %15 : vector<272x8xf32>
    %c0_16 = arith.constant 0 : index
    %c18 = arith.constant 18 : index
    %c0_17 = arith.constant 0 : index
    %17 = vector.load %arg2[%c0_16, %c18, %c0_17] : memref<1x296x16xbf16, #tpu.memory_space<vmem>>, vector<1x272x16xbf16>
    %18 = vector.shape_cast %17 : vector<1x272x16xbf16> to vector<272x16xbf16>
    %c3 = arith.constant 3 : index
    %c0_18 = arith.constant 0 : index
    %c0_19 = arith.constant 0 : index
    %19 = vector.load %arg3[%c3, %c0_18, %c0_19] : memref<4x16x8xbf16, #tpu.memory_space<vmem>>, vector<1x16x8xbf16>
    %20 = vector.shape_cast %19 : vector<1x16x8xbf16> to vector<16x8xbf16>
    %cst_20 = arith.constant dense<0.000000e+00> : vector<272x8xf32>
    %21 = tpu.matmul %18, %20, %cst_20 {dimension_numbers = #tpu.dot_dimension_numbers<[1], [0], [0], [1], [0, 0, 1, 1], [], []>} : vector<272x16xbf16>, vector<16x8xbf16>, vector<272x8xf32> -> vector<272x8xf32>
    %22 = arith.addf %16, %21 : vector<272x8xf32>
    %c0_21 = arith.constant 0 : index
    %c0_22 = arith.constant 0 : index
    %23 = vector.load %arg4[%c0_21, %c0_22] : memref<1x8xf32, #tpu.memory_space<vmem>>, vector<1x8xf32>
    %24 = vector.broadcast %23 : vector<1x8xf32> to vector<272x8xf32>
    %25 = arith.addf %22, %24 : vector<272x8xf32>
    %cst_23 = arith.constant 2.000000e-01 : f32
    %26 = vector.broadcast %cst_23 : f32 to vector<272x8xf32>
    %27 = arith.mulf %26, %25 : vector<272x8xf32>
    %28 = arith.maximumf %25, %27 : vector<272x8xf32>
    %29 = arith.truncf %28 : vector<272x8xf32> to vector<272x8xbf16>
    %c0_24 = arith.constant 0 : index
    %c0_25 = arith.constant 0 : index
    %c0_26 = arith.constant 0 : index
    %30 = vector.load %arg5[%c0_24, %c0_25, %c0_26] : memref<1x272x8xbf16, #tpu.memory_space<vmem>>, vector<1x272x8xbf16>
    %31 = vector.shape_cast %30 : vector<1x272x8xbf16> to vector<272x8xbf16>
    %32 = vector.shape_cast %29 : vector<272x8xbf16> to vector<1x272x8xbf16>
    tpu.vector_store %arg5[%c0_24, %c0_25, %c0_26], %32 {strides = array<i32>} : memref<1x272x8xbf16, #tpu.memory_space<vmem>>, vector<1x272x8xbf16>,
    return
  }
  func.func @transform_0(%arg0: i32, %arg1: i32) -> (i32, i32, i32) {
    %c0_i32 = arith.constant 0 : i32
    %c0_i32_0 = arith.constant 0 : i32
    %c0_i32_1 = arith.constant 0 : i32
    return %arg0, %c0_i32, %c0_i32_0 : i32, i32, i32
  }
  func.func @transform_1(%arg0: i32, %arg1: i32) -> (i32, i32, i32) {
    %c0_i32 = arith.constant 0 : i32
    %c0_i32_0 = arith.constant 0 : i32
    %c0_i32_1 = arith.constant 0 : i32
    return %c0_i32, %c0_i32_0, %arg1 : i32, i32, i32
  }
  func.func @transform_2(%arg0: i32, %arg1: i32) -> (i32, i32) {
    %c0_i32 = arith.constant 0 : i32
    %c0_i32_0 = arith.constant 0 : i32
    return %c0_i32, %arg1 : i32, i32
  }
  func.func @transform_3(%arg0: i32, %arg1: i32) -> (i32, i32, i32) {
    %c0_i32 = arith.constant 0 : i32
    %c0_i32_0 = arith.constant 0 : i32
    return %arg0, %c0_i32, %arg1 : i32, i32, i32
  }
}

module attributes {stable_mosaic.version = 11 : i64} {
  func.func @_fused_conv_kernel(%arg0: i32, %arg1: i32, %arg2: memref<1x88x32xbf16, #tpu.memory_space<vmem>>, %arg3: memref<4x32x16xbf16, #tpu.memory_space<vmem>>, %arg4: memref<72x1xf32, #tpu.memory_space<vmem>>, %arg5: memref<1x72x16xbf16, #tpu.memory_space<vmem>>) attributes {dimension_semantics = [#tpu.dimension_semantics<parallel>, #tpu.dimension_semantics<parallel>], iteration_bounds = array<i64: 2, 1>, scalar_prefetch = 0 : i64, scratch_operands = 0 : i64, tpu.core_type = #tpu.core_type<tc>, window_params = [{transform_indices = @transform_0, window_bounds = array<i64: 1, 88, 32>}, {transform_indices = @transform_1, window_bounds = array<i64: 4, 32, 16>}, {pipeline_mode = #tpu.pipeline_mode<synchronous>, transform_indices = @transform_2, window_bounds = array<i64: 72, 1>}, {transform_indices = @transform_3, window_bounds = array<i64: 1, 72, 16>}]} {
    %c0 = arith.constant 0 : index
    %c0_0 = arith.constant 0 : index
    %c0_1 = arith.constant 0 : index
    %0 = vector.load %arg2[%c0, %c0_0, %c0_1] : memref<1x88x32xbf16, #tpu.memory_space<vmem>>, vector<1x72x32xbf16>
    %1 = vector.shape_cast %0 : vector<1x72x32xbf16> to vector<72x32xbf16>
    %c0_2 = arith.constant 0 : index
    %c0_3 = arith.constant 0 : index
    %c0_4 = arith.constant 0 : index
    %2 = vector.load %arg3[%c0_2, %c0_3, %c0_4] : memref<4x32x16xbf16, #tpu.memory_space<vmem>>, vector<1x32x16xbf16>
    %3 = vector.shape_cast %2 : vector<1x32x16xbf16> to vector<32x16xbf16>
    %cst = arith.constant dense<0.000000e+00> : vector<72x16xf32>
    %4 = tpu.matmul %1, %3, %cst {dimension_numbers = #tpu.dot_dimension_numbers<[1], [0], [0], [1], [0, 0, 1, 1], [], []>} : vector<72x32xbf16>, vector<32x16xbf16>, vector<72x16xf32> -> vector<72x16xf32>
    %c0_5 = arith.constant 0 : index
    %c1 = arith.constant 1 : index
    %c0_6 = arith.constant 0 : index
    %5 = vector.load %arg2[%c0_5, %c1, %c0_6] : memref<1x88x32xbf16, #tpu.memory_space<vmem>>, vector<1x72x32xbf16>
    %6 = vector.shape_cast %5 : vector<1x72x32xbf16> to vector<72x32xbf16>
    %c1_7 = arith.constant 1 : index
    %c0_8 = arith.constant 0 : index
    %c0_9 = arith.constant 0 : index
    %7 = vector.load %arg3[%c1_7, %c0_8, %c0_9] : memref<4x32x16xbf16, #tpu.memory_space<vmem>>, vector<1x32x16xbf16>
    %8 = vector.shape_cast %7 : vector<1x32x16xbf16> to vector<32x16xbf16>
    %cst_10 = arith.constant dense<0.000000e+00> : vector<72x16xf32>
    %9 = tpu.matmul %6, %8, %cst_10 {dimension_numbers = #tpu.dot_dimension_numbers<[1], [0], [0], [1], [0, 0, 1, 1], [], []>} : vector<72x32xbf16>, vector<32x16xbf16>, vector<72x16xf32> -> vector<72x16xf32>
    %10 = arith.addf %4, %9 : vector<72x16xf32>
    %c0_11 = arith.constant 0 : index
    %c9 = arith.constant 9 : index
    %c0_12 = arith.constant 0 : index
    %11 = vector.load %arg2[%c0_11, %c9, %c0_12] : memref<1x88x32xbf16, #tpu.memory_space<vmem>>, vector<1x72x32xbf16>
    %12 = vector.shape_cast %11 : vector<1x72x32xbf16> to vector<72x32xbf16>
    %c2 = arith.constant 2 : index
    %c0_13 = arith.constant 0 : index
    %c0_14 = arith.constant 0 : index
    %13 = vector.load %arg3[%c2, %c0_13, %c0_14] : memref<4x32x16xbf16, #tpu.memory_space<vmem>>, vector<1x32x16xbf16>
    %14 = vector.shape_cast %13 : vector<1x32x16xbf16> to vector<32x16xbf16>
    %cst_15 = arith.constant dense<0.000000e+00> : vector<72x16xf32>
    %15 = tpu.matmul %12, %14, %cst_15 {dimension_numbers = #tpu.dot_dimension_numbers<[1], [0], [0], [1], [0, 0, 1, 1], [], []>} : vector<72x32xbf16>, vector<32x16xbf16>, vector<72x16xf32> -> vector<72x16xf32>
    %16 = arith.addf %10, %15 : vector<72x16xf32>
    %c0_16 = arith.constant 0 : index
    %c10 = arith.constant 10 : index
    %c0_17 = arith.constant 0 : index
    %17 = vector.load %arg2[%c0_16, %c10, %c0_17] : memref<1x88x32xbf16, #tpu.memory_space<vmem>>, vector<1x72x32xbf16>
    %18 = vector.shape_cast %17 : vector<1x72x32xbf16> to vector<72x32xbf16>
    %c3 = arith.constant 3 : index
    %c0_18 = arith.constant 0 : index
    %c0_19 = arith.constant 0 : index
    %19 = vector.load %arg3[%c3, %c0_18, %c0_19] : memref<4x32x16xbf16, #tpu.memory_space<vmem>>, vector<1x32x16xbf16>
    %20 = vector.shape_cast %19 : vector<1x32x16xbf16> to vector<32x16xbf16>
    %cst_20 = arith.constant dense<0.000000e+00> : vector<72x16xf32>
    %21 = tpu.matmul %18, %20, %cst_20 {dimension_numbers = #tpu.dot_dimension_numbers<[1], [0], [0], [1], [0, 0, 1, 1], [], []>} : vector<72x32xbf16>, vector<32x16xbf16>, vector<72x16xf32> -> vector<72x16xf32>
    %22 = arith.addf %16, %21 : vector<72x16xf32>
    %c0_21 = arith.constant 0 : index
    %c0_22 = arith.constant 0 : index
    %23 = vector.load %arg4[%c0_21, %c0_22] : memref<72x1xf32, #tpu.memory_space<vmem>>, vector<72x1xf32>
    %24 = vector.broadcast %23 : vector<72x1xf32> to vector<72x16xf32>
    %25 = arith.mulf %22, %24 : vector<72x16xf32>
    %cst_23 = arith.constant dense<0.000000e+00> : vector<16xf32>
    %26 = vector.multi_reduction <add>, %25, %cst_23 [0] : vector<72x16xf32> to vector<16xf32>
    %27 = vector.shape_cast %26 : vector<16xf32> to vector<1x16xf32>
    %cst_24 = arith.constant 1.562500e-02 : f32
    %28 = vector.broadcast %cst_24 : f32 to vector<1x16xf32>
    %29 = arith.mulf %27, %28 : vector<1x16xf32>
    %30 = arith.mulf %25, %25 : vector<72x16xf32>
    %cst_25 = arith.constant dense<0.000000e+00> : vector<16xf32>
    %31 = vector.multi_reduction <add>, %30, %cst_25 [0] : vector<72x16xf32> to vector<16xf32>
    %32 = vector.shape_cast %31 : vector<16xf32> to vector<1x16xf32>
    %cst_26 = arith.constant 1.562500e-02 : f32
    %33 = vector.broadcast %cst_26 : f32 to vector<1x16xf32>
    %34 = arith.mulf %32, %33 : vector<1x16xf32>
    %35 = arith.mulf %29, %29 : vector<1x16xf32>
    %36 = arith.subf %34, %35 : vector<1x16xf32>
    %cst_27 = arith.constant 0.000000e+00 : f32
    %37 = vector.broadcast %cst_27 : f32 to vector<1x16xf32>
    %38 = arith.maximumf %36, %37 : vector<1x16xf32>
    %39 = vector.broadcast %29 : vector<1x16xf32> to vector<72x16xf32>
    %40 = arith.subf %22, %39 : vector<72x16xf32>
    %cst_28 = arith.constant 9.99999974E-6 : f32
    %41 = vector.broadcast %cst_28 : f32 to vector<1x16xf32>
    %42 = arith.addf %38, %41 : vector<1x16xf32>
    %43 = math.rsqrt %42 : vector<1x16xf32>
    %44 = vector.broadcast %43 : vector<1x16xf32> to vector<72x16xf32>
    %45 = arith.mulf %40, %44 : vector<72x16xf32>
    %cst_29 = arith.constant 2.000000e-01 : f32
    %46 = vector.broadcast %cst_29 : f32 to vector<72x16xf32>
    %47 = arith.mulf %46, %45 : vector<72x16xf32>
    %48 = arith.maximumf %45, %47 : vector<72x16xf32>
    %49 = arith.truncf %48 : vector<72x16xf32> to vector<72x16xbf16>
    %c0_30 = arith.constant 0 : index
    %c0_31 = arith.constant 0 : index
    %c0_32 = arith.constant 0 : index
    %50 = vector.load %arg5[%c0_30, %c0_31, %c0_32] : memref<1x72x16xbf16, #tpu.memory_space<vmem>>, vector<1x72x16xbf16>
    %51 = vector.shape_cast %50 : vector<1x72x16xbf16> to vector<72x16xbf16>
    %52 = vector.shape_cast %49 : vector<72x16xbf16> to vector<1x72x16xbf16>
    tpu.vector_store %arg5[%c0_30, %c0_31, %c0_32], %52 {strides = array<i32>} : memref<1x72x16xbf16, #tpu.memory_space<vmem>>, vector<1x72x16xbf16>,
    return
  }
  func.func @transform_0(%arg0: i32, %arg1: i32) -> (i32, i32, i32) {
    %c0_i32 = arith.constant 0 : i32
    %c0_i32_0 = arith.constant 0 : i32
    %c0_i32_1 = arith.constant 0 : i32
    return %arg0, %c0_i32, %c0_i32_0 : i32, i32, i32
  }
  func.func @transform_1(%arg0: i32, %arg1: i32) -> (i32, i32, i32) {
    %c0_i32 = arith.constant 0 : i32
    %c0_i32_0 = arith.constant 0 : i32
    %c0_i32_1 = arith.constant 0 : i32
    return %c0_i32, %c0_i32_0, %arg1 : i32, i32, i32
  }
  func.func @transform_2(%arg0: i32, %arg1: i32) -> (i32, i32) {
    %c0_i32 = arith.constant 0 : i32
    %c0_i32_0 = arith.constant 0 : i32
    %c0_i32_1 = arith.constant 0 : i32
    return %c0_i32, %c0_i32_0 : i32, i32
  }
  func.func @transform_3(%arg0: i32, %arg1: i32) -> (i32, i32, i32) {
    %c0_i32 = arith.constant 0 : i32
    %c0_i32_0 = arith.constant 0 : i32
    return %arg0, %c0_i32, %arg1 : i32, i32, i32
  }
}

module attributes {stable_mosaic.version = 11 : i64} {
  func.func @_fused_conv_kernel(%arg0: i32, %arg1: i32, %arg2: memref<1x32x64xbf16, #tpu.memory_space<vmem>>, %arg3: memref<4x64x32xbf16, #tpu.memory_space<vmem>>, %arg4: memref<20x1xf32, #tpu.memory_space<vmem>>, %arg5: memref<1x20x32xbf16, #tpu.memory_space<vmem>>) attributes {dimension_semantics = [#tpu.dimension_semantics<parallel>, #tpu.dimension_semantics<parallel>], iteration_bounds = array<i64: 2, 1>, scalar_prefetch = 0 : i64, scratch_operands = 0 : i64, tpu.core_type = #tpu.core_type<tc>, window_params = [{transform_indices = @transform_0, window_bounds = array<i64: 1, 32, 64>}, {transform_indices = @transform_1, window_bounds = array<i64: 4, 64, 32>}, {pipeline_mode = #tpu.pipeline_mode<synchronous>, transform_indices = @transform_2, window_bounds = array<i64: 20, 1>}, {transform_indices = @transform_3, window_bounds = array<i64: 1, 20, 32>}]} {
    %c0 = arith.constant 0 : index
    %c0_0 = arith.constant 0 : index
    %c0_1 = arith.constant 0 : index
    %0 = vector.load %arg2[%c0, %c0_0, %c0_1] : memref<1x32x64xbf16, #tpu.memory_space<vmem>>, vector<1x20x64xbf16>
    %1 = vector.shape_cast %0 : vector<1x20x64xbf16> to vector<20x64xbf16>
    %c0_2 = arith.constant 0 : index
    %c0_3 = arith.constant 0 : index
    %c0_4 = arith.constant 0 : index
    %2 = vector.load %arg3[%c0_2, %c0_3, %c0_4] : memref<4x64x32xbf16, #tpu.memory_space<vmem>>, vector<1x64x32xbf16>
    %3 = vector.shape_cast %2 : vector<1x64x32xbf16> to vector<64x32xbf16>
    %cst = arith.constant dense<0.000000e+00> : vector<20x32xf32>
    %4 = tpu.matmul %1, %3, %cst {dimension_numbers = #tpu.dot_dimension_numbers<[1], [0], [0], [1], [0, 0, 1, 1], [], []>} : vector<20x64xbf16>, vector<64x32xbf16>, vector<20x32xf32> -> vector<20x32xf32>
    %c0_5 = arith.constant 0 : index
    %c1 = arith.constant 1 : index
    %c0_6 = arith.constant 0 : index
    %5 = vector.load %arg2[%c0_5, %c1, %c0_6] : memref<1x32x64xbf16, #tpu.memory_space<vmem>>, vector<1x20x64xbf16>
    %6 = vector.shape_cast %5 : vector<1x20x64xbf16> to vector<20x64xbf16>
    %c1_7 = arith.constant 1 : index
    %c0_8 = arith.constant 0 : index
    %c0_9 = arith.constant 0 : index
    %7 = vector.load %arg3[%c1_7, %c0_8, %c0_9] : memref<4x64x32xbf16, #tpu.memory_space<vmem>>, vector<1x64x32xbf16>
    %8 = vector.shape_cast %7 : vector<1x64x32xbf16> to vector<64x32xbf16>
    %cst_10 = arith.constant dense<0.000000e+00> : vector<20x32xf32>
    %9 = tpu.matmul %6, %8, %cst_10 {dimension_numbers = #tpu.dot_dimension_numbers<[1], [0], [0], [1], [0, 0, 1, 1], [], []>} : vector<20x64xbf16>, vector<64x32xbf16>, vector<20x32xf32> -> vector<20x32xf32>
    %10 = arith.addf %4, %9 : vector<20x32xf32>
    %c0_11 = arith.constant 0 : index
    %c5 = arith.constant 5 : index
    %c0_12 = arith.constant 0 : index
    %11 = vector.load %arg2[%c0_11, %c5, %c0_12] : memref<1x32x64xbf16, #tpu.memory_space<vmem>>, vector<1x20x64xbf16>
    %12 = vector.shape_cast %11 : vector<1x20x64xbf16> to vector<20x64xbf16>
    %c2 = arith.constant 2 : index
    %c0_13 = arith.constant 0 : index
    %c0_14 = arith.constant 0 : index
    %13 = vector.load %arg3[%c2, %c0_13, %c0_14] : memref<4x64x32xbf16, #tpu.memory_space<vmem>>, vector<1x64x32xbf16>
    %14 = vector.shape_cast %13 : vector<1x64x32xbf16> to vector<64x32xbf16>
    %cst_15 = arith.constant dense<0.000000e+00> : vector<20x32xf32>
    %15 = tpu.matmul %12, %14, %cst_15 {dimension_numbers = #tpu.dot_dimension_numbers<[1], [0], [0], [1], [0, 0, 1, 1], [], []>} : vector<20x64xbf16>, vector<64x32xbf16>, vector<20x32xf32> -> vector<20x32xf32>
    %16 = arith.addf %10, %15 : vector<20x32xf32>
    %c0_16 = arith.constant 0 : index
    %c6 = arith.constant 6 : index
    %c0_17 = arith.constant 0 : index
    %17 = vector.load %arg2[%c0_16, %c6, %c0_17] : memref<1x32x64xbf16, #tpu.memory_space<vmem>>, vector<1x20x64xbf16>
    %18 = vector.shape_cast %17 : vector<1x20x64xbf16> to vector<20x64xbf16>
    %c3 = arith.constant 3 : index
    %c0_18 = arith.constant 0 : index
    %c0_19 = arith.constant 0 : index
    %19 = vector.load %arg3[%c3, %c0_18, %c0_19] : memref<4x64x32xbf16, #tpu.memory_space<vmem>>, vector<1x64x32xbf16>
    %20 = vector.shape_cast %19 : vector<1x64x32xbf16> to vector<64x32xbf16>
    %cst_20 = arith.constant dense<0.000000e+00> : vector<20x32xf32>
    %21 = tpu.matmul %18, %20, %cst_20 {dimension_numbers = #tpu.dot_dimension_numbers<[1], [0], [0], [1], [0, 0, 1, 1], [], []>} : vector<20x64xbf16>, vector<64x32xbf16>, vector<20x32xf32> -> vector<20x32xf32>
    %22 = arith.addf %16, %21 : vector<20x32xf32>
    %c0_21 = arith.constant 0 : index
    %c0_22 = arith.constant 0 : index
    %23 = vector.load %arg4[%c0_21, %c0_22] : memref<20x1xf32, #tpu.memory_space<vmem>>, vector<20x1xf32>
    %24 = vector.broadcast %23 : vector<20x1xf32> to vector<20x32xf32>
    %25 = arith.mulf %22, %24 : vector<20x32xf32>
    %cst_23 = arith.constant dense<0.000000e+00> : vector<32xf32>
    %26 = vector.multi_reduction <add>, %25, %cst_23 [0] : vector<20x32xf32> to vector<32xf32>
    %27 = vector.shape_cast %26 : vector<32xf32> to vector<1x32xf32>
    %cst_24 = arith.constant 6.250000e-02 : f32
    %28 = vector.broadcast %cst_24 : f32 to vector<1x32xf32>
    %29 = arith.mulf %27, %28 : vector<1x32xf32>
    %30 = arith.mulf %25, %25 : vector<20x32xf32>
    %cst_25 = arith.constant dense<0.000000e+00> : vector<32xf32>
    %31 = vector.multi_reduction <add>, %30, %cst_25 [0] : vector<20x32xf32> to vector<32xf32>
    %32 = vector.shape_cast %31 : vector<32xf32> to vector<1x32xf32>
    %cst_26 = arith.constant 6.250000e-02 : f32
    %33 = vector.broadcast %cst_26 : f32 to vector<1x32xf32>
    %34 = arith.mulf %32, %33 : vector<1x32xf32>
    %35 = arith.mulf %29, %29 : vector<1x32xf32>
    %36 = arith.subf %34, %35 : vector<1x32xf32>
    %cst_27 = arith.constant 0.000000e+00 : f32
    %37 = vector.broadcast %cst_27 : f32 to vector<1x32xf32>
    %38 = arith.maximumf %36, %37 : vector<1x32xf32>
    %39 = vector.broadcast %29 : vector<1x32xf32> to vector<20x32xf32>
    %40 = arith.subf %22, %39 : vector<20x32xf32>
    %cst_28 = arith.constant 9.99999974E-6 : f32
    %41 = vector.broadcast %cst_28 : f32 to vector<1x32xf32>
    %42 = arith.addf %38, %41 : vector<1x32xf32>
    %43 = math.rsqrt %42 : vector<1x32xf32>
    %44 = vector.broadcast %43 : vector<1x32xf32> to vector<20x32xf32>
    %45 = arith.mulf %40, %44 : vector<20x32xf32>
    %cst_29 = arith.constant 2.000000e-01 : f32
    %46 = vector.broadcast %cst_29 : f32 to vector<20x32xf32>
    %47 = arith.mulf %46, %45 : vector<20x32xf32>
    %48 = arith.maximumf %45, %47 : vector<20x32xf32>
    %49 = arith.truncf %48 : vector<20x32xf32> to vector<20x32xbf16>
    %c0_30 = arith.constant 0 : index
    %c0_31 = arith.constant 0 : index
    %c0_32 = arith.constant 0 : index
    %50 = vector.load %arg5[%c0_30, %c0_31, %c0_32] : memref<1x20x32xbf16, #tpu.memory_space<vmem>>, vector<1x20x32xbf16>
    %51 = vector.shape_cast %50 : vector<1x20x32xbf16> to vector<20x32xbf16>
    %52 = vector.shape_cast %49 : vector<20x32xbf16> to vector<1x20x32xbf16>
    tpu.vector_store %arg5[%c0_30, %c0_31, %c0_32], %52 {strides = array<i32>} : memref<1x20x32xbf16, #tpu.memory_space<vmem>>, vector<1x20x32xbf16>,
    return
  }
  func.func @transform_0(%arg0: i32, %arg1: i32) -> (i32, i32, i32) {
    %c0_i32 = arith.constant 0 : i32
    %c0_i32_0 = arith.constant 0 : i32
    %c0_i32_1 = arith.constant 0 : i32
    return %arg0, %c0_i32, %c0_i32_0 : i32, i32, i32
  }
  func.func @transform_1(%arg0: i32, %arg1: i32) -> (i32, i32, i32) {
    %c0_i32 = arith.constant 0 : i32
    %c0_i32_0 = arith.constant 0 : i32
    %c0_i32_1 = arith.constant 0 : i32
    return %c0_i32, %c0_i32_0, %arg1 : i32, i32, i32
  }
  func.func @transform_2(%arg0: i32, %arg1: i32) -> (i32, i32) {
    %c0_i32 = arith.constant 0 : i32
    %c0_i32_0 = arith.constant 0 : i32
    %c0_i32_1 = arith.constant 0 : i32
    return %c0_i32, %c0_i32_0 : i32, i32
  }
  func.func @transform_3(%arg0: i32, %arg1: i32) -> (i32, i32, i32) {
    %c0_i32 = arith.constant 0 : i32
    %c0_i32_0 = arith.constant 0 : i32
    return %arg0, %c0_i32, %arg1 : i32, i32, i32
  }
}

module attributes {stable_mosaic.version = 11 : i64} {
  func.func @_fused_conv_kernel(%arg0: i32, %arg1: i32, %arg2: memref<1x40x32xbf16, #tpu.memory_space<vmem>>, %arg3: memref<16x32x64xbf16, #tpu.memory_space<vmem>>, %arg4: memref<18x1xf32, #tpu.memory_space<vmem>>, %arg5: memref<1x18x64xbf16, #tpu.memory_space<vmem>>) attributes {dimension_semantics = [#tpu.dimension_semantics<parallel>, #tpu.dimension_semantics<parallel>], iteration_bounds = array<i64: 2, 1>, scalar_prefetch = 0 : i64, scratch_operands = 0 : i64, tpu.core_type = #tpu.core_type<tc>, window_params = [{transform_indices = @transform_0, window_bounds = array<i64: 1, 40, 32>}, {transform_indices = @transform_1, window_bounds = array<i64: 16, 32, 64>}, {pipeline_mode = #tpu.pipeline_mode<synchronous>, transform_indices = @transform_2, window_bounds = array<i64: 18, 1>}, {transform_indices = @transform_3, window_bounds = array<i64: 1, 18, 64>}]} {
    %c0 = arith.constant 0 : index
    %c0_0 = arith.constant 0 : index
    %c0_1 = arith.constant 0 : index
    %0 = vector.load %arg2[%c0, %c0_0, %c0_1] : memref<1x40x32xbf16, #tpu.memory_space<vmem>>, vector<1x18x32xbf16>
    %1 = vector.shape_cast %0 : vector<1x18x32xbf16> to vector<18x32xbf16>
    %c0_2 = arith.constant 0 : index
    %c0_3 = arith.constant 0 : index
    %c0_4 = arith.constant 0 : index
    %2 = vector.load %arg3[%c0_2, %c0_3, %c0_4] : memref<16x32x64xbf16, #tpu.memory_space<vmem>>, vector<1x32x64xbf16>
    %3 = vector.shape_cast %2 : vector<1x32x64xbf16> to vector<32x64xbf16>
    %cst = arith.constant dense<0.000000e+00> : vector<18x64xf32>
    %4 = tpu.matmul %1, %3, %cst {dimension_numbers = #tpu.dot_dimension_numbers<[1], [0], [0], [1], [0, 0, 1, 1], [], []>} : vector<18x32xbf16>, vector<32x64xbf16>, vector<18x64xf32> -> vector<18x64xf32>
    %c0_5 = arith.constant 0 : index
    %c1 = arith.constant 1 : index
    %c0_6 = arith.constant 0 : index
    %5 = vector.load %arg2[%c0_5, %c1, %c0_6] : memref<1x40x32xbf16, #tpu.memory_space<vmem>>, vector<1x18x32xbf16>
    %6 = vector.shape_cast %5 : vector<1x18x32xbf16> to vector<18x32xbf16>
    %c1_7 = arith.constant 1 : index
    %c0_8 = arith.constant 0 : index
    %c0_9 = arith.constant 0 : index
    %7 = vector.load %arg3[%c1_7, %c0_8, %c0_9] : memref<16x32x64xbf16, #tpu.memory_space<vmem>>, vector<1x32x64xbf16>
    %8 = vector.shape_cast %7 : vector<1x32x64xbf16> to vector<32x64xbf16>
    %cst_10 = arith.constant dense<0.000000e+00> : vector<18x64xf32>
    %9 = tpu.matmul %6, %8, %cst_10 {dimension_numbers = #tpu.dot_dimension_numbers<[1], [0], [0], [1], [0, 0, 1, 1], [], []>} : vector<18x32xbf16>, vector<32x64xbf16>, vector<18x64xf32> -> vector<18x64xf32>
    %10 = arith.addf %4, %9 : vector<18x64xf32>
    %c0_11 = arith.constant 0 : index
    %c2 = arith.constant 2 : index
    %c0_12 = arith.constant 0 : index
    %11 = vector.load %arg2[%c0_11, %c2, %c0_12] : memref<1x40x32xbf16, #tpu.memory_space<vmem>>, vector<1x18x32xbf16>
    %12 = vector.shape_cast %11 : vector<1x18x32xbf16> to vector<18x32xbf16>
    %c2_13 = arith.constant 2 : index
    %c0_14 = arith.constant 0 : index
    %c0_15 = arith.constant 0 : index
    %13 = vector.load %arg3[%c2_13, %c0_14, %c0_15] : memref<16x32x64xbf16, #tpu.memory_space<vmem>>, vector<1x32x64xbf16>
    %14 = vector.shape_cast %13 : vector<1x32x64xbf16> to vector<32x64xbf16>
    %cst_16 = arith.constant dense<0.000000e+00> : vector<18x64xf32>
    %15 = tpu.matmul %12, %14, %cst_16 {dimension_numbers = #tpu.dot_dimension_numbers<[1], [0], [0], [1], [0, 0, 1, 1], [], []>} : vector<18x32xbf16>, vector<32x64xbf16>, vector<18x64xf32> -> vector<18x64xf32>
    %16 = arith.addf %10, %15 : vector<18x64xf32>
    %c0_17 = arith.constant 0 : index
    %c3 = arith.constant 3 : index
    %c0_18 = arith.constant 0 : index
    %17 = vector.load %arg2[%c0_17, %c3, %c0_18] : memref<1x40x32xbf16, #tpu.memory_space<vmem>>, vector<1x18x32xbf16>
    %18 = vector.shape_cast %17 : vector<1x18x32xbf16> to vector<18x32xbf16>
    %c3_19 = arith.constant 3 : index
    %c0_20 = arith.constant 0 : index
    %c0_21 = arith.constant 0 : index
    %19 = vector.load %arg3[%c3_19, %c0_20, %c0_21] : memref<16x32x64xbf16, #tpu.memory_space<vmem>>, vector<1x32x64xbf16>
    %20 = vector.shape_cast %19 : vector<1x32x64xbf16> to vector<32x64xbf16>
    %cst_22 = arith.constant dense<0.000000e+00> : vector<18x64xf32>
    %21 = tpu.matmul %18, %20, %cst_22 {dimension_numbers = #tpu.dot_dimension_numbers<[1], [0], [0], [1], [0, 0, 1, 1], [], []>} : vector<18x32xbf16>, vector<32x64xbf16>, vector<18x64xf32> -> vector<18x64xf32>
    %22 = arith.addf %16, %21 : vector<18x64xf32>
    %c0_23 = arith.constant 0 : index
    %c6 = arith.constant 6 : index
    %c0_24 = arith.constant 0 : index
    %23 = vector.load %arg2[%c0_23, %c6, %c0_24] : memref<1x40x32xbf16, #tpu.memory_space<vmem>>, vector<1x18x32xbf16>
    %24 = vector.shape_cast %23 : vector<1x18x32xbf16> to vector<18x32xbf16>
    %c4 = arith.constant 4 : index
    %c0_25 = arith.constant 0 : index
    %c0_26 = arith.constant 0 : index
    %25 = vector.load %arg3[%c4, %c0_25, %c0_26] : memref<16x32x64xbf16, #tpu.memory_space<vmem>>, vector<1x32x64xbf16>
    %26 = vector.shape_cast %25 : vector<1x32x64xbf16> to vector<32x64xbf16>
    %cst_27 = arith.constant dense<0.000000e+00> : vector<18x64xf32>
    %27 = tpu.matmul %24, %26, %cst_27 {dimension_numbers = #tpu.dot_dimension_numbers<[1], [0], [0], [1], [0, 0, 1, 1], [], []>} : vector<18x32xbf16>, vector<32x64xbf16>, vector<18x64xf32> -> vector<18x64xf32>
    %28 = arith.addf %22, %27 : vector<18x64xf32>
    %c0_28 = arith.constant 0 : index
    %c7 = arith.constant 7 : index
    %c0_29 = arith.constant 0 : index
    %29 = vector.load %arg2[%c0_28, %c7, %c0_29] : memref<1x40x32xbf16, #tpu.memory_space<vmem>>, vector<1x18x32xbf16>
    %30 = vector.shape_cast %29 : vector<1x18x32xbf16> to vector<18x32xbf16>
    %c5 = arith.constant 5 : index
    %c0_30 = arith.constant 0 : index
    %c0_31 = arith.constant 0 : index
    %31 = vector.load %arg3[%c5, %c0_30, %c0_31] : memref<16x32x64xbf16, #tpu.memory_space<vmem>>, vector<1x32x64xbf16>
    %32 = vector.shape_cast %31 : vector<1x32x64xbf16> to vector<32x64xbf16>
    %cst_32 = arith.constant dense<0.000000e+00> : vector<18x64xf32>
    %33 = tpu.matmul %30, %32, %cst_32 {dimension_numbers = #tpu.dot_dimension_numbers<[1], [0], [0], [1], [0, 0, 1, 1], [], []>} : vector<18x32xbf16>, vector<32x64xbf16>, vector<18x64xf32> -> vector<18x64xf32>
    %34 = arith.addf %28, %33 : vector<18x64xf32>
    %c0_33 = arith.constant 0 : index
    %c8 = arith.constant 8 : index
    %c0_34 = arith.constant 0 : index
    %35 = vector.load %arg2[%c0_33, %c8, %c0_34] : memref<1x40x32xbf16, #tpu.memory_space<vmem>>, vector<1x18x32xbf16>
    %36 = vector.shape_cast %35 : vector<1x18x32xbf16> to vector<18x32xbf16>
    %c6_35 = arith.constant 6 : index
    %c0_36 = arith.constant 0 : index
    %c0_37 = arith.constant 0 : index
    %37 = vector.load %arg3[%c6_35, %c0_36, %c0_37] : memref<16x32x64xbf16, #tpu.memory_space<vmem>>, vector<1x32x64xbf16>
    %38 = vector.shape_cast %37 : vector<1x32x64xbf16> to vector<32x64xbf16>
    %cst_38 = arith.constant dense<0.000000e+00> : vector<18x64xf32>
    %39 = tpu.matmul %36, %38, %cst_38 {dimension_numbers = #tpu.dot_dimension_numbers<[1], [0], [0], [1], [0, 0, 1, 1], [], []>} : vector<18x32xbf16>, vector<32x64xbf16>, vector<18x64xf32> -> vector<18x64xf32>
    %40 = arith.addf %34, %39 : vector<18x64xf32>
    %c0_39 = arith.constant 0 : index
    %c9 = arith.constant 9 : index
    %c0_40 = arith.constant 0 : index
    %41 = vector.load %arg2[%c0_39, %c9, %c0_40] : memref<1x40x32xbf16, #tpu.memory_space<vmem>>, vector<1x18x32xbf16>
    %42 = vector.shape_cast %41 : vector<1x18x32xbf16> to vector<18x32xbf16>
    %c7_41 = arith.constant 7 : index
    %c0_42 = arith.constant 0 : index
    %c0_43 = arith.constant 0 : index
    %43 = vector.load %arg3[%c7_41, %c0_42, %c0_43] : memref<16x32x64xbf16, #tpu.memory_space<vmem>>, vector<1x32x64xbf16>
    %44 = vector.shape_cast %43 : vector<1x32x64xbf16> to vector<32x64xbf16>
    %cst_44 = arith.constant dense<0.000000e+00> : vector<18x64xf32>
    %45 = tpu.matmul %42, %44, %cst_44 {dimension_numbers = #tpu.dot_dimension_numbers<[1], [0], [0], [1], [0, 0, 1, 1], [], []>} : vector<18x32xbf16>, vector<32x64xbf16>, vector<18x64xf32> -> vector<18x64xf32>
    %46 = arith.addf %40, %45 : vector<18x64xf32>
    %c0_45 = arith.constant 0 : index
    %c12 = arith.constant 12 : index
    %c0_46 = arith.constant 0 : index
    %47 = vector.load %arg2[%c0_45, %c12, %c0_46] : memref<1x40x32xbf16, #tpu.memory_space<vmem>>, vector<1x18x32xbf16>
    %48 = vector.shape_cast %47 : vector<1x18x32xbf16> to vector<18x32xbf16>
    %c8_47 = arith.constant 8 : index
    %c0_48 = arith.constant 0 : index
    %c0_49 = arith.constant 0 : index
    %49 = vector.load %arg3[%c8_47, %c0_48, %c0_49] : memref<16x32x64xbf16, #tpu.memory_space<vmem>>, vector<1x32x64xbf16>
    %50 = vector.shape_cast %49 : vector<1x32x64xbf16> to vector<32x64xbf16>
    %cst_50 = arith.constant dense<0.000000e+00> : vector<18x64xf32>
    %51 = tpu.matmul %48, %50, %cst_50 {dimension_numbers = #tpu.dot_dimension_numbers<[1], [0], [0], [1], [0, 0, 1, 1], [], []>} : vector<18x32xbf16>, vector<32x64xbf16>, vector<18x64xf32> -> vector<18x64xf32>
    %52 = arith.addf %46, %51 : vector<18x64xf32>
    %c0_51 = arith.constant 0 : index
    %c13 = arith.constant 13 : index
    %c0_52 = arith.constant 0 : index
    %53 = vector.load %arg2[%c0_51, %c13, %c0_52] : memref<1x40x32xbf16, #tpu.memory_space<vmem>>, vector<1x18x32xbf16>
    %54 = vector.shape_cast %53 : vector<1x18x32xbf16> to vector<18x32xbf16>
    %c9_53 = arith.constant 9 : index
    %c0_54 = arith.constant 0 : index
    %c0_55 = arith.constant 0 : index
    %55 = vector.load %arg3[%c9_53, %c0_54, %c0_55] : memref<16x32x64xbf16, #tpu.memory_space<vmem>>, vector<1x32x64xbf16>
    %56 = vector.shape_cast %55 : vector<1x32x64xbf16> to vector<32x64xbf16>
    %cst_56 = arith.constant dense<0.000000e+00> : vector<18x64xf32>
    %57 = tpu.matmul %54, %56, %cst_56 {dimension_numbers = #tpu.dot_dimension_numbers<[1], [0], [0], [1], [0, 0, 1, 1], [], []>} : vector<18x32xbf16>, vector<32x64xbf16>, vector<18x64xf32> -> vector<18x64xf32>
    %58 = arith.addf %52, %57 : vector<18x64xf32>
    %c0_57 = arith.constant 0 : index
    %c14 = arith.constant 14 : index
    %c0_58 = arith.constant 0 : index
    %59 = vector.load %arg2[%c0_57, %c14, %c0_58] : memref<1x40x32xbf16, #tpu.memory_space<vmem>>, vector<1x18x32xbf16>
    %60 = vector.shape_cast %59 : vector<1x18x32xbf16> to vector<18x32xbf16>
    %c10 = arith.constant 10 : index
    %c0_59 = arith.constant 0 : index
    %c0_60 = arith.constant 0 : index
    %61 = vector.load %arg3[%c10, %c0_59, %c0_60] : memref<16x32x64xbf16, #tpu.memory_space<vmem>>, vector<1x32x64xbf16>
    %62 = vector.shape_cast %61 : vector<1x32x64xbf16> to vector<32x64xbf16>
    %cst_61 = arith.constant dense<0.000000e+00> : vector<18x64xf32>
    %63 = tpu.matmul %60, %62, %cst_61 {dimension_numbers = #tpu.dot_dimension_numbers<[1], [0], [0], [1], [0, 0, 1, 1], [], []>} : vector<18x32xbf16>, vector<32x64xbf16>, vector<18x64xf32> -> vector<18x64xf32>
    %64 = arith.addf %58, %63 : vector<18x64xf32>
    %c0_62 = arith.constant 0 : index
    %c15 = arith.constant 15 : index
    %c0_63 = arith.constant 0 : index
    %65 = vector.load %arg2[%c0_62, %c15, %c0_63] : memref<1x40x32xbf16, #tpu.memory_space<vmem>>, vector<1x18x32xbf16>
    %66 = vector.shape_cast %65 : vector<1x18x32xbf16> to vector<18x32xbf16>
    %c11 = arith.constant 11 : index
    %c0_64 = arith.constant 0 : index
    %c0_65 = arith.constant 0 : index
    %67 = vector.load %arg3[%c11, %c0_64, %c0_65] : memref<16x32x64xbf16, #tpu.memory_space<vmem>>, vector<1x32x64xbf16>
    %68 = vector.shape_cast %67 : vector<1x32x64xbf16> to vector<32x64xbf16>
    %cst_66 = arith.constant dense<0.000000e+00> : vector<18x64xf32>
    %69 = tpu.matmul %66, %68, %cst_66 {dimension_numbers = #tpu.dot_dimension_numbers<[1], [0], [0], [1], [0, 0, 1, 1], [], []>} : vector<18x32xbf16>, vector<32x64xbf16>, vector<18x64xf32> -> vector<18x64xf32>
    %70 = arith.addf %64, %69 : vector<18x64xf32>
    %c0_67 = arith.constant 0 : index
    %c18 = arith.constant 18 : index
    %c0_68 = arith.constant 0 : index
    %71 = vector.load %arg2[%c0_67, %c18, %c0_68] : memref<1x40x32xbf16, #tpu.memory_space<vmem>>, vector<1x18x32xbf16>
    %72 = vector.shape_cast %71 : vector<1x18x32xbf16> to vector<18x32xbf16>
    %c12_69 = arith.constant 12 : index
    %c0_70 = arith.constant 0 : index
    %c0_71 = arith.constant 0 : index
    %73 = vector.load %arg3[%c12_69, %c0_70, %c0_71] : memref<16x32x64xbf16, #tpu.memory_space<vmem>>, vector<1x32x64xbf16>
    %74 = vector.shape_cast %73 : vector<1x32x64xbf16> to vector<32x64xbf16>
    %cst_72 = arith.constant dense<0.000000e+00> : vector<18x64xf32>
    %75 = tpu.matmul %72, %74, %cst_72 {dimension_numbers = #tpu.dot_dimension_numbers<[1], [0], [0], [1], [0, 0, 1, 1], [], []>} : vector<18x32xbf16>, vector<32x64xbf16>, vector<18x64xf32> -> vector<18x64xf32>
    %76 = arith.addf %70, %75 : vector<18x64xf32>
    %c0_73 = arith.constant 0 : index
    %c19 = arith.constant 19 : index
    %c0_74 = arith.constant 0 : index
    %77 = vector.load %arg2[%c0_73, %c19, %c0_74] : memref<1x40x32xbf16, #tpu.memory_space<vmem>>, vector<1x18x32xbf16>
    %78 = vector.shape_cast %77 : vector<1x18x32xbf16> to vector<18x32xbf16>
    %c13_75 = arith.constant 13 : index
    %c0_76 = arith.constant 0 : index
    %c0_77 = arith.constant 0 : index
    %79 = vector.load %arg3[%c13_75, %c0_76, %c0_77] : memref<16x32x64xbf16, #tpu.memory_space<vmem>>, vector<1x32x64xbf16>
    %80 = vector.shape_cast %79 : vector<1x32x64xbf16> to vector<32x64xbf16>
    %cst_78 = arith.constant dense<0.000000e+00> : vector<18x64xf32>
    %81 = tpu.matmul %78, %80, %cst_78 {dimension_numbers = #tpu.dot_dimension_numbers<[1], [0], [0], [1], [0, 0, 1, 1], [], []>} : vector<18x32xbf16>, vector<32x64xbf16>, vector<18x64xf32> -> vector<18x64xf32>
    %82 = arith.addf %76, %81 : vector<18x64xf32>
    %c0_79 = arith.constant 0 : index
    %c20 = arith.constant 20 : index
    %c0_80 = arith.constant 0 : index
    %83 = vector.load %arg2[%c0_79, %c20, %c0_80] : memref<1x40x32xbf16, #tpu.memory_space<vmem>>, vector<1x18x32xbf16>
    %84 = vector.shape_cast %83 : vector<1x18x32xbf16> to vector<18x32xbf16>
    %c14_81 = arith.constant 14 : index
    %c0_82 = arith.constant 0 : index
    %c0_83 = arith.constant 0 : index
    %85 = vector.load %arg3[%c14_81, %c0_82, %c0_83] : memref<16x32x64xbf16, #tpu.memory_space<vmem>>, vector<1x32x64xbf16>
    %86 = vector.shape_cast %85 : vector<1x32x64xbf16> to vector<32x64xbf16>
    %cst_84 = arith.constant dense<0.000000e+00> : vector<18x64xf32>
    %87 = tpu.matmul %84, %86, %cst_84 {dimension_numbers = #tpu.dot_dimension_numbers<[1], [0], [0], [1], [0, 0, 1, 1], [], []>} : vector<18x32xbf16>, vector<32x64xbf16>, vector<18x64xf32> -> vector<18x64xf32>
    %88 = arith.addf %82, %87 : vector<18x64xf32>
    %c0_85 = arith.constant 0 : index
    %c21 = arith.constant 21 : index
    %c0_86 = arith.constant 0 : index
    %89 = vector.load %arg2[%c0_85, %c21, %c0_86] : memref<1x40x32xbf16, #tpu.memory_space<vmem>>, vector<1x18x32xbf16>
    %90 = vector.shape_cast %89 : vector<1x18x32xbf16> to vector<18x32xbf16>
    %c15_87 = arith.constant 15 : index
    %c0_88 = arith.constant 0 : index
    %c0_89 = arith.constant 0 : index
    %91 = vector.load %arg3[%c15_87, %c0_88, %c0_89] : memref<16x32x64xbf16, #tpu.memory_space<vmem>>, vector<1x32x64xbf16>
    %92 = vector.shape_cast %91 : vector<1x32x64xbf16> to vector<32x64xbf16>
    %cst_90 = arith.constant dense<0.000000e+00> : vector<18x64xf32>
    %93 = tpu.matmul %90, %92, %cst_90 {dimension_numbers = #tpu.dot_dimension_numbers<[1], [0], [0], [1], [0, 0, 1, 1], [], []>} : vector<18x32xbf16>, vector<32x64xbf16>, vector<18x64xf32> -> vector<18x64xf32>
    %94 = arith.addf %88, %93 : vector<18x64xf32>
    %c0_91 = arith.constant 0 : index
    %c0_92 = arith.constant 0 : index
    %95 = vector.load %arg4[%c0_91, %c0_92] : memref<18x1xf32, #tpu.memory_space<vmem>>, vector<18x1xf32>
    %96 = vector.broadcast %95 : vector<18x1xf32> to vector<18x64xf32>
    %97 = arith.mulf %94, %96 : vector<18x64xf32>
    %cst_93 = arith.constant dense<0.000000e+00> : vector<64xf32>
    %98 = vector.multi_reduction <add>, %97, %cst_93 [0] : vector<18x64xf32> to vector<64xf32>
    %99 = vector.shape_cast %98 : vector<64xf32> to vector<1x64xf32>
    %cst_94 = arith.constant 0.111111112 : f32
    %100 = vector.broadcast %cst_94 : f32 to vector<1x64xf32>
    %101 = arith.mulf %99, %100 : vector<1x64xf32>
    %102 = arith.mulf %97, %97 : vector<18x64xf32>
    %cst_95 = arith.constant dense<0.000000e+00> : vector<64xf32>
    %103 = vector.multi_reduction <add>, %102, %cst_95 [0] : vector<18x64xf32> to vector<64xf32>
    %104 = vector.shape_cast %103 : vector<64xf32> to vector<1x64xf32>
    %cst_96 = arith.constant 0.111111112 : f32
    %105 = vector.broadcast %cst_96 : f32 to vector<1x64xf32>
    %106 = arith.mulf %104, %105 : vector<1x64xf32>
    %107 = arith.mulf %101, %101 : vector<1x64xf32>
    %108 = arith.subf %106, %107 : vector<1x64xf32>
    %cst_97 = arith.constant 0.000000e+00 : f32
    %109 = vector.broadcast %cst_97 : f32 to vector<1x64xf32>
    %110 = arith.maximumf %108, %109 : vector<1x64xf32>
    %111 = vector.broadcast %101 : vector<1x64xf32> to vector<18x64xf32>
    %112 = arith.subf %94, %111 : vector<18x64xf32>
    %cst_98 = arith.constant 9.99999974E-6 : f32
    %113 = vector.broadcast %cst_98 : f32 to vector<1x64xf32>
    %114 = arith.addf %110, %113 : vector<1x64xf32>
    %115 = math.rsqrt %114 : vector<1x64xf32>
    %116 = vector.broadcast %115 : vector<1x64xf32> to vector<18x64xf32>
    %117 = arith.mulf %112, %116 : vector<18x64xf32>
    %cst_99 = arith.constant 2.000000e-01 : f32
    %118 = vector.broadcast %cst_99 : f32 to vector<18x64xf32>
    %119 = arith.mulf %118, %117 : vector<18x64xf32>
    %120 = arith.maximumf %117, %119 : vector<18x64xf32>
    %121 = arith.truncf %120 : vector<18x64xf32> to vector<18x64xbf16>
    %c0_100 = arith.constant 0 : index
    %c0_101 = arith.constant 0 : index
    %c0_102 = arith.constant 0 : index
    %122 = vector.load %arg5[%c0_100, %c0_101, %c0_102] : memref<1x18x64xbf16, #tpu.memory_space<vmem>>, vector<1x18x64xbf16>
    %123 = vector.shape_cast %122 : vector<1x18x64xbf16> to vector<18x64xbf16>
    %124 = vector.shape_cast %121 : vector<18x64xbf16> to vector<1x18x64xbf16>
    tpu.vector_store %arg5[%c0_100, %c0_101, %c0_102], %124 {strides = array<i32>} : memref<1x18x64xbf16, #tpu.memory_space<vmem>>, vector<1x18x64xbf16>,
    return
  }
  func.func @transform_0(%arg0: i32, %arg1: i32) -> (i32, i32, i32) {
    %c0_i32 = arith.constant 0 : i32
    %c0_i32_0 = arith.constant 0 : i32
    %c0_i32_1 = arith.constant 0 : i32
    return %arg0, %c0_i32, %c0_i32_0 : i32, i32, i32
  }
  func.func @transform_1(%arg0: i32, %arg1: i32) -> (i32, i32, i32) {
    %c0_i32 = arith.constant 0 : i32
    %c0_i32_0 = arith.constant 0 : i32
    %c0_i32_1 = arith.constant 0 : i32
    return %c0_i32, %c0_i32_0, %arg1 : i32, i32, i32
  }
  func.func @transform_2(%arg0: i32, %arg1: i32) -> (i32, i32) {
    %c0_i32 = arith.constant 0 : i32
    %c0_i32_0 = arith.constant 0 : i32
    %c0_i32_1 = arith.constant 0 : i32
    return %c0_i32, %c0_i32_0 : i32, i32
  }
  func.func @transform_3(%arg0: i32, %arg1: i32) -> (i32, i32, i32) {
    %c0_i32 = arith.constant 0 : i32
    %c0_i32_0 = arith.constant 0 : i32
    return %arg0, %c0_i32, %arg1 : i32, i32, i32
  }
}

</mosaic_0001>

<bundles_post_ra>
// kernel: _lambda_.4
= control target key start
LH: loop header
LB: loop body
LE: loop exit
PB: predicated region body
PF: predicated region fallthrough
CT: control target
= control target key end

     0   :  { %8 = vsyncpa [#allocation3], 0  ;;  %s3831_s0 = inlined_call_operand.hbm [shape: bf16[2,296,16], index: 0, kind: input, shape index: {}]   ;;  %s3832_s1 = inlined_call_operand.hbm [shape: bf16[4,16,8], index: 1, kind: input, shape index: {}]   ;;  %s3833_s2 = inlined_call_operand.hbm [shape: f32[1,8], index: 2, kind: input, shape index: {}]   ;;  %s3834_s3 = inlined_call_operand.hbm [shape: bf16[2,272,8], index: 3, kind: output, shape index: {}]  }
   0x1   :  { %10 = vsyncpa [#allocation3 + $0x1], 0 }
   0x2   :  { %11 = vsyncpa [#allocation6], 0 }
   0x3   :  { %12 = vsyncpa [#allocation4], 0 }
   0x4   :  { %14 = vsyncpa [#allocation4 + $0x1], 0  ;;  %s3062_s12 = smov 0   ;;  %s3064_s13 = smov 0  }
   0x5   :  { %s3066_s14 = smov 0   ;;  %s3068_s15 = smov 0  }
   0x6   :  { %s3070_s16 = smov 0   ;;  %s3072_s17 = smov 0  }
   0x7 LB: > { %s2180_s18 = sadd.s32 4294967295, %s3030_s17   ;;  %s2181_s19 = sadd.s32 4294967294, %s3030_s17   ;;  %s3030_s17 = sphi %s3072_s17, %s20_s17   ;;  %s3026_s16 = sphi %s3070_s16, %s3856_s16   ;;  %s3022_s15 = sphi %s3068_s15, %s3855_s15   ;;  %s3018_s14 = sphi %s3066_s14, %s3854_s14   ;;  %s3014_s13 = sphi %s3064_s13, %s3853_s13   ;;  %s3010_s12 = sphi %s3062_s12, %s3852_s12  }
   0x8   : > { %p52_p0 = scmp.ne.s32.totalorder %s3014_s13, %s3010_s12  ;;  %p3096_p1 = scmp.eq.s32.totalorder %s2180_s18, 0 }
   0x9   : > { %p3100_p2 = scmp.eq.s32.totalorder %s2180_s18, 1  ;;  %p136_p3 = scmp.eq.s32.totalorder %s2181_s19, 1 }
   0xa   : > { %s3839_s20 = scalar_select %p3096_p1, 1, 0 }
   0xb   : > { %p3106_p4 = por %p3096_p1, %p52_p0  ;;  %p2182_p5 = scmp.ge.s32.totalorder %s3030_s17, 1 }
   0xc   : > { %p3111_p6 = por %p136_p3, %p52_p0  ;;  %p143_p7 = scmp.lt.s32.totalorder %s3030_s17, 3 }
   0xd   : > { %s3841_s22 = scalar_select %p3106_p4, 1, 0 }
   0xe   : > { %s3842_s23 = scalar_select %p3111_p6, 1, 0 }
   0xf   : > { %p3116_p8 = pnand %p2182_p5, %p143_p7  ;;  %s3032_s25 = smov [#allocation5]  }
  0x10   : > { %s157_s26 = sshll.u32 %s3032_s25, 4  ;;  %s3033_s28 = smov [#allocation7]   ;;  %s3120_s26 = int_to_ptr.vmem [resolvable:$true] %s157_s26 }
  0x11   : > { %p2740_p9 = pneg %p3116_p8  ;;  %s173_s29 = sshll.u32 %s3033_s28, 4  ;;  %s3131_s29 = int_to_ptr.vmem [resolvable:$true] %s173_s29 }
  0x12   : > { %s2858_s5 = scalar_lea.hbm %s3832_s1, 512 }
  0x13   : > { %p3127_p11 = pnand %p2740_p9, %p3096_p1  ;;  %p2859_p12 = scmp.ne.s32.totalorder %s3832_s1, %s2858_s5 }
  0x14   : > { %p2865_p5 = scmp.lt.u32.totalorder %s2858_s5, %s3832_s1 }
  0x15   : > { %p2860_p13 = pneg %p3127_p11 }
  0x17   : > { %p2861_p0 = pnand %p2860_p13, %p2859_p12 }
  0x19   : > { %p2862_p3 = pneg %p2861_p0 }
  0x1b   : > { %p2867_p7 = pnand %p2865_p5, %p2862_p3 }
  0x1d   : > { %2870 = shalt.err (!%p2867_p7)
}
  0x1e   : > { %s2871_s10 = scalar_lea.vmem %s3120_s26, 512  ;;  %p2879_p1 = scmp.lt.s32.totalorder %s3120_s26, %s3120_s26 }
  0x1f   : > { %p2872_p9 = scmp.ne.s32.totalorder %s3120_s26, %s2871_s10  ;;  %p2880_p12 = scmp.lt.s32.totalorder %s2871_s10, %s2871_s10 }
  0x21   : > { %p2874_p10 = pnand %p2872_p9, %p2860_p13  ;;  %p2881_p0 = por %p2880_p12, %p2879_p1 }
  0x23   : > { %p2875_p6 = pneg %p2874_p10 }
  0x25   : > { %p2882_p4 = pnand %p2881_p0, %p2875_p6 }
  0x27   : > { %2885 = shalt.err (!%p2882_p4)
}
  0x28   : > { %s3034_s11 = smov 64   ;;  %s3035_s18 = smov 4  }
  0x29   : > { %2743 = dma.hbm_to_vmem [thread:$0]  (!%p3127_p11), %s3832_s1, 512, %s3120_s26, [#allocation6], %s3034_s11, %s3034_s11, %s3035_s18  }
  0x2a   : > { %s2886_s4 = scalar_lea.hbm %s3833_s2, 16 }
  0x2b   : > { %p2887_p1 = scmp.ne.s32.totalorder %s3833_s2, %s2886_s4  ;;  %p2893_p10 = scmp.lt.u32.totalorder %s2886_s4, %s3833_s2 }
  0x2d   : > { %p2889_p4 = pnand %p2887_p1, %p2860_p13 }
  0x2f   : > { %p2890_p6 = pneg %p2889_p4 }
  0x31   : > { %p2895_p3 = pnand %p2893_p10, %p2890_p6 }
  0x33   : > { %2898 = shalt.err (!%p2895_p3)
}
  0x34   : > { %s2899_s26 = scalar_lea.vmem %s3131_s29, 16  ;;  %s2906_s9 = scalar_lea.vmem %s3131_s29, 32 }
  0x35   : > { %p2900_p5 = scmp.ne.s32.totalorder %s3131_s29, %s2899_s26  ;;  %p2907_p12 = scmp.lt.s32.totalorder %s3131_s29, %s3131_s29 }
  0x36   : > { %p2908_p0 = scmp.lt.s32.totalorder %s2906_s9, %s2899_s26 }
  0x37   : > { %p2902_p7 = pnand %p2900_p5, %p2860_p13 }
  0x38   : > { %p2909_p1 = por %p2908_p0, %p2907_p12 }
  0x39   : > { %p2903_p9 = pneg %p2902_p7 }
  0x3b   : > { %p2910_p4 = pnand %p2909_p1, %p2903_p9 }
  0x3d   : > { %2913 = shalt.err (!%p2910_p4)
}
  0x3e   : > { %2746 = dma.hbm_to_vmem [thread:$0]  (!%p3127_p11), %s3833_s2, 16, %s3131_s29, [#allocation6]  }
  0x3f   : > { %s32_s25 = sadd.s32 1, %s3026_s16  ;;  %s39_s28 = sadd.s32 1, %s3018_s14 }
  0x40   : > { %p34_p13 = scmp.ge.s32.totalorder %s32_s25, 2  ;;  %p46_p6 = scmp.ne.s32.totalorder %s3018_s14, %s3014_s13 }
  0x41   : > { %p47_p10 = scmp.eq.s32.totalorder %s3030_s17, 0  ;;  %p2757_p3 = scmp.lt.s32.totalorder %s3030_s17, 2 }
  0x42   : > { %s3858_s25 = smov (%p34_p13, %s32_s25), 0  ;;  %p3199_p7 = por %p3100_p2, %p46_p6 }
  0x43   : > { %p48_p5 = por %p47_p10, %p46_p6  ;;  %s36_s30 = ssub.s32 %s3026_s16, %s3858_s25 }
  0x44   : > { %s3845_s27 = scalar_select %p3199_p7, 1, 0 }
  0x45   : > { %s184_s4 = sand.u32 1, %s3018_s14   ;;  %p37_p9 = scmp.eq.s32.totalorder %s36_s30, 0 }
  0x46   : > { %s2723_s29 = smul.u32 148, %s184_s4  ;;  %p3206_p11 = pnand %p2757_p3, %p48_p5 }
  0x47   : > { %s3211_s6 = scalar_select %p37_p9, %s3018_s14, %s39_s28  }
  0x48   : > { %s2724_s7 = smul.u32 2368, %s3026_s16  ;;  %s188_s8 = scalar_lea.vmem [#allocation2], %s2723_s29 }
  0x49   : > { %s195_s26 = sshll.u32 %s188_s8, 4  ;;  %s3221_s19 = scalar_lea.sflag [#allocation3], %s184_s4  ;;  %s3219_s26 = int_to_ptr.vmem [resolvable:$true] %s195_s26 }
  0x4a   : > { %s3217_s10 = scalar_lea.hbm %s3831_s0, %s2724_s7  ;;  %p2916_p12 = pneg %p3206_p11 }
  0x4b   : > { %s2914_s30 = scalar_lea.hbm %s3217_s10, 2368  ;;  %s2919_s7 = scalar_lea.hbm %s3831_s0, 4736 }
  0x4c   : > { %p2915_p2 = scmp.ne.s32.totalorder %s3217_s10, %s2914_s30  ;;  %p2920_p4 = scmp.lt.u32.totalorder %s3217_s10, %s3831_s0 }
  0x4d   : > { %p2921_p13 = scmp.lt.u32.totalorder %s2919_s7, %s2914_s30  ;;  %p2923_p10 = scmp.lt.u32.totalorder %s2914_s30, %s3217_s10 }
  0x4e   : > { %p2917_p0 = pnand %p2916_p12, %p2915_p2 }
  0x4f   : > { %p2922_p6 = por %p2921_p13, %p2920_p4 }
  0x50   : > { %p2918_p1 = pneg %p2917_p0 }
  0x51   : > { %p2924_p3 = por %p2923_p10, %p2922_p6 }
  0x53   : > { %p2925_p5 = pnand %p2924_p3, %p2918_p1 }
  0x55   : > { %2928 = shalt.err (!%p2925_p5)
}
  0x56   : > { %s2929_s4 = scalar_lea.vmem %s3219_s26, 2368  ;;  %s3036_s9 = smov [#allocation2]  }
  0x57   : > { %p2930_p9 = scmp.ne.s32.totalorder %s3219_s26, %s2929_s4  ;;  %s2934_s28 = sshll.u32 %s3036_s9, 4  ;;  %s2935_s28 = int_to_ptr.vmem [resolvable:$false] %s2934_s28 }
  0x58   : > { %s2936_s29 = scalar_lea.vmem %s2935_s28, 4736  ;;  %p2937_p7 = scmp.lt.s32.totalorder %s3219_s26, %s2935_s28 }
  0x59   : > { %p2932_p2 = pnand %p2930_p9, %p2916_p12  ;;  %p2938_p4 = scmp.lt.s32.totalorder %s2936_s29, %s2929_s4 }
  0x5b   : > { %p2933_p0 = pneg %p2932_p2  ;;  %p2939_p13 = por %p2938_p4, %p2937_p7 }
  0x5d   : > { %p2940_p6 = pnand %p2939_p13, %p2933_p0 }
  0x5f   : > { %2943 = shalt.err (!%p2940_p6)
}
  0x60   : > { %2750 = dma.hbm_to_vmem [thread:$0]  (!%p3206_p11), %s3217_s10, 2368, %s3219_s26, %s3221_s19, %s3034_s11, %s3034_s11, %s3035_s18  }
  0x61   : > { %207 = sbr.rel (%p3116_p8) target bundleno = 623 (0x26f), region = 32  ;;  %s3255_s30 = sand.u32 (!%p3116_p8), 1, %s3014_s13  }
  0x62   : > { %s2725_s7 = smul.u32 (!%p3116_p8), 148, %s3255_s30  ;;  %s210_s8 = scalar_lea.sflag (!%p3116_p8), [#allocation3], %s3255_s30 }
  0x63   : > { %p3847_p7 = scmp.ne.s32.totalorder (!%p3116_p8), %s3841_s22, 0 }
  0x64   : > { %s3259_s21 = scalar_lea.vmem (!%p3116_p8), [#allocation2], %s2725_s7 }
  0x68   : > { %2997 = dma.done.wait (%p3847_p7), %s210_s8, 2368  }
  0x69   : > { %2999 = vsyncadd (%p3847_p7), %s210_s8, 4294964928  ;;  %p3848_p11 = scmp.ne.s32.totalorder %s3839_s20, 0 }
  0x6b   : > { %3001 = dma.done.wait (%p3848_p11), [#allocation6], 528  }
  0x6c   : > { %3003 = vsyncadd (%p3848_p11), [#allocation6], 4294966768  ;;  %v3037_v0 = vmov 0.0   ;;  %vm3038_vm0 = vmmov 0   ;;  %vm373_vm1 = vsmask.f32 7424 }
  0x6d   : > { %2443 = vmatprep.subr.bf16.mxu0 %v3037_v0  ;;  %2513 = vmatprep.subr.bf16.mxu1 %v3037_v0  ;;  %v2817_v1 = vld [vmem:[#allocation5 + $0x8] sm:$0xff]   ;;  %v2818_v2 = vld [vmem:[#allocation5] sm:$0xff]   ;;  %vm520_vm2 = vcmask 130048   ;;  %v2822_v9 = vld [vmem:[#allocation5 + $0x18] sm:$0xff]   ;;  %vm1483_vm3 = vcmask 1046528   ;;  %s2726_s20 = smul.u32 136, %s3255_s30 }
  0x6e   : > { %2515 = vmatprep.mubr.msk.bf16.mxu1 %vm3038_vm0, %v3037_v0  ;;  %2445 = vmatprep.mubr.msk.bf16.mxu0 %vm3038_vm0, %v3037_v0  ;;  %v2819_v3 = vld [vmem:[%s3259_s21] sm:$0xff]   ;;  %v2820_v4 = vld [vmem:[%s3259_s21 + $0x8] sm:$0xff]   ;;  %v2823_v12 = vld [vmem:[%s3259_s21 + $0x10] sm:$0xff]   ;;  %vm2024_vm4 = vcmask 60416   ;;  %s2727_s24 = smul.u32 2176, %s3022_s15  ;;  %s2060_s15 = scalar_lea.sflag [#allocation4], %s3255_s30 }
  0x6f   : > { %2444 = vmatpush3.bf16.msra.mxu0 %v2817_v1  ;;  %2514 = vmatpush3.bf16.msra.mxu1 %v2818_v2  ;;  %v375_v5 = vshrl.u32 %v2819_v3, 16  ;;  %v377_v6 = vshll.u32 %v2819_v3, 16  ;;  %v382_v7 = vshll.u32 %v2820_v4, 16  ;;  %v2821_v11 = vld [vmem:[#allocation5 + $0x10] sm:$0xff]   ;;  %v386_v13 = vshrl.u32 %v2820_v4, 16  ;;  %v2827_v37 = vld [vmem:[%s3259_s21 + $0x30] sm:$0xff]  }
  0x70   : > { %2583 = vmatprep.subr.bf16.mxu0 %v3037_v0  ;;  %2653 = vmatprep.subr.bf16.mxu1 %v3037_v0  ;;  %v390_v15 = vshll.u32 %v2823_v12, 16  ;;  %v2824_v19 = vld [vmem:[%s3259_s21 + $0x18] sm:$0xff]   ;;  %v394_v21 = vshrl.u32 %v2823_v12, 16  ;;  %v2825_v25 = vld [vmem:[%s3259_s21 + $0x20] sm:$0xff]   ;;  %v2826_v31 = vld [vmem:[%s3259_s21 + $0x28] sm:$0xff]   ;;  %v422_v40 = vshll.u32 %v2827_v37, 16  ;;  %s3776_s26 = scalar_lea.hbm %s3834_s3, %s2727_s24 }
  0x71   : > { %v379_v8 = vrot.slane %v377_v6, 1  ;;  %v384_v10 = vrot.slane %v382_v7, 1  ;;  %v398_v22 = vshll.u32 %v2824_v19, 16  ;;  %v402_v27 = vshrl.u32 %v2824_v19, 16  ;;  %v2828_v43 = vld [vmem:[%s3259_s21 + $0x38] sm:$0xff]   ;;  %v2829_v49 = vld [vmem:[%s3259_s21 + $0x40] sm:$0xff]  }
  0x72   : > { %2516 = vmatmul.mubr.msk.bf16.vlgmr.msra.gmra.mrb[0].mxu1 %vm520_vm2, %v2819_v3  ;;  %v392_v18 = vrot.slane %v390_v15, 1  ;;  %v406_v28 = vshll.u32 %v2825_v25, 16  ;;  %v410_v33 = vshrl.u32 %v2825_v25, 16  ;;  %v414_v34 = vshll.u32 %v2826_v31, 16  ;;  %v2830_v55 = vld [vmem:[%s3259_s21 + $0x48] sm:$0xff]   ;;  %v2831_v61 = vld [vmem:[%s3259_s21 + $0x50] sm:$0xff]  }
  0x73   : > { %2519 = vmatprep.mubr.msk.bf16.mxu1 %vm3038_vm0, %v3037_v0  ;;  %v380_v14 = vor.u32 %v379_v8, %v375_v5  ;;  %2654 = vmatpush3.bf16.msra.mxu1 %v2822_v9  ;;  %v388_v17 = vor.u32 %v386_v13, %v384_v10  ;;  %v400_v24 = vrot.slane %v398_v22, 1  ;;  %v418_v39 = vshrl.u32 %v2826_v31, 16  ;;  %v2835_v22 = vld [vmem:[%s3259_s21 + $0x70] sm:$0xff]   ;;  %s3643_s22 = scalar_lea.vmem [#allocation8], %s2726_s20  ;;  %p3849_p12 = scmp.ne.s32.totalorder %s3845_s27, 0 }
  0x74   : > { %v396_v23 = vor.u32 %v394_v21, %v392_v18  ;;  %v408_v30 = vrot.slane %v406_v28, 1  ;;  %v416_v36 = vrot.slane %v414_v34, 1  ;;  %v424_v42 = vrot.slane %v422_v40, 1  ;;  %v2836_v28 = vld [vmem:[%s3259_s21 + $0x78] sm:$0xff]   ;;  %v2837_v34 = vld [vmem:[%s3259_s21 + $0x80] sm:$0xff]   ;;  %s2074_s11 = sshll.u32 %s3643_s22, 4  ;;  %s3778_s11 = int_to_ptr.vmem [resolvable:$true] %s2074_s11 }
  0x75   : > { %v385_v16 = vsel %vm373_vm1, %v380_v14, %v384_v10  ;;  %v393_v20 = vsel %vm373_vm1, %v388_v17, %v392_v18  ;;  %v404_v29 = vor.u32 %v402_v27, %v400_v24  ;;  %v426_v45 = vshrl.u32 %v2827_v37, 16  ;;  %v2833_v10 = vld [vmem:[%s3259_s21 + $0x60] sm:$0xff]   ;;  %v2838_v40 = vld [vmem:[%s3259_s21 + $0x88] ss:$0 sps:$4 sm:$0x11]   ;;  %s2944_s10 = scalar_lea.vmem %s3778_s11, 2176 }
  0x76   : > { %2446 = vmatmul.mubr.msk.bf16.vlgmr.msra.gmra.mrb[0].mxu0 %vm520_vm2, %v385_v16  ;;  %v401_v26 = vsel %vm373_vm1, %v396_v23, %v400_v24  ;;  %v412_v35 = vor.u32 %v410_v33, %v408_v30  ;;  %v420_v41 = vor.u32 %v418_v39, %v416_v36  ;;  %v430_v46 = vshll.u32 %v2828_v43, 16  ;;  %v2834_v16 = vld [vmem:[%s3259_s21 + $0x68] sm:$0xff]   ;;  %p2945_p8 = scmp.ne.s32.totalorder %s3778_s11, %s2944_s10  ;;  %s3039_s19 = smov [#allocation8]  }
  0x77   : > { %2584 = vmatpush3.bf16.msra.mxu0 %v2821_v11  ;;  %2449 = vmatprep.mubr.msk.bf16.mxu0 %vm3038_vm0, %v3037_v0  ;;  %v409_v32 = vsel %vm373_vm1, %v404_v29, %v408_v30  ;;  %v428_v47 = vor.u32 %v426_v45, %v424_v42  ;;  %v434_v51 = vshrl.u32 %v2828_v43, 16  ;;  %v438_v52 = vshll.u32 %v2829_v49, 16  ;;  %s2948_s4 = sshll.u32 %s3039_s19, 4  ;;  %s2949_s4 = int_to_ptr.vmem [resolvable:$false] %s2948_s4 }
  0x78   : > { %v417_v38 = vsel %vm373_vm1, %v412_v35, %v416_v36  ;;  %v425_v44 = vsel %vm373_vm1, %v420_v41, %v424_v42  ;;  %v432_v48 = vrot.slane %v430_v46, 1  ;;  %v442_v57 = vshrl.u32 %v2829_v49, 16  ;;  %v950_v41 = vld [vmem:[%s3259_s21 + $0x8] sm:$0xf]  ;;  %v951_v42 = vld [vmem:[%s3259_s21 + $0xc] sm:$0xf]  ;;  %p2946_p1 = pnand %p2945_p8, %p3849_p12  ;;  %p2951_p3 = scmp.lt.s32.totalorder %s3778_s11, %s2949_s4 }
  0x79   : > { %v440_v54 = vrot.slane %v438_v52, 1  ;;  %v446_v58 = vshll.u32 %v2830_v55, 16  ;;  %v450_v63 = vshrl.u32 %v2830_v55, 16  ;;  %v454_v1 = vshll.u32 %v2831_v61, 16  ;;  %s2950_s9 = scalar_lea.vmem %s2949_s4, 4352 }
  0x7a   : > { %2520 = vmatmul.mubr.msk.bf16.gmra.mrb[4].mxu1 %vm520_vm2, %v2820_v4  ;;  %v433_v50 = vsel %vm373_vm1, %v428_v47, %v432_v48  ;;  %v436_v53 = vor.u32 %v434_v51, %v432_v48  ;;  %v2832_v4 = vld [vmem:[%s3259_s21 + $0x58] sm:$0xff]   ;;  %v458_v6 = vshrl.u32 %v2831_v61, 16  ;;  %v470_v13 = vshll.u32 %v2833_v10, 16  ;;  %v1476_v47 = vld [vmem:[%s3259_s21 + $0x8] sm:$0xe]  ;;  %v2840_v48 = vld [vmem:[%s3259_s21 + $0x10] sm:$0xff]   ;;  %p2947_p10 = pneg %p2946_p1  ;;  %p2952_p5 = scmp.lt.s32.totalorder %s2950_s9, %s2944_s10 }
  0x7b   : > { %2523 = vmatprep.mubr.msk.bf16.mxu1 %vm3038_vm0, %v3037_v0  ;;  %v444_v59 = vor.u32 %v442_v57, %v440_v54  ;;  %v448_v60 = vrot.slane %v446_v58, 1  ;;  %v456_v3 = vrot.slane %v454_v1, 1  ;;  %v462_v7 = vshll.u32 %v2832_v4, 16 }
  0x7c   : > { %v441_v56 = vsel %vm373_vm1, %v436_v53, %v440_v54  ;;  %v472_v15 = vrot.slane %v470_v13, 1  ;;  %v474_v18 = vshrl.u32 %v2833_v10, 16  ;;  %v482_v24 = vshrl.u32 %v2834_v16, 16  ;;  %v2844_v13 = vld [vmem:[%s3259_s21 + $0x28] sm:$0xff]   ;;  %p2953_p9 = por %p2952_p5, %p2951_p3 }
  0x7d   : > { %v449_v62 = vsel %vm373_vm1, %v444_v59, %v448_v60  ;;  %v452_v2 = vor.u32 %v450_v63, %v448_v60  ;;  %v460_v8 = vor.u32 %v458_v6, %v456_v3  ;;  %v464_v9 = vrot.slane %v462_v7, 1  ;;  %v2842_v60 = vld [vmem:[%s3259_s21 + $0x18] sm:$0xff]  }
  0x7e   : > { %2450 = vmatmul.mubr.msk.bf16.gmra.mrb[4].mxu0 %vm520_vm2, %v393_v20  ;;  %v476_v20 = vor.u32 %v474_v18, %v472_v15  ;;  %v490_v30 = vshrl.u32 %v2835_v22, 16  ;;  %v498_v36 = vshrl.u32 %v2836_v28, 16  ;;  %v510_v45 = vshll.u32 %v2838_v40, 16  ;;  %p2954_p2 = pnand %p2953_p9, %p2947_p10 }
  0x7f   : > { %2453 = vmatprep.mubr.msk.bf16.mxu0 %vm3038_vm0, %v3037_v0  ;;  %v457_v5 = vsel %vm373_vm1, %v452_v2, %v456_v3  ;;  %v465_v11 = vsel %vm373_vm1, %v460_v8, %v464_v9  ;;  %v2244_v46 = vcombine.low %v950_v41, %v951_v42  ;;  %v1485_v54 = vrot.slane %v2840_v48, 1 }
  0x80   : > { %v512_v51 = vrot.slane %v510_v45, 1  ;;  %v1084_v58 = vshll.u32 %v2840_v48, 16  ;;  %v1487_v63 = vrot.slane %v2842_v60, 1  ;;  %v1088_v2 = vshrl.u32 %v2840_v48, 16  ;;  %v2848_v45 = vld [vmem:[%s3259_s21 + $0x48] sm:$0xff]  }
  0x81   : > { %v1079_v52 = vshll.u32 %v2244_v46, 16  ;;  %v1092_v3 = vshll.u32 %v2842_v60, 16  ;;  %v1499_v48 = vrot.slane %v2848_v45, 1 }
  0x82   : > { %2524 = vmatmul.mubr.msk.bf16.gmra.mrb[8].mxu1 %vm520_vm2, %v2823_v12  ;;  %v466_v12 = vshrl.u32 %v2832_v4, 16 }
  0x83   : > { %2527 = vmatprep.mubr.msk.bf16.mxu1 %vm3038_vm0, %v3037_v0  ;;  %v1081_v57 = vrot.slane %v1079_v52, 1  ;;  %v1094_v7 = vrot.slane %v1092_v3, 1 }
  0x84   : > { %v468_v14 = vor.u32 %v466_v12, %v464_v9 }
  0x86   : > { %2454 = vmatmul.mubr.msk.bf16.gmra.mrb[8].mxu0 %vm520_vm2, %v401_v26  ;;  %v473_v17 = vsel %vm373_vm1, %v468_v14, %v472_v15 }
  0x87   : > { %2457 = vmatprep.mubr.msk.bf16.mxu0 %vm3038_vm0, %v3037_v0 }
  0x8a   : > { %2528 = vmatmul.mubr.msk.bf16.gmra.mrb[12].mxu1 %vm520_vm2, %v2824_v19  ;;  %v478_v19 = vshll.u32 %v2834_v16, 16 }
  0x8b   : > { %2531 = vmatprep.mubr.msk.bf16.mxu1 %vm3038_vm0, %v3037_v0 }
  0x8c   : > { %v480_v21 = vrot.slane %v478_v19, 1  ;;  %v1108_v19 = vshll.u32 %v2844_v13, 16 }
  0x8e   : > { %2458 = vmatmul.mubr.msk.bf16.gmra.mrb[12].mxu0 %vm520_vm2, %v409_v32  ;;  %v481_v23 = vsel %vm373_vm1, %v476_v20, %v480_v21  ;;  %v484_v26 = vor.u32 %v482_v24, %v480_v21  ;;  %v2845_v21 = vld [vmem:[%s3259_s21 + $0x30] sm:$0xff]  }
  0x8f   : > { %2461 = vmatprep.mubr.msk.bf16.mxu0 %vm3038_vm0, %v3037_v0  ;;  %v1493_v24 = vrot.slane %v2845_v21, 1 }
  0x92   : > { %2532 = vmatmul.mubr.msk.bf16.gmra.mrb[16].mxu1 %vm520_vm2, %v2825_v25  ;;  %v486_v25 = vshll.u32 %v2835_v22, 16 }
  0x93   : > { %2535 = vmatprep.mubr.msk.bf16.mxu1 %vm3038_vm0, %v3037_v0 }
  0x94   : > { %v488_v27 = vrot.slane %v486_v25, 1 }
  0x96   : > { %2462 = vmatmul.mubr.msk.bf16.gmra.mrb[16].mxu0 %vm520_vm2, %v417_v38  ;;  %v489_v29 = vsel %vm373_vm1, %v484_v26, %v488_v27  ;;  %v492_v32 = vor.u32 %v490_v30, %v488_v27  ;;  %v1112_v26 = vshrl.u32 %v2844_v13, 16  ;;  %v1116_v27 = vshll.u32 %v2845_v21, 16 }
  0x97   : > { %2465 = vmatprep.mubr.msk.bf16.mxu0 %vm3038_vm0, %v3037_v0 }
  0x9a   : > { %2536 = vmatmul.mubr.msk.bf16.gmra.mrb[20].mxu1 %vm520_vm2, %v2826_v31  ;;  %v494_v31 = vshll.u32 %v2836_v28, 16 }
  0x9b   : > { %2539 = vmatprep.mubr.msk.bf16.mxu1 %vm3038_vm0, %v3037_v0 }
  0x9c   : > { %v496_v33 = vrot.slane %v494_v31, 1  ;;  %v1118_v31 = vrot.slane %v1116_v27, 1 }
  0x9e   : > { %2466 = vmatmul.mubr.msk.bf16.gmra.mrb[20].mxu0 %vm520_vm2, %v425_v44  ;;  %v497_v35 = vsel %vm373_vm1, %v492_v32, %v496_v33  ;;  %v500_v38 = vor.u32 %v498_v36, %v496_v33  ;;  %v506_v44 = vshrl.u32 %v2837_v34, 16 }
  0x9f   : > { %2469 = vmatprep.mubr.msk.bf16.mxu0 %vm3038_vm0, %v3037_v0 }
  0xa2   : > { %2540 = vmatmul.mubr.msk.bf16.gmra.mrb[24].mxu1 %vm520_vm2, %v2827_v37  ;;  %v502_v37 = vshll.u32 %v2837_v34, 16 }
  0xa3   : > { %2543 = vmatprep.mubr.msk.bf16.mxu1 %vm3038_vm0, %v3037_v0 }
  0xa4   : > { %v504_v39 = vrot.slane %v502_v37, 1  ;;  %v2847_v37 = vld [vmem:[%s3259_s21 + $0x40] sm:$0xff]  }
  0xa5   : > { %v1497_v40 = vrot.slane %v2847_v37, 1 }
  0xa6   : > { %2470 = vmatmul.mubr.msk.bf16.gmra.mrb[24].mxu0 %vm520_vm2, %v433_v50  ;;  %v508_v50 = vor.u32 %v506_v44, %v504_v39 }
  0xa7   : > { %2473 = vmatprep.mubr.msk.bf16.mxu0 %vm3038_vm0, %v3037_v0  ;;  %v1500_v52 = vsel %vm1483_vm3, %v1497_v40, %v1499_v48 }
  0xaa   : > { %2544 = vmatmul.mubr.msk.bf16.gmra.mrb[28].mxu1 %vm520_vm2, %v2828_v43  ;;  %v505_v43 = vsel %vm373_vm1, %v500_v38, %v504_v39 }
  0xab   : > { %2547 = vmatprep.mubr.msk.bf16.mxu1 %vm3038_vm0, %v3037_v0 }
  0xae   : > { %2474 = vmatmul.mubr.msk.bf16.gmra.mrb[28].mxu0 %vm520_vm2, %v441_v56  ;;  %v1077_v56 = vshrl.u32 %v2244_v46, 16 }
  0xaf   : > { %2477 = vmatprep.mubr.msk.bf16.mxu0 %vm3038_vm0, %v3037_v0 }
  0xb2   : > { %2548 = vmatmul.mubr.msk.bf16.gmra.mrb[32].mxu1 %vm520_vm2, %v2829_v49  ;;  %v2280_v49 = vcombine.low %v1476_v47, %v951_v42 }
  0xb3   : > { %2551 = vmatprep.mubr.msk.bf16.mxu1 %vm3038_vm0, %v3037_v0 }
  0xb4   : > { %v1484_v53 = vrot.slane %v2280_v49, 1 }
  0xb6   : > { %2478 = vmatmul.mubr.msk.bf16.gmra.mrb[32].mxu0 %vm520_vm2, %v449_v62  ;;  %v1486_v59 = vsel %vm1483_vm3, %v1484_v53, %v1485_v54  ;;  %v1086_v62 = vrot.slane %v1084_v58, 1  ;;  %v2849_v53 = vld [vmem:[%s3259_s21 + $0x50] sm:$0xff]   ;;  %v1144_v58 = vshrl.u32 %v2848_v45, 16 }
  0xb7   : > { %2481 = vmatprep.mubr.msk.bf16.mxu0 %vm3038_vm0, %v3037_v0  ;;  %v1152_v3 = vshrl.u32 %v2849_v53, 16 }
  0xb8   : > { %v1090_v6 = vor.u32 %v1088_v2, %v1086_v62 }
  0xba   : > { %2552 = vmatmul.mubr.msk.bf16.gmra.mrb[36].mxu1 %vm520_vm2, %v2830_v55  ;;  %v513_v55 = vsel %vm373_vm1, %v508_v50, %v512_v51  ;;  %v1095_v9 = vsel %vm373_vm1, %v1090_v6, %v1094_v7  ;;  %v1136_v50 = vshrl.u32 %v2847_v37, 16  ;;  %v1140_v51 = vshll.u32 %v2848_v45, 16  ;;  %v2851_v6 = vld [vmem:[%s3259_s21 + $0x60] sm:$0xff]  }
  0xbb   : > { %2555 = vmatprep.mubr.msk.bf16.mxu1 %vm3038_vm0, %v3037_v0  ;;  %v1168_v27 = vshrl.u32 %v2851_v6, 16 }
  0xbe   : > { %2482 = vmatmul.mubr.msk.bf16.gmra.mrb[36].mxu0 %vm520_vm2, %v457_v5  ;;  %v2843_v5 = vld [vmem:[%s3259_s21 + $0x20] sm:$0xff]  }
  0xbf   : > { %2485 = vmatprep.mubr.msk.bf16.mxu0 %vm3038_vm0, %v3037_v0  ;;  %v1489_v8 = vrot.slane %v2843_v5, 1  ;;  %v1104_v18 = vshrl.u32 %v2843_v5, 16 }
  0xc1   : > { %v1490_v12 = vsel %vm1483_vm3, %v1487_v63, %v1489_v8 }
  0xc2   : > { %2556 = vmatmul.mubr.msk.bf16.gmra.mrb[40].mxu1 %vm520_vm2, %v2831_v61  ;;  %v1082_v61 = vor.u32 %v1081_v57, %v1077_v56  ;;  %v1501_v56 = vrot.slane %v2849_v53, 1 }
  0xc3   : > { %2559 = vmatprep.mubr.msk.bf16.mxu1 %vm3038_vm0, %v3037_v0 }
  0xc4   : > { %v1087_v1 = vsel %vm373_vm1, %v1082_v61, %v1086_v62  ;;  %v2850_v61 = vld [vmem:[%s3259_s21 + $0x58] sm:$0xff]  }
  0xc6   : > { %2486 = vmatmul.mubr.msk.bf16.gmra.mrb[40].mxu0 %vm520_vm2, %v465_v11  ;;  %v1100_v11 = vshll.u32 %v2843_v5, 16 }
  0xc7   : > { %2489 = vmatprep.mubr.msk.bf16.mxu0 %vm3038_vm0, %v3037_v0 }
  0xc8   : > { %v1102_v15 = vrot.slane %v1100_v11, 1  ;;  %v1160_v11 = vshrl.u32 %v2850_v61, 16 }
  0xca   : > { %2560 = vmatmul.mubr.msk.bf16.gmra.mrb[44].mxu1 %vm520_vm2, %v2832_v4  ;;  %v1488_v4 = vsel %vm1483_vm3, %v1485_v54, %v1487_v63 }
  0xcb   : > { %2563 = vmatprep.mubr.msk.bf16.mxu1 %vm3038_vm0, %v3037_v0 }
  0xce   : > { %2490 = vmatmul.mubr.msk.bf16.gmra.mrb[44].mxu0 %vm520_vm2, %v473_v17 }
  0xcf   : > { %2493 = vmatprep.mubr.msk.bf16.mxu0 %vm3038_vm0, %v3037_v0 }
  0xd2   : > { %2564 = vmatmul.mubr.msk.bf16.gmra.mrb[48].mxu1 %vm520_vm2, %v2833_v10  ;;  %v1096_v10 = vshrl.u32 %v2842_v60, 16  ;;  %v1502_v60 = vsel %vm1483_vm3, %v1499_v48, %v1501_v56 }
  0xd3   : > { %2567 = vmatprep.mubr.msk.bf16.mxu1 %vm3038_vm0, %v3037_v0 }
  0xd4   : > { %v1098_v14 = vor.u32 %v1096_v10, %v1094_v7 }
  0xd6   : > { %2494 = vmatmul.mubr.msk.bf16.gmra.mrb[48].mxu0 %vm520_vm2, %v481_v23  ;;  %v1103_v17 = vsel %vm373_vm1, %v1098_v14, %v1102_v15  ;;  %v1110_v23 = vrot.slane %v1108_v19, 1 }
  0xd7   : > { %2497 = vmatprep.mubr.msk.bf16.mxu0 %vm3038_vm0, %v3037_v0 }
  0xd8   : > { %v1114_v30 = vor.u32 %v1112_v26, %v1110_v23 }
  0xda   : > { %2568 = vmatmul.mubr.msk.bf16.gmra.mrb[52].mxu1 %vm520_vm2, %v2834_v16  ;;  %v1491_v16 = vrot.slane %v2844_v13, 1  ;;  %v1119_v33 = vsel %vm373_vm1, %v1114_v30, %v1118_v31 }
  0xdb   : > { %2571 = vmatprep.mubr.msk.bf16.mxu1 %vm3038_vm0, %v3037_v0 }
  0xdc   : > { %v1492_v20 = vsel %vm1483_vm3, %v1489_v8, %v1491_v16 }
  0xde   : > { %2498 = vmatmul.mubr.msk.bf16.gmra.mrb[52].mxu0 %vm520_vm2, %v489_v29  ;;  %v2846_v29 = vld [vmem:[%s3259_s21 + $0x38] sm:$0xff]  }
  0xdf   : > { %2501 = vmatprep.mubr.msk.bf16.mxu0 %vm3038_vm0, %v3037_v0  ;;  %v1495_v32 = vrot.slane %v2846_v29, 1  ;;  %v1128_v42 = vshrl.u32 %v2846_v29, 16 }
  0xe1   : > { %v1496_v36 = vsel %vm1483_vm3, %v1493_v24, %v1495_v32  ;;  %v1498_v44 = vsel %vm1483_vm3, %v1495_v32, %v1497_v40 }
  0xe2   : > { %2572 = vmatmul.mubr.msk.bf16.gmra.mrb[56].mxu1 %vm520_vm2, %v2835_v22  ;;  %v1106_v22 = vor.u32 %v1104_v18, %v1102_v15 }
  0xe3   : > { %2575 = vmatprep.mubr.msk.bf16.mxu1 %vm3038_vm0, %v3037_v0 }
  0xe4   : > { %v1111_v25 = vsel %vm373_vm1, %v1106_v22, %v1110_v23 }
  0xe6   : > { %2502 = vmatmul.mubr.msk.bf16.gmra.mrb[56].mxu0 %vm520_vm2, %v497_v35  ;;  %v1124_v35 = vshll.u32 %v2846_v29, 16 }
  0xe7   : > { %2505 = vmatprep.mubr.msk.bf16.mxu0 %vm3038_vm0, %v3037_v0 }
  0xe8   : > { %v1126_v39 = vrot.slane %v1124_v35, 1  ;;  %v2853_v35 = vld [vmem:[%s3259_s21 + $0x70] sm:$0xff]  }
  0xea   : > { %2576 = vmatmul.mubr.msk.bf16.gmra.mrb[60].mxu1 %vm520_vm2, %v2836_v28  ;;  %v1494_v28 = vsel %vm1483_vm3, %v1491_v16, %v1493_v24  ;;  %v1130_v46 = vor.u32 %v1128_v42, %v1126_v39  ;;  %v1509_v42 = vrot.slane %v2853_v35, 1 }
  0xeb   : > { %2579 = vmatprep.mubr.msk.bf16.mxu1 %vm3038_vm0, %v3037_v0 }
  0xee   : > { %2506 = vmatmul.mubr.msk.bf16.gmra.mrb[60].mxu0 %vm520_vm2, %v505_v43  ;;  %v1132_v43 = vshll.u32 %v2847_v37, 16 }
  0xef   : > { %2509 = vmatprep.mubr.msk.bf16.mxu0 %vm3038_vm0, %v3037_v0 }
  0xf0   : > { %v1134_v47 = vrot.slane %v1132_v43, 1 }
  0xf2   : > { %2580 = vmatmul.mubr.msk.bf16.gmra.mrb[64].mxu1 %vm520_vm2, %v2837_v34  ;;  %v1120_v34 = vshrl.u32 %v2845_v21, 16  ;;  %v1135_v49 = vsel %vm373_vm1, %v1130_v46, %v1134_v47  ;;  %v1138_v54 = vor.u32 %v1136_v50, %v1134_v47  ;;  %v1180_v46 = vshll.u32 %v2853_v35, 16 }
  0xf3   : > { %2655 = vmatprep.mubr.msk.bf16.mxu1 %vm3038_vm0, %v3037_v0 }
  0xf4   : > { %v1122_v38 = vor.u32 %v1120_v34, %v1118_v31 }
  0xf6   : > { %2510 = vmatmul.mubr.msk.bf16.gmra.mrb[64].mxu0 %vm520_vm2, %v513_v55  ;;  %v1127_v41 = vsel %vm373_vm1, %v1122_v38, %v1126_v39  ;;  %v1142_v55 = vrot.slane %v1140_v51, 1 }
  0xf7   : > { %2585 = vmatprep.mubr.msk.bf16.mxu0 %vm3038_vm0, %v3037_v0 }
  0xf8   : > { %v1143_v57 = vsel %vm373_vm1, %v1138_v54, %v1142_v55  ;;  %v1146_v62 = vor.u32 %v1144_v58, %v1142_v55 }
  0xfa   : > { %2656 = vmatmul.mubr.msk.bf16.vlgmr.msra.gmra.mrb[68].mxu1 %vm520_vm2, %v1486_v59  ;;  %v1148_v59 = vshll.u32 %v2849_v53, 16  ;;  %v2854_v53 = vld [vmem:[%s3259_s21 + $0x78] sm:$0xff]  }
  0xfb   : > { %2659 = vmatprep.mubr.msk.bf16.mxu1 %vm3038_vm0, %v3037_v0 }
  0xfc   : > { %v1150_v63 = vrot.slane %v1148_v59, 1 }
  0xfe   : > { %2586 = vmatmul.mubr.msk.bf16.vlgmr.msra.gmra.mrb[68].mxu0 %vm520_vm2, %v1087_v1  ;;  %v1503_v1 = vrot.slane %v2850_v61, 1  ;;  %v1151_v2 = vsel %vm373_vm1, %v1146_v62, %v1150_v63  ;;  %v1154_v7 = vor.u32 %v1152_v3, %v1150_v63  ;;  %v1184_v63 = vshrl.u32 %v2853_v35, 16 }
  0xff   : > { %2589 = vmatprep.mubr.msk.bf16.mxu0 %vm3038_vm0, %v3037_v0 }
 0x100   : > { %v1504_v5 = vsel %vm1483_vm3, %v1501_v56, %v1503_v1  ;;  %v1182_v56 = vrot.slane %v1180_v46, 1 }
 0x102   : > { %2660 = vmatmul.mubr.msk.bf16.gmra.mrb[72].mxu1 %vm520_vm2, %v1488_v4  ;;  %v1156_v4 = vshll.u32 %v2850_v61, 16 }
 0x103   : > { %2663 = vmatprep.mubr.msk.bf16.mxu1 %vm3038_vm0, %v3037_v0 }
 0x104   : > { %v1158_v8 = vrot.slane %v1156_v4, 1 }
 0x106   : > { %2590 = vmatmul.mubr.msk.bf16.gmra.mrb[72].mxu0 %vm520_vm2, %v1095_v9  ;;  %v1505_v9 = vrot.slane %v2851_v6, 1  ;;  %v1159_v10 = vsel %vm373_vm1, %v1154_v7, %v1158_v8  ;;  %v1162_v19 = vor.u32 %v1160_v11, %v1158_v8  ;;  %v2855_v8 = vld [vmem:[%s3259_s21 + $0x80] sm:$0xff]  }
 0x107   : > { %2593 = vmatprep.mubr.msk.bf16.mxu0 %vm3038_vm0, %v3037_v0 }
 0x108   : > { %v1506_v16 = vsel %vm1483_vm3, %v1503_v1, %v1505_v9  ;;  %v1188_v1 = vshll.u32 %v2854_v53, 16 }
 0x10a   : > { %2664 = vmatmul.mubr.msk.bf16.gmra.mrb[76].mxu1 %vm520_vm2, %v1490_v12  ;;  %v1164_v12 = vshll.u32 %v2851_v6, 16  ;;  %v1190_v11 = vrot.slane %v1188_v1, 1 }
 0x10b   : > { %2667 = vmatprep.mubr.msk.bf16.mxu1 %vm3038_vm0, %v3037_v0 }
 0x10e   : > { %2594 = vmatmul.mubr.msk.bf16.gmra.mrb[76].mxu0 %vm520_vm2, %v1103_v17  ;;  %v2852_v17 = vld [vmem:[%s3259_s21 + $0x68] sm:$0xff]  }
 0x10f   : > { %2597 = vmatprep.mubr.msk.bf16.mxu0 %vm3038_vm0, %v3037_v0  ;;  %v1507_v24 = vrot.slane %v2852_v17, 1  ;;  %v1176_v45 = vshrl.u32 %v2852_v17, 16 }
 0x111   : > { %v1508_v34 = vsel %vm1483_vm3, %v1505_v9, %v1507_v24 }
 0x112   : > { %2668 = vmatmul.mubr.msk.bf16.gmra.mrb[80].mxu1 %vm520_vm2, %v1492_v20  ;;  %v1166_v20 = vrot.slane %v1164_v12, 1 }
 0x113   : > { %2671 = vmatprep.mubr.msk.bf16.mxu1 %vm3038_vm0, %v3037_v0 }
 0x114   : > { %v1167_v26 = vsel %vm373_vm1, %v1162_v19, %v1166_v20  ;;  %v1170_v37 = vor.u32 %v1168_v27, %v1166_v20  ;;  %v1196_v19 = vshll.u32 %v2855_v8, 16  ;;  %v2856_v27 = vld [vmem:[%s3259_s21 + $0x88] sm:$0xff]  }
 0x115   : > { %v1515_v35 = vrot.slane %v2856_v27, 1 }
 0x116   : > { %2598 = vmatmul.mubr.msk.bf16.gmra.mrb[80].mxu0 %vm520_vm2, %v1111_v25 }
 0x117   : > { %2601 = vmatprep.mubr.msk.bf16.mxu0 %vm3038_vm0, %v3037_v0 }
 0x11a   : > { %2672 = vmatmul.mubr.msk.bf16.gmra.mrb[84].mxu1 %vm520_vm2, %v1494_v28  ;;  %v1172_v28 = vshll.u32 %v2852_v17, 16 }
 0x11b   : > { %2675 = vmatprep.mubr.msk.bf16.mxu1 %vm3038_vm0, %v3037_v0 }
 0x11c   : > { %v1174_v38 = vrot.slane %v1172_v28, 1 }
 0x11e   : > { %2602 = vmatmul.mubr.msk.bf16.gmra.mrb[84].mxu0 %vm520_vm2, %v1119_v33  ;;  %v1178_v55 = vor.u32 %v1176_v45, %v1174_v38 }
 0x11f   : > { %2605 = vmatprep.mubr.msk.bf16.mxu0 %vm3038_vm0, %v3037_v0 }
 0x120   : > { %v1183_v62 = vsel %vm373_vm1, %v1178_v55, %v1182_v56 }
 0x122   : > { %2676 = vmatmul.mubr.msk.bf16.gmra.mrb[88].mxu1 %vm520_vm2, %v1496_v36 }
 0x123   : > { %2679 = vmatprep.mubr.msk.bf16.mxu1 %vm3038_vm0, %v3037_v0 }
 0x126   : > { %2606 = vmatmul.mubr.msk.bf16.gmra.mrb[88].mxu0 %vm520_vm2, %v1127_v41 }
 0x127   : > { %2609 = vmatprep.mubr.msk.bf16.mxu0 %vm3038_vm0, %v3037_v0 }
 0x12a   : > { %2680 = vmatmul.mubr.msk.bf16.gmra.mrb[92].mxu1 %vm520_vm2, %v1498_v44  ;;  %v1175_v44 = vsel %vm373_vm1, %v1170_v37, %v1174_v38  ;;  %v1200_v38 = vshrl.u32 %v2855_v8, 16 }
 0x12b   : > { %2683 = vmatprep.mubr.msk.bf16.mxu1 %vm3038_vm0, %v3037_v0 }
 0x12e   : > { %2610 = vmatmul.mubr.msk.bf16.gmra.mrb[92].mxu0 %vm520_vm2, %v1135_v49 }
 0x12f   : > { %2613 = vmatprep.mubr.msk.bf16.mxu0 %vm3038_vm0, %v3037_v0 }
 0x132   : > { %2684 = vmatmul.mubr.msk.bf16.gmra.mrb[96].mxu1 %vm520_vm2, %v1500_v52  ;;  %v1510_v52 = vsel %vm1483_vm3, %v1507_v24, %v1509_v42 }
 0x133   : > { %2687 = vmatprep.mubr.msk.bf16.mxu1 %vm3038_vm0, %v3037_v0 }
 0x136   : > { %2614 = vmatmul.mubr.msk.bf16.gmra.mrb[96].mxu0 %vm520_vm2, %v1143_v57 }
 0x137   : > { %2617 = vmatprep.mubr.msk.bf16.mxu0 %vm3038_vm0, %v3037_v0 }
 0x13a   : > { %2688 = vmatmul.mubr.msk.bf16.gmra.mrb[100].mxu1 %vm520_vm2, %v1502_v60  ;;  %v1511_v60 = vrot.slane %v2854_v53, 1 }
 0x13b   : > { %2691 = vmatprep.mubr.msk.bf16.mxu1 %vm3038_vm0, %v3037_v0 }
 0x13c   : > { %v1512_v7 = vsel %vm1483_vm3, %v1509_v42, %v1511_v60 }
 0x13e   : > { %2618 = vmatmul.mubr.msk.bf16.gmra.mrb[100].mxu0 %vm520_vm2, %v1151_v2 }
 0x13f   : > { %2621 = vmatprep.mubr.msk.bf16.mxu0 %vm3038_vm0, %v3037_v0 }
 0x142   : > { %2692 = vmatmul.mubr.msk.bf16.gmra.mrb[104].mxu1 %vm520_vm2, %v1504_v5 }
 0x143   : > { %2695 = vmatprep.mubr.msk.bf16.mxu1 %vm3038_vm0, %v3037_v0 }
 0x145   : > { %v815_v13 = vpop.f32.mrb[0].mxu1 }
 0x146   : > { %v2517_v14 = vpop.f32.mrb[1].mxu1  ;;  %2622 = vmatmul.mubr.msk.bf16.gmra.mrb[104].mxu0 %vm520_vm2, %v1159_v10  ;;  %v1186_v10 = vor.u32 %v1184_v63, %v1182_v56 }
 0x147   : > { %v818_v15 = vpop.f32.mrb[2].mxu1  ;;  %2625 = vmatprep.mubr.msk.bf16.mxu0 %vm3038_vm0, %v3037_v0 }
 0x148   : > { %v2518_v18 = vpop.f32.mrb[3].mxu1  ;;  %v1191_v17 = vsel %vm373_vm1, %v1186_v10, %v1190_v11 }
 0x149   : > { %v606_v21 = vpop.f32.mrb[0].mxu0  ;;  %v1192_v18 = vshrl.u32 %v2854_v53, 16 }
 0x14a   : > { %2696 = vmatmul.mubr.msk.bf16.gmra.mrb[108].mxu1 %vm520_vm2, %v1506_v16  ;;  %v3511_v22 = vadd.f32 %v815_v13, %v606_v21  ;;  %v2447_v23 = vpop.f32.mrb[1].mxu0 }
 0x14b   : > { %2699 = vmatprep.mubr.msk.bf16.mxu1 %vm3038_vm0, %v3037_v0  ;;  %v609_v25 = vpop.f32.mrb[2].mxu0 }
 0x14c   : > { %v3516_v29 = vadd.f32 %v818_v15, %v609_v25  ;;  %v2448_v30 = vpop.f32.mrb[3].mxu0  ;;  %v1513_v15 = vrot.slane %v2855_v8, 1 }
 0x14d   : > { %v823_v31 = vpop.f32.mrb[4].mxu1  ;;  %v1194_v30 = vor.u32 %v1192_v18, %v1190_v11 }
 0x14e   : > { %v2521_v32 = vpop.f32.mrb[5].mxu1  ;;  %2626 = vmatmul.mubr.msk.bf16.gmra.mrb[108].mxu0 %vm520_vm2, %v1167_v26  ;;  %v1514_v26 = vsel %vm1483_vm3, %v1511_v60, %v1513_v15  ;;  %v1516_v46 = vsel %vm1483_vm3, %v1513_v15, %v1515_v35 }
 0x14f   : > { %v826_v33 = vpop.f32.mrb[6].mxu1  ;;  %2629 = vmatprep.mubr.msk.bf16.mxu0 %vm3038_vm0, %v3037_v0 }
 0x150   : > { %v2522_v36 = vpop.f32.mrb[7].mxu1 }
 0x151   : > { %v614_v39 = vpop.f32.mrb[4].mxu0 }
 0x152   : > { %2700 = vmatmul.mubr.msk.bf16.gmra.mrb[112].mxu1 %vm520_vm2, %v1508_v34  ;;  %v3524_v40 = vadd.f32 %v823_v31, %v614_v39  ;;  %v2451_v41 = vpop.f32.mrb[5].mxu0  ;;  %v1198_v31 = vrot.slane %v1196_v19, 1  ;;  %v1204_v39 = vshll.u32 %v2856_v27, 16 }
 0x153   : > { %2703 = vmatprep.mubr.msk.bf16.mxu1 %vm3038_vm0, %v3037_v0  ;;  %v617_v43 = vpop.f32.mrb[6].mxu0 }
 0x154   : > { %v3529_v47 = vadd.f32 %v826_v33, %v617_v43  ;;  %v2452_v48 = vpop.f32.mrb[7].mxu0  ;;  %v1199_v37 = vsel %vm373_vm1, %v1194_v30, %v1198_v31 }
 0x155   : > { %v831_v49 = vpop.f32.mrb[8].mxu1  ;;  %v2857_v48 = vld [vmem:[%s3259_s21 + $0x90] ss:$0 sps:$4 sm:$0x11]  }
 0x156   : > { %v2525_v50 = vpop.f32.mrb[9].mxu1  ;;  %2630 = vmatmul.mubr.msk.bf16.gmra.mrb[112].mxu0 %vm520_vm2, %v1175_v44  ;;  %v1517_v55 = vrot.slane %v2857_v48, 1  ;;  %v1212_v60 = vshll.u32 %v2857_v48, 16 }
 0x157   : > { %v834_v51 = vpop.f32.mrb[10].mxu1  ;;  %2633 = vmatprep.mubr.msk.bf16.mxu0 %vm3038_vm0, %v3037_v0  ;;  %v1202_v50 = vor.u32 %v1200_v38, %v1198_v31 }
 0x158   : > { %v2526_v54 = vpop.f32.mrb[11].mxu1 }
 0x159   : > { %v622_v57 = vpop.f32.mrb[8].mxu0 }
 0x15a   : > { %2704 = vmatmul.mubr.msk.bf16.gmra.mrb[116].mxu1 %vm520_vm2, %v1510_v52  ;;  %v3537_v58 = vadd.f32 %v831_v49, %v622_v57  ;;  %v2455_v59 = vpop.f32.mrb[9].mxu0 }
 0x15b   : > { %2707 = vmatprep.mubr.msk.bf16.mxu1 %vm3038_vm0, %v3037_v0  ;;  %v625_v61 = vpop.f32.mrb[10].mxu0  ;;  %v1208_v59 = vshrl.u32 %v2856_v27, 16 }
 0x15c   : > { %v3542_v2 = vadd.f32 %v834_v51, %v625_v61  ;;  %v2456_v3 = vpop.f32.mrb[11].mxu0  ;;  %v1206_v51 = vrot.slane %v1204_v39, 1 }
 0x15d   : > { %v839_v4 = vpop.f32.mrb[12].mxu1 }
 0x15e   : > { %v2529_v5 = vpop.f32.mrb[13].mxu1  ;;  %2634 = vmatmul.mubr.msk.bf16.gmra.mrb[116].mxu0 %vm520_vm2, %v1183_v62  ;;  %v1207_v57 = vsel %vm373_vm1, %v1202_v50, %v1206_v51 }
 0x15f   : > { %v842_v6 = vpop.f32.mrb[14].mxu1  ;;  %2637 = vmatprep.mubr.msk.bf16.mxu0 %vm3038_vm0, %v3037_v0 }
 0x160   : > { %v2530_v9 = vpop.f32.mrb[15].mxu1 }
 0x161   : > { %v630_v12 = vpop.f32.mrb[12].mxu0 }
 0x162   : > { %2708 = vmatmul.mubr.msk.bf16.gmra.mrb[120].mxu1 %vm520_vm2, %v1512_v7  ;;  %v3550_v13 = vadd.f32 %v839_v4, %v630_v12  ;;  %v2459_v14 = vpop.f32.mrb[13].mxu0  ;;  %v1518_v4 = vsel %vm1483_vm3, %v1515_v35, %v1517_v55  ;;  %v1214_v7 = vrot.slane %v1212_v60, 1 }
 0x163   : > { %2711 = vmatprep.mubr.msk.bf16.mxu1 %vm3038_vm0, %v3037_v0  ;;  %v633_v16 = vpop.f32.mrb[14].mxu0 }
 0x164   : > { %v3555_v20 = vadd.f32 %v842_v6, %v633_v16  ;;  %v2460_v21 = vpop.f32.mrb[15].mxu0  ;;  %v1210_v6 = vor.u32 %v1208_v59, %v1206_v51 }
 0x165   : > { %v847_v23 = vpop.f32.mrb[16].mxu1 }
 0x166   : > { %v2533_v24 = vpop.f32.mrb[17].mxu1  ;;  %2638 = vmatmul.mubr.msk.bf16.gmra.mrb[120].mxu0 %vm520_vm2, %v1191_v17  ;;  %v1215_v12 = vsel %vm373_vm1, %v1210_v6, %v1214_v7 }
 0x167   : > { %v850_v25 = vpop.f32.mrb[18].mxu1  ;;  %2641 = vmatprep.mubr.msk.bf16.mxu0 %vm3038_vm0, %v3037_v0 }
 0x168   : > { %v2534_v28 = vpop.f32.mrb[19].mxu1 }
 0x169   : > { %v638_v32 = vpop.f32.mrb[16].mxu0 }
 0x16a   : > { %2712 = vmatmul.mubr.msk.bf16.gmra.mrb[124].mxu1 %vm520_vm2, %v1514_v26  ;;  %v3563_v33 = vadd.f32 %v847_v23, %v638_v32  ;;  %v2463_v34 = vpop.f32.mrb[17].mxu0 }
 0x16b   : > { %2715 = vmatprep.mubr.msk.bf16.mxu1 %vm3038_vm0, %v3037_v0  ;;  %v641_v36 = vpop.f32.mrb[18].mxu0 }
 0x16c   : > { %v3568_v41 = vadd.f32 %v850_v25, %v641_v36  ;;  %v2464_v42 = vpop.f32.mrb[19].mxu0 }
 0x16d   : > { %v855_v43 = vpop.f32.mrb[20].mxu1 }
 0x16e   : > { %v2537_v44 = vpop.f32.mrb[21].mxu1  ;;  %2642 = vmatmul.mubr.msk.bf16.gmra.mrb[124].mxu0 %vm520_vm2, %v1199_v37 }
 0x16f   : > { %v858_v45 = vpop.f32.mrb[22].mxu1  ;;  %2645 = vmatprep.mubr.msk.bf16.mxu0 %vm3038_vm0, %v3037_v0 }
 0x170   : > { %v2538_v49 = vpop.f32.mrb[23].mxu1 }
 0x171   : > { %v646_v52 = vpop.f32.mrb[20].mxu0 }
 0x172   : > { %2716 = vmatmul.mubr.msk.bf16.gmra.mrb[128].mxu1 %vm520_vm2, %v1516_v46  ;;  %v3576_v53 = vadd.f32 %v855_v43, %v646_v52  ;;  %v2467_v54 = vpop.f32.mrb[21].mxu0 }
 0x173   : > { %2719 = vmatprep.mubr.msk.bf16.mxu1 %vm3038_vm0, %v3037_v0  ;;  %v649_v56 = vpop.f32.mrb[22].mxu0 }
 0x174   : > { %v3581_v61 = vadd.f32 %v858_v45, %v649_v56  ;;  %v2468_v62 = vpop.f32.mrb[23].mxu0 }
 0x175   : > { %v863_v63 = vpop.f32.mrb[24].mxu1 }
 0x176   : > { %v2541_v1 = vpop.f32.mrb[25].mxu1  ;;  %2646 = vmatmul.mubr.msk.bf16.gmra.mrb[128].mxu0 %vm520_vm2, %v1207_v57 }
 0x177   : > { %v866_v3 = vpop.f32.mrb[26].mxu1  ;;  %2649 = vmatprep.mubr.msk.bf16.mxu0 %vm3038_vm0, %v3037_v0 }
 0x178   : > { %v2542_v5 = vpop.f32.mrb[27].mxu1 }
 0x179   : > { %v654_v8 = vpop.f32.mrb[24].mxu0 }
 0x17a   : > { %2720 = vmatmul.mubr.msk.bf16.gmra.mrb[132].mxu1 %vm520_vm2, %v1518_v4  ;;  %v3588_v9 = vadd.f32 %v863_v63, %v654_v8  ;;  %v2471_v10 = vpop.f32.mrb[25].mxu0 }
 0x17b   : > { %v657_v11 = vpop.f32.mrb[26].mxu0 }
 0x17c   : > { %v3591_v14 = vadd.f32 %v866_v3, %v657_v11  ;;  %v2472_v15 = vpop.f32.mrb[27].mxu0 }
 0x17d   : > { %v871_v16 = vpop.f32.mrb[28].mxu1 }
 0x17e   : > { %v2545_v17 = vpop.f32.mrb[29].mxu1  ;;  %2650 = vmatmul.mubr.msk.bf16.gmra.mrb[132].mxu0 %vm520_vm2, %v1215_v12 }
 0x17f   : > { %v874_v18 = vpop.f32.mrb[30].mxu1 }
 0x180   : > { %v2546_v0 = vpop.f32.mrb[31].mxu1 }
 0x181   : > { %v662_v19 = vpop.f32.mrb[28].mxu0 }
 0x182   : > { %v3594_v21 = vadd.f32 %v871_v16, %v662_v19  ;;  %v2475_v23 = vpop.f32.mrb[29].mxu0 }
 0x183   : > { %v665_v24 = vpop.f32.mrb[30].mxu0 }
 0x184   : > { %v3596_v25 = vadd.f32 %v874_v18, %v665_v24  ;;  %v2476_v26 = vpop.f32.mrb[31].mxu0 }
 0x185   : > { %v879_v27 = vpop.f32.mrb[32].mxu1 }
 0x186   : > { %v2549_v28 = vpop.f32.mrb[33].mxu1 }
 0x187   : > { %v882_v30 = vpop.f32.mrb[34].mxu1 }
 0x188   : > { %v2550_v31 = vpop.f32.mrb[35].mxu1 }
 0x189   : > { %v670_v32 = vpop.f32.mrb[32].mxu0 }
 0x18a   : > { %v3598_v34 = vadd.f32 %v879_v27, %v670_v32  ;;  %v2479_v35 = vpop.f32.mrb[33].mxu0 }
 0x18b   : > { %v673_v36 = vpop.f32.mrb[34].mxu0 }
 0x18c   : > { %v3600_v37 = vadd.f32 %v882_v30, %v673_v36  ;;  %v2480_v38 = vpop.f32.mrb[35].mxu0 }
 0x18d   : > { %v887_v39 = vpop.f32.mrb[36].mxu1 }
 0x18e   : > { %v2553_v42 = vpop.f32.mrb[37].mxu1 }
 0x18f   : > { %v890_v43 = vpop.f32.mrb[38].mxu1 }
 0x190   : > { %v2554_v44 = vpop.f32.mrb[39].mxu1 }
 0x191   : > { %v678_v45 = vpop.f32.mrb[36].mxu0 }
 0x192   : > { %v3602_v46 = vadd.f32 %v887_v39, %v678_v45  ;;  %v2483_v48 = vpop.f32.mrb[37].mxu0 }
 0x193   : > { %v681_v49 = vpop.f32.mrb[38].mxu0 }
 0x194   : > { %v3604_v50 = vadd.f32 %v890_v43, %v681_v49  ;;  %v2484_v51 = vpop.f32.mrb[39].mxu0 }
 0x195   : > { %v895_v52 = vpop.f32.mrb[40].mxu1 }
 0x196   : > { %v2557_v54 = vpop.f32.mrb[41].mxu1 }
 0x197   : > { %v898_v55 = vpop.f32.mrb[42].mxu1 }
 0x198   : > { %v2558_v56 = vpop.f32.mrb[43].mxu1 }
 0x199   : > { %v686_v57 = vpop.f32.mrb[40].mxu0 }
 0x19a   : > { %v3606_v59 = vadd.f32 %v895_v52, %v686_v57  ;;  %v2487_v60 = vpop.f32.mrb[41].mxu0 }
 0x19b   : > { %v689_v62 = vpop.f32.mrb[42].mxu0 }
 0x19c   : > { %v3608_v63 = vadd.f32 %v898_v55, %v689_v62  ;;  %v2488_v1 = vpop.f32.mrb[43].mxu0 }
 0x19d   : > { %v903_v3 = vpop.f32.mrb[44].mxu1 }
 0x19e   : > { %v2561_v4 = vpop.f32.mrb[45].mxu1 }
 0x19f   : > { %v906_v5 = vpop.f32.mrb[46].mxu1 }
 0x1a0   : > { %v2562_v6 = vpop.f32.mrb[47].mxu1 }
 0x1a1   : > { %v694_v7 = vpop.f32.mrb[44].mxu0 }
 0x1a2   : > { %v3610_v8 = vadd.f32 %v903_v3, %v694_v7  ;;  %v2491_v10 = vpop.f32.mrb[45].mxu0 }
 0x1a3   : > { %v697_v11 = vpop.f32.mrb[46].mxu0 }
 0x1a4   : > { %v3612_v12 = vadd.f32 %v906_v5, %v697_v11  ;;  %v2492_v15 = vpop.f32.mrb[47].mxu0 }
 0x1a5   : > { %v911_v16 = vpop.f32.mrb[48].mxu1 }
 0x1a6   : > { %v2565_v17 = vpop.f32.mrb[49].mxu1 }
 0x1a7   : > { %v914_v18 = vpop.f32.mrb[50].mxu1 }
 0x1a8   : > { %v2566_v0 = vpop.f32.mrb[51].mxu1 }
 0x1a9   : > { %v702_v19 = vpop.f32.mrb[48].mxu0 }
 0x1aa   : > { %v3614_v23 = vadd.f32 %v911_v16, %v702_v19  ;;  %v2495_v24 = vpop.f32.mrb[49].mxu0 }
 0x1ab   : > { %v705_v26 = vpop.f32.mrb[50].mxu0 }
 0x1ac   : > { %v3616_v27 = vadd.f32 %v914_v18, %v705_v26  ;;  %v2496_v28 = vpop.f32.mrb[51].mxu0 }
 0x1ad   : > { %v919_v30 = vpop.f32.mrb[52].mxu1 }
 0x1ae   : > { %v2569_v31 = vpop.f32.mrb[53].mxu1 }
 0x1af   : > { %v922_v32 = vpop.f32.mrb[54].mxu1 }
 0x1b0   : > { %v2570_v35 = vpop.f32.mrb[55].mxu1 }
 0x1b1   : > { %v710_v36 = vpop.f32.mrb[52].mxu0 }
 0x1b2   : > { %v3618_v38 = vadd.f32 %v919_v30, %v710_v36  ;;  %v2499_v39 = vpop.f32.mrb[53].mxu0 }
 0x1b3   : > { %v713_v42 = vpop.f32.mrb[54].mxu0 }
 0x1b4   : > { %v3620_v43 = vadd.f32 %v922_v32, %v713_v42  ;;  %v2500_v44 = vpop.f32.mrb[55].mxu0 }
 0x1b5   : > { %v927_v45 = vpop.f32.mrb[56].mxu1 }
 0x1b6   : > { %v2573_v48 = vpop.f32.mrb[57].mxu1 }
 0x1b7   : > { %v930_v49 = vpop.f32.mrb[58].mxu1  ;;  %v3635_v48 = vld [vmem:[#allocation7] ss:$0 sm:$0xff] }
 0x1b8   : > { %v2574_v51 = vpop.f32.mrb[59].mxu1 }
 0x1b9   : > { %v718_v52 = vpop.f32.mrb[56].mxu0 }
 0x1ba   : > { %v3622_v54 = vadd.f32 %v927_v45, %v718_v52  ;;  %v2503_v55 = vpop.f32.mrb[57].mxu0 }
 0x1bb   : > { %v721_v56 = vpop.f32.mrb[58].mxu0 }
 0x1bc   : > { %v3624_v57 = vadd.f32 %v930_v49, %v721_v56  ;;  %v2504_v60 = vpop.f32.mrb[59].mxu0 }
 0x1bd   : > { %v935_v62 = vpop.f32.mrb[60].mxu1 }
 0x1be   : > { %v2577_v1 = vpop.f32.mrb[61].mxu1 }
 0x1bf   : > { %v938_v3 = vpop.f32.mrb[62].mxu1 }
 0x1c0   : > { %v2578_v4 = vpop.f32.mrb[63].mxu1 }
 0x1c1   : > { %v726_v5 = vpop.f32.mrb[60].mxu0 }
 0x1c2   : > { %v3626_v6 = vadd.f32 %v935_v62, %v726_v5  ;;  %v2507_v7 = vpop.f32.mrb[61].mxu0 }
 0x1c3   : > { %v729_v10 = vpop.f32.mrb[62].mxu0 }
 0x1c4   : > { %v3628_v11 = vadd.f32 %v938_v3, %v729_v10  ;;  %v2508_v15 = vpop.f32.mrb[63].mxu0 }
 0x1c5   : > { %v943_v16 = vpop.f32.mrb[64].mxu1 }
 0x1c6   : > { %v2581_v17 = vpop.f32.mrb[65].mxu1 }
 0x1c7   : > { %v946_v18 = vpop.f32.mrb[66].mxu1 }
 0x1c8   : > { %v2582_v0 = vpop.f32.mrb[67].mxu1 }
 0x1c9   : > { %v734_v19 = vpop.f32.mrb[64].mxu0 }
 0x1ca   : > { %v3630_v24 = vadd.f32 %v943_v16, %v734_v19  ;;  %v2511_v26 = vpop.f32.mrb[65].mxu0 }
 0x1cb   : > { %v737_v28 = vpop.f32.mrb[66].mxu0 }
 0x1cc   : > { %v3632_v30 = vadd.f32 %v946_v18, %v737_v28  ;;  %v2512_v31 = vpop.f32.mrb[67].mxu0 }
 0x1cd   : > { %v1610_v32 = vpop.f32.mrb[68].mxu1 }
 0x1ce   : > { %v2657_v35 = vpop.f32.mrb[69].mxu1 }
 0x1cf   : > { %v1613_v36 = vpop.f32.mrb[70].mxu1 }
 0x1d0   : > { %v2658_v39 = vpop.f32.mrb[71].mxu1 }
 0x1d1   : > { %v1307_v42 = vpop.f32.mrb[68].mxu0 }
 0x1d2   : > { %v1442_v44 = vadd.f32 %v1307_v42, %v3511_v22  ;;  %v2587_v45 = vpop.f32.mrb[69].mxu0 }
 0x1d3   : > { %v1310_v49 = vpop.f32.mrb[70].mxu0 }
 0x1d4   : > { %v1745_v51 = vadd.f32 %v1610_v32, %v1442_v44  ;;  %v1443_v52 = vadd.f32 %v1310_v49, %v3516_v29  ;;  %v2588_v55 = vpop.f32.mrb[71].mxu0 }
 0x1d5   : > { %v1618_v56 = vpop.f32.mrb[72].mxu1 }
 0x1d6   : > { %v2661_v60 = vpop.f32.mrb[73].mxu1  ;;  %v1786_v62 = vadd.f32 %v3635_v48, %v1745_v51  ;;  %v1746_v1 = vadd.f32 %v1613_v36, %v1443_v52 }
 0x1d7   : > { %v1621_v3 = vpop.f32.mrb[74].mxu1 }
 0x1d8   : > { %v2662_v4 = vpop.f32.mrb[75].mxu1  ;;  %v1820_v5 = vmul.f32 0.2, %v1786_v62  ;;  %v1787_v7 = vadd.f32 %v3635_v48, %v1746_v1 }
 0x1d9   : > { %v1315_v22 = vpop.f32.mrb[72].mxu0 }
 0x1da   : > { %v1854_v10 = vmax.f32 %v1786_v62, %v1820_v5  ;;  %v1821_v15 = vmul.f32 0.2, %v1787_v7  ;;  %v1444_v16 = vadd.f32 %v1315_v22, %v3524_v40  ;;  %v2591_v17 = vpop.f32.mrb[73].mxu0 }
 0x1db   : > { %v1318_v29 = vpop.f32.mrb[74].mxu0 }
 0x1dc   : > { %v2337_v18 = vpack.c.bf16 %v1854_v10, %v1854_v10  ;;  %v1855_v0 = vmax.f32 %v1787_v7, %v1821_v15  ;;  %v1747_v19 = vadd.f32 %v1618_v56, %v1444_v16  ;;  %v1445_v26 = vadd.f32 %v1318_v29, %v3529_v47  ;;  %v2592_v28 = vpop.f32.mrb[75].mxu0 }
 0x1dd   : > { %v1626_v31 = vpop.f32.mrb[76].mxu1 }
 0x1de   : > { %v2665_v32 = vpop.f32.mrb[77].mxu1  ;;  %2025 = vst.msk [vmem:[%s3643_s22] sm:$0xf] %vm2024_vm4, %v2337_v18  ;;  %v2338_v35 = vpack.c.bf16 %v1855_v0, %v1855_v0  ;;  %v1788_v40 = vadd.f32 %v3635_v48, %v1747_v19  ;;  %v1748_v36 = vadd.f32 %v1621_v3, %v1445_v26 }
 0x1df   : > { %v1629_v39 = vpop.f32.mrb[78].mxu1 }
 0x1e0   : > { %v2666_v42 = vpop.f32.mrb[79].mxu1  ;;  %2026 = vst.msk [vmem:[%s3643_s22 + $0x4] sm:$0xf] %vm2024_vm4, %v2338_v35  ;;  %v1822_v44 = vmul.f32 0.2, %v1788_v40  ;;  %v1789_v47 = vadd.f32 %v3635_v48, %v1748_v36 }
 0x1e1   : > { %v1323_v45 = vpop.f32.mrb[76].mxu0 }
 0x1e2   : > { %v1856_v49 = vmax.f32 %v1788_v40, %v1822_v44  ;;  %v1823_v51 = vmul.f32 0.2, %v1789_v47  ;;  %v1446_v52 = vadd.f32 %v1323_v45, %v3537_v58  ;;  %v2595_v55 = vpop.f32.mrb[77].mxu0 }
 0x1e3   : > { %v1326_v56 = vpop.f32.mrb[78].mxu0 }
 0x1e4   : > { %v2339_v60 = vpack.c.bf16 %v1856_v49, %v1856_v49  ;;  %v1857_v62 = vmax.f32 %v1789_v47, %v1823_v51  ;;  %v1749_v1 = vadd.f32 %v1626_v31, %v1446_v52  ;;  %v1447_v3 = vadd.f32 %v1326_v56, %v3542_v2  ;;  %v2596_v4 = vpop.f32.mrb[79].mxu0 }
 0x1e5   : > { %v1634_v5 = vpop.f32.mrb[80].mxu1 }
 0x1e6   : > { %v2669_v7 = vpop.f32.mrb[81].mxu1  ;;  %2027 = vst.msk [vmem:[%s3643_s22 + $0x8] sm:$0xf] %vm2024_vm4, %v2339_v60  ;;  %v2340_v22 = vpack.c.bf16 %v1857_v62, %v1857_v62  ;;  %v1790_v10 = vadd.f32 %v3635_v48, %v1749_v1  ;;  %v1750_v15 = vadd.f32 %v1629_v39, %v1447_v3 }
 0x1e7   : > { %v1637_v16 = vpop.f32.mrb[82].mxu1 }
 0x1e8   : > { %v2670_v17 = vpop.f32.mrb[83].mxu1  ;;  %2028 = vst.msk [vmem:[%s3643_s22 + $0xc] sm:$0xf] %vm2024_vm4, %v2340_v22  ;;  %v1824_v58 = vmul.f32 0.2, %v1790_v10  ;;  %v1791_v29 = vadd.f32 %v3635_v48, %v1750_v15 }
 0x1e9   : > { %v1331_v18 = vpop.f32.mrb[80].mxu0 }
 0x1ea   : > { %v1858_v0 = vmax.f32 %v1790_v10, %v1824_v58  ;;  %v1825_v2 = vmul.f32 0.2, %v1791_v29  ;;  %v1448_v19 = vadd.f32 %v1331_v18, %v3550_v13  ;;  %v2599_v26 = vpop.f32.mrb[81].mxu0 }
 0x1eb   : > { %v1334_v28 = vpop.f32.mrb[82].mxu0 }
 0x1ec   : > { %v2341_v31 = vpack.c.bf16 %v1858_v0, %v1858_v0  ;;  %v1859_v32 = vmax.f32 %v1791_v29, %v1825_v2  ;;  %v1751_v35 = vadd.f32 %v1634_v5, %v1448_v19  ;;  %v1449_v40 = vadd.f32 %v1334_v28, %v3555_v20  ;;  %v2600_v36 = vpop.f32.mrb[83].mxu0 }
 0x1ed   : > { %v1642_v39 = vpop.f32.mrb[84].mxu1 }
 0x1ee   : > { %v2673_v42 = vpop.f32.mrb[85].mxu1  ;;  %2029 = vst.msk [vmem:[%s3643_s22 + $0x10] sm:$0xf] %vm2024_vm4, %v2341_v31  ;;  %v2342_v44 = vpack.c.bf16 %v1859_v32, %v1859_v32  ;;  %v1792_v47 = vadd.f32 %v3635_v48, %v1751_v35  ;;  %v1752_v45 = vadd.f32 %v1637_v16, %v1449_v40 }
 0x1ef   : > { %v1645_v49 = vpop.f32.mrb[86].mxu1 }
 0x1f0   : > { %v2674_v51 = vpop.f32.mrb[87].mxu1  ;;  %2030 = vst.msk [vmem:[%s3643_s22 + $0x14] sm:$0xf] %vm2024_vm4, %v2342_v44  ;;  %v1826_v13 = vmul.f32 0.2, %v1792_v47  ;;  %v1793_v52 = vadd.f32 %v3635_v48, %v1752_v45 }
 0x1f1   : > { %v1339_v55 = vpop.f32.mrb[84].mxu0 }
 0x1f2   : > { %v1860_v56 = vmax.f32 %v1792_v47, %v1826_v13  ;;  %v1827_v20 = vmul.f32 0.2, %v1793_v52  ;;  %v1450_v60 = vadd.f32 %v1339_v55, %v3563_v33  ;;  %v2603_v62 = vpop.f32.mrb[85].mxu0 }
 0x1f3   : > { %v1342_v1 = vpop.f32.mrb[86].mxu0 }
 0x1f4   : > { %v2343_v3 = vpack.c.bf16 %v1860_v56, %v1860_v56  ;;  %v1861_v4 = vmax.f32 %v1793_v52, %v1827_v20  ;;  %v1753_v5 = vadd.f32 %v1642_v39, %v1450_v60  ;;  %v1451_v7 = vadd.f32 %v1342_v1, %v3568_v41  ;;  %v2604_v22 = vpop.f32.mrb[87].mxu0 }
 0x1f5   : > { %v1650_v10 = vpop.f32.mrb[88].mxu1 }
 0x1f6   : > { %v2677_v15 = vpop.f32.mrb[89].mxu1  ;;  %2031 = vst.msk [vmem:[%s3643_s22 + $0x18] sm:$0xf] %vm2024_vm4, %v2343_v3  ;;  %v2344_v16 = vpack.c.bf16 %v1861_v4, %v1861_v4  ;;  %v1794_v17 = vadd.f32 %v3635_v48, %v1753_v5  ;;  %v1754_v58 = vadd.f32 %v1645_v49, %v1451_v7 }
 0x1f7   : > { %v1653_v29 = vpop.f32.mrb[90].mxu1 }
 0x1f8   : > { %v2678_v18 = vpop.f32.mrb[91].mxu1  ;;  %2032 = vst.msk [vmem:[%s3643_s22 + $0x1c] sm:$0xf] %vm2024_vm4, %v2344_v16  ;;  %v1828_v33 = vmul.f32 0.2, %v1794_v17  ;;  %v1795_v0 = vadd.f32 %v3635_v48, %v1754_v58 }
 0x1f9   : > { %v1347_v2 = vpop.f32.mrb[88].mxu0 }
 0x1fa   : > { %v1862_v19 = vmax.f32 %v1794_v17, %v1828_v33  ;;  %v1829_v41 = vmul.f32 0.2, %v1795_v0  ;;  %v1452_v26 = vadd.f32 %v1347_v2, %v3576_v53  ;;  %v2607_v28 = vpop.f32.mrb[89].mxu0 }
 0x1fb   : > { %v1350_v31 = vpop.f32.mrb[90].mxu0 }
 0x1fc   : > { %v2345_v32 = vpack.c.bf16 %v1862_v19, %v1862_v19  ;;  %v1863_v35 = vmax.f32 %v1795_v0, %v1829_v41  ;;  %v1755_v40 = vadd.f32 %v1650_v10, %v1452_v26  ;;  %v1453_v36 = vadd.f32 %v1350_v31, %v3581_v61  ;;  %v2608_v39 = vpop.f32.mrb[91].mxu0 }
 0x1fd   : > { %v1658_v42 = vpop.f32.mrb[92].mxu1 }
 0x1fe   : > { %v2681_v44 = vpop.f32.mrb[93].mxu1  ;;  %2033 = vst.msk [vmem:[%s3643_s22 + $0x20] sm:$0xf] %vm2024_vm4, %v2345_v32  ;;  %v2346_v47 = vpack.c.bf16 %v1863_v35, %v1863_v35  ;;  %v1796_v45 = vadd.f32 %v3635_v48, %v1755_v40  ;;  %v1756_v49 = vadd.f32 %v1653_v29, %v1453_v36 }
 0x1ff   : > { %v1661_v51 = vpop.f32.mrb[94].mxu1 }
 0x200   : > { %v2682_v13 = vpop.f32.mrb[95].mxu1  ;;  %2034 = vst.msk [vmem:[%s3643_s22 + $0x24] sm:$0xf] %vm2024_vm4, %v2346_v47  ;;  %v1830_v53 = vmul.f32 0.2, %v1796_v45  ;;  %v1797_v52 = vadd.f32 %v3635_v48, %v1756_v49 }
 0x201   : > { %v1355_v55 = vpop.f32.mrb[92].mxu0 }
 0x202   : > { %v1864_v56 = vmax.f32 %v1796_v45, %v1830_v53  ;;  %v1831_v61 = vmul.f32 0.2, %v1797_v52  ;;  %v1454_v20 = vadd.f32 %v1355_v55, %v3588_v9  ;;  %v2611_v60 = vpop.f32.mrb[93].mxu0 }
 0x203   : > { %v1358_v62 = vpop.f32.mrb[94].mxu0 }
 0x204   : > { %v2347_v1 = vpack.c.bf16 %v1864_v56, %v1864_v56  ;;  %v1865_v3 = vmax.f32 %v1797_v52, %v1831_v61  ;;  %v1757_v4 = vadd.f32 %v1658_v42, %v1454_v20  ;;  %v1455_v5 = vadd.f32 %v1358_v62, %v3591_v14  ;;  %v2612_v7 = vpop.f32.mrb[95].mxu0 }
 0x205   : > { %v1666_v22 = vpop.f32.mrb[96].mxu1 }
 0x206   : > { %v2685_v10 = vpop.f32.mrb[97].mxu1  ;;  %2035 = vst.msk [vmem:[%s3643_s22 + $0x28] sm:$0xf] %vm2024_vm4, %v2347_v1  ;;  %v2348_v15 = vpack.c.bf16 %v1865_v3, %v1865_v3  ;;  %v1798_v16 = vadd.f32 %v3635_v48, %v1757_v4  ;;  %v1758_v17 = vadd.f32 %v1661_v51, %v1455_v5 }
 0x207   : > { %v1669_v58 = vpop.f32.mrb[98].mxu1 }
 0x208   : > { %v2686_v29 = vpop.f32.mrb[99].mxu1  ;;  %2036 = vst.msk [vmem:[%s3643_s22 + $0x2c] sm:$0xf] %vm2024_vm4, %v2348_v15  ;;  %v1832_v9 = vmul.f32 0.2, %v1798_v16  ;;  %v1799_v18 = vadd.f32 %v3635_v48, %v1758_v17 }
 0x209   : > { %v1363_v33 = vpop.f32.mrb[96].mxu0 }
 0x20a   : > { %v1866_v0 = vmax.f32 %v1798_v16, %v1832_v9  ;;  %v1833_v14 = vmul.f32 0.2, %v1799_v18  ;;  %v1456_v2 = vadd.f32 %v1363_v33, %v3594_v21  ;;  %v2615_v19 = vpop.f32.mrb[97].mxu0 }
 0x20b   : > { %v1366_v41 = vpop.f32.mrb[98].mxu0 }
 0x20c   : > { %v2349_v26 = vpack.c.bf16 %v1866_v0, %v1866_v0  ;;  %v1867_v28 = vmax.f32 %v1799_v18, %v1833_v14  ;;  %v1759_v31 = vadd.f32 %v1666_v22, %v1456_v2  ;;  %v1457_v32 = vadd.f32 %v1366_v41, %v3596_v25  ;;  %v2616_v35 = vpop.f32.mrb[99].mxu0 }
 0x20d   : > { %v1674_v40 = vpop.f32.mrb[100].mxu1 }
 0x20e   : > { %v2689_v36 = vpop.f32.mrb[101].mxu1  ;;  %2037 = vst.msk [vmem:[%s3643_s22 + $0x30] sm:$0xf] %vm2024_vm4, %v2349_v26  ;;  %v2350_v39 = vpack.c.bf16 %v1867_v28, %v1867_v28  ;;  %v1800_v42 = vadd.f32 %v3635_v48, %v1759_v31  ;;  %v1760_v44 = vadd.f32 %v1669_v58, %v1457_v32 }
 0x20f   : > { %v1677_v47 = vpop.f32.mrb[102].mxu1 }
 0x210   : > { %v2690_v45 = vpop.f32.mrb[103].mxu1  ;;  %2038 = vst.msk [vmem:[%s3643_s22 + $0x34] sm:$0xf] %vm2024_vm4, %v2350_v39  ;;  %v1834_v21 = vmul.f32 0.2, %v1800_v42  ;;  %v1801_v49 = vadd.f32 %v3635_v48, %v1760_v44 }
 0x211   : > { %v1371_v51 = vpop.f32.mrb[100].mxu0 }
 0x212   : > { %v1868_v13 = vmax.f32 %v1800_v42, %v1834_v21  ;;  %v1835_v25 = vmul.f32 0.2, %v1801_v49  ;;  %v1458_v53 = vadd.f32 %v1371_v51, %v3598_v34  ;;  %v2619_v52 = vpop.f32.mrb[101].mxu0 }
 0x213   : > { %v1374_v55 = vpop.f32.mrb[102].mxu0 }
 0x214   : > { %v2351_v56 = vpack.c.bf16 %v1868_v13, %v1868_v13  ;;  %v1869_v61 = vmax.f32 %v1801_v49, %v1835_v25  ;;  %v1761_v20 = vadd.f32 %v1674_v40, %v1458_v53  ;;  %v1459_v60 = vadd.f32 %v1374_v55, %v3600_v37  ;;  %v2620_v62 = vpop.f32.mrb[103].mxu0 }
 0x215   : > { %v1682_v1 = vpop.f32.mrb[104].mxu1 }
 0x216   : > { %v2693_v3 = vpop.f32.mrb[105].mxu1  ;;  %2039 = vst.msk [vmem:[%s3643_s22 + $0x38] sm:$0xf] %vm2024_vm4, %v2351_v56  ;;  %v2352_v4 = vpack.c.bf16 %v1869_v61, %v1869_v61  ;;  %v1802_v5 = vadd.f32 %v3635_v48, %v1761_v20  ;;  %v1762_v7 = vadd.f32 %v1677_v47, %v1459_v60 }
 0x217   : > { %v1685_v22 = vpop.f32.mrb[106].mxu1 }
 0x218   : > { %v2694_v10 = vpop.f32.mrb[107].mxu1  ;;  %2040 = vst.msk [vmem:[%s3643_s22 + $0x3c] sm:$0xf] %vm2024_vm4, %v2352_v4  ;;  %v1836_v34 = vmul.f32 0.2, %v1802_v5  ;;  %v1803_v15 = vadd.f32 %v3635_v48, %v1762_v7 }
 0x219   : > { %v1379_v16 = vpop.f32.mrb[104].mxu0 }
 0x21a   : > { %v1870_v17 = vmax.f32 %v1802_v5, %v1836_v34  ;;  %v1837_v37 = vmul.f32 0.2, %v1803_v15  ;;  %v1460_v58 = vadd.f32 %v1379_v16, %v3602_v46  ;;  %v2623_v29 = vpop.f32.mrb[105].mxu0 }
 0x21b   : > { %v1382_v9 = vpop.f32.mrb[106].mxu0 }
 0x21c   : > { %v2353_v18 = vpack.c.bf16 %v1870_v17, %v1870_v17  ;;  %v1871_v33 = vmax.f32 %v1803_v15, %v1837_v37  ;;  %v1763_v0 = vadd.f32 %v1682_v1, %v1460_v58  ;;  %v1461_v14 = vadd.f32 %v1382_v9, %v3604_v50  ;;  %v2624_v2 = vpop.f32.mrb[107].mxu0 }
 0x21d   : > { %v1690_v19 = vpop.f32.mrb[108].mxu1 }
 0x21e   : > { %v2697_v41 = vpop.f32.mrb[109].mxu1  ;;  %2041 = vst.msk [vmem:[%s3643_s22 + $0x40] sm:$0xf] %vm2024_vm4, %v2353_v18  ;;  %v2354_v26 = vpack.c.bf16 %v1871_v33, %v1871_v33  ;;  %v1804_v28 = vadd.f32 %v3635_v48, %v1763_v0  ;;  %v1764_v31 = vadd.f32 %v1685_v22, %v1461_v14 }
 0x21f   : > { %v1693_v32 = vpop.f32.mrb[110].mxu1 }
 0x220   : > { %v2698_v35 = vpop.f32.mrb[111].mxu1  ;;  %2042 = vst.msk [vmem:[%s3643_s22 + $0x44] sm:$0xf] %vm2024_vm4, %v2354_v26  ;;  %v1838_v46 = vmul.f32 0.2, %v1804_v28  ;;  %v1805_v40 = vadd.f32 %v3635_v48, %v1764_v31 }
 0x221   : > { %v1387_v36 = vpop.f32.mrb[108].mxu0 }
 0x222   : > { %v1872_v39 = vmax.f32 %v1804_v28, %v1838_v46  ;;  %v1839_v50 = vmul.f32 0.2, %v1805_v40  ;;  %v1462_v42 = vadd.f32 %v1387_v36, %v3606_v59  ;;  %v2627_v44 = vpop.f32.mrb[109].mxu0 }
 0x223   : > { %v1390_v47 = vpop.f32.mrb[110].mxu0 }
 0x224   : > { %v2355_v45 = vpack.c.bf16 %v1872_v39, %v1872_v39  ;;  %v1873_v21 = vmax.f32 %v1805_v40, %v1839_v50  ;;  %v1765_v49 = vadd.f32 %v1690_v19, %v1462_v42  ;;  %v1463_v51 = vadd.f32 %v1390_v47, %v3608_v63  ;;  %v2628_v13 = vpop.f32.mrb[111].mxu0 }
 0x225   : > { %v1698_v25 = vpop.f32.mrb[112].mxu1 }
 0x226   : > { %v2701_v53 = vpop.f32.mrb[113].mxu1  ;;  %2043 = vst.msk [vmem:[%s3643_s22 + $0x48] sm:$0xf] %vm2024_vm4, %v2355_v45  ;;  %v2356_v52 = vpack.c.bf16 %v1873_v21, %v1873_v21  ;;  %v1806_v55 = vadd.f32 %v3635_v48, %v1765_v49  ;;  %v1766_v56 = vadd.f32 %v1693_v32, %v1463_v51 }
 0x227   : > { %v1701_v61 = vpop.f32.mrb[114].mxu1 }
 0x228   : > { %v2702_v20 = vpop.f32.mrb[115].mxu1  ;;  %2044 = vst.msk [vmem:[%s3643_s22 + $0x4c] sm:$0xf] %vm2024_vm4, %v2356_v52  ;;  %v1840_v59 = vmul.f32 0.2, %v1806_v55  ;;  %v1807_v60 = vadd.f32 %v3635_v48, %v1766_v56 }
 0x229   : > { %v1395_v62 = vpop.f32.mrb[112].mxu0 }
 0x22a   : > { %v1874_v1 = vmax.f32 %v1806_v55, %v1840_v59  ;;  %v1841_v63 = vmul.f32 0.2, %v1807_v60  ;;  %v1464_v3 = vadd.f32 %v1395_v62, %v3610_v8  ;;  %v2631_v4 = vpop.f32.mrb[113].mxu0 }
 0x22b   : > { %v1398_v5 = vpop.f32.mrb[114].mxu0 }
 0x22c   : > { %v2357_v7 = vpack.c.bf16 %v1874_v1, %v1874_v1  ;;  %v1875_v22 = vmax.f32 %v1807_v60, %v1841_v63  ;;  %v1767_v10 = vadd.f32 %v1698_v25, %v1464_v3  ;;  %v1465_v34 = vadd.f32 %v1398_v5, %v3612_v12  ;;  %v2632_v15 = vpop.f32.mrb[115].mxu0 }
 0x22d   : > { %v1706_v16 = vpop.f32.mrb[116].mxu1 }
 0x22e   : > { %v2705_v17 = vpop.f32.mrb[117].mxu1  ;;  %2045 = vst.msk [vmem:[%s3643_s22 + $0x50] sm:$0xf] %vm2024_vm4, %v2357_v7  ;;  %v2358_v37 = vpack.c.bf16 %v1875_v22, %v1875_v22  ;;  %v1808_v58 = vadd.f32 %v3635_v48, %v1767_v10  ;;  %v1768_v29 = vadd.f32 %v1701_v61, %v1465_v34 }
 0x22f   : > { %v1709_v9 = vpop.f32.mrb[118].mxu1 }
 0x230   : > { %v2706_v18 = vpop.f32.mrb[119].mxu1  ;;  %2046 = vst.msk [vmem:[%s3643_s22 + $0x54] sm:$0xf] %vm2024_vm4, %v2358_v37  ;;  %v1842_v8 = vmul.f32 0.2, %v1808_v58  ;;  %v1809_v33 = vadd.f32 %v3635_v48, %v1768_v29 }
 0x231   : > { %v1403_v0 = vpop.f32.mrb[116].mxu0 }
 0x232   : > { %v1876_v14 = vmax.f32 %v1808_v58, %v1842_v8  ;;  %v1843_v12 = vmul.f32 0.2, %v1809_v33  ;;  %v1466_v2 = vadd.f32 %v1403_v0, %v3614_v23  ;;  %v2635_v19 = vpop.f32.mrb[117].mxu0 }
 0x233   : > { %v1406_v41 = vpop.f32.mrb[118].mxu0 }
 0x234   : > { %v2359_v26 = vpack.c.bf16 %v1876_v14, %v1876_v14  ;;  %v1877_v28 = vmax.f32 %v1809_v33, %v1843_v12  ;;  %v1769_v31 = vadd.f32 %v1706_v16, %v1466_v2  ;;  %v1467_v32 = vadd.f32 %v1406_v41, %v3616_v27  ;;  %v2636_v35 = vpop.f32.mrb[119].mxu0 }
 0x235   : > { %v1714_v46 = vpop.f32.mrb[120].mxu1 }
 0x236   : > { %v2709_v40 = vpop.f32.mrb[121].mxu1  ;;  %2047 = vst.msk [vmem:[%s3643_s22 + $0x58] sm:$0xf] %vm2024_vm4, %v2359_v26  ;;  %v2360_v36 = vpack.c.bf16 %v1877_v28, %v1877_v28  ;;  %v1810_v39 = vadd.f32 %v3635_v48, %v1769_v31  ;;  %v1770_v50 = vadd.f32 %v1709_v9, %v1467_v32 }
 0x237   : > { %v1717_v42 = vpop.f32.mrb[122].mxu1 }
 0x238   : > { %v2710_v44 = vpop.f32.mrb[123].mxu1  ;;  %2048 = vst.msk [vmem:[%s3643_s22 + $0x5c] sm:$0xf] %vm2024_vm4, %v2360_v36  ;;  %v1844_v23 = vmul.f32 0.2, %v1810_v39  ;;  %v1811_v47 = vadd.f32 %v3635_v48, %v1770_v50 }
 0x239   : > { %v1411_v45 = vpop.f32.mrb[120].mxu0 }
 0x23a   : > { %v1878_v21 = vmax.f32 %v1810_v39, %v1844_v23  ;;  %v1845_v27 = vmul.f32 0.2, %v1811_v47  ;;  %v1468_v49 = vadd.f32 %v1411_v45, %v3618_v38  ;;  %v2639_v51 = vpop.f32.mrb[121].mxu0 }
 0x23b   : > { %v1414_v13 = vpop.f32.mrb[122].mxu0 }
 0x23c   : > { %v2361_v25 = vpack.c.bf16 %v1878_v21, %v1878_v21  ;;  %v1879_v53 = vmax.f32 %v1811_v47, %v1845_v27  ;;  %v1771_v52 = vadd.f32 %v1714_v46, %v1468_v49  ;;  %v1469_v55 = vadd.f32 %v1414_v13, %v3620_v43  ;;  %v2640_v56 = vpop.f32.mrb[123].mxu0 }
 0x23d   : > { %v1722_v61 = vpop.f32.mrb[124].mxu1 }
 0x23e   : > { %v2713_v20 = vpop.f32.mrb[125].mxu1  ;;  %2049 = vst.msk [vmem:[%s3643_s22 + $0x60] sm:$0xf] %vm2024_vm4, %v2361_v25  ;;  %v2362_v59 = vpack.c.bf16 %v1879_v53, %v1879_v53  ;;  %v1812_v60 = vadd.f32 %v3635_v48, %v1771_v52  ;;  %v1772_v62 = vadd.f32 %v1717_v42, %v1469_v55 }
 0x23f   : > { %v1725_v1 = vpop.f32.mrb[126].mxu1 }
 0x240   : > { %v2714_v63 = vpop.f32.mrb[127].mxu1  ;;  %2050 = vst.msk [vmem:[%s3643_s22 + $0x64] sm:$0xf] %vm2024_vm4, %v2362_v59  ;;  %v1846_v38 = vmul.f32 0.2, %v1812_v60  ;;  %v1813_v3 = vadd.f32 %v3635_v48, %v1772_v62 }
 0x241   : > { %v1419_v4 = vpop.f32.mrb[124].mxu0 }
 0x242   : > { %v1880_v5 = vmax.f32 %v1812_v60, %v1846_v38  ;;  %v1847_v43 = vmul.f32 0.2, %v1813_v3  ;;  %v1470_v7 = vadd.f32 %v1419_v4, %v3622_v54  ;;  %v2643_v22 = vpop.f32.mrb[125].mxu0 }
 0x243   : > { %v1422_v10 = vpop.f32.mrb[126].mxu0 }
 0x244   : > { %v2363_v34 = vpack.c.bf16 %v1880_v5, %v1880_v5  ;;  %v1881_v15 = vmax.f32 %v1813_v3, %v1847_v43  ;;  %v1773_v16 = vadd.f32 %v1722_v61, %v1470_v7  ;;  %v1471_v17 = vadd.f32 %v1422_v10, %v3624_v57  ;;  %v2644_v37 = vpop.f32.mrb[127].mxu0 }
 0x245   : > { %v1730_v58 = vpop.f32.mrb[128].mxu1 }
 0x246   : > { %v2717_v29 = vpop.f32.mrb[129].mxu1  ;;  %2051 = vst.msk [vmem:[%s3643_s22 + $0x68] sm:$0xf] %vm2024_vm4, %v2363_v34  ;;  %v2364_v9 = vpack.c.bf16 %v1881_v15, %v1881_v15  ;;  %v1814_v18 = vadd.f32 %v3635_v48, %v1773_v16  ;;  %v1774_v8 = vadd.f32 %v1725_v1, %v1471_v17 }
 0x247   : > { %v1733_v33 = vpop.f32.mrb[130].mxu1 }
 0x248   : > { %v2718_v0 = vpop.f32.mrb[131].mxu1  ;;  %2052 = vst.msk [vmem:[%s3643_s22 + $0x6c] sm:$0xf] %vm2024_vm4, %v2364_v9  ;;  %v1848_v54 = vmul.f32 0.2, %v1814_v18  ;;  %v1815_v14 = vadd.f32 %v3635_v48, %v1774_v8 }
 0x249   : > { %v1427_v12 = vpop.f32.mrb[128].mxu0 }
 0x24a   : > { %v1882_v2 = vmax.f32 %v1814_v18, %v1848_v54  ;;  %v1849_v57 = vmul.f32 0.2, %v1815_v14  ;;  %v1472_v19 = vadd.f32 %v1427_v12, %v3626_v6  ;;  %v2647_v41 = vpop.f32.mrb[129].mxu0 }
 0x24b   : > { %v1430_v26 = vpop.f32.mrb[130].mxu0 }
 0x24c   : > { %v2365_v28 = vpack.c.bf16 %v1882_v2, %v1882_v2  ;;  %v1883_v31 = vmax.f32 %v1815_v14, %v1849_v57  ;;  %v1775_v32 = vadd.f32 %v1730_v58, %v1472_v19  ;;  %v1473_v35 = vadd.f32 %v1430_v26, %v3628_v11  ;;  %v2648_v46 = vpop.f32.mrb[131].mxu0 }
 0x24d   : > { %v1738_v40 = vpop.f32.mrb[132].mxu1 }
 0x24e   : > { %v2721_v36 = vpop.f32.mrb[133].mxu1  ;;  %2053 = vst.msk [vmem:[%s3643_s22 + $0x70] sm:$0xf] %vm2024_vm4, %v2365_v28  ;;  %v2366_v39 = vpack.c.bf16 %v1883_v31, %v1883_v31  ;;  %v1816_v50 = vadd.f32 %v3635_v48, %v1775_v32  ;;  %v1776_v42 = vadd.f32 %v1733_v33, %v1473_v35 }
 0x24f   : > { %v1741_v44 = vpop.f32.mrb[134].mxu1 }
 0x250   : > { %v2722_v6 = vpop.f32.mrb[135].mxu1  ;;  %2054 = vst.msk [vmem:[%s3643_s22 + $0x74] sm:$0xf] %vm2024_vm4, %v2366_v39  ;;  %v1850_v23 = vmul.f32 0.2, %v1816_v50  ;;  %v1817_v47 = vadd.f32 %v3635_v48, %v1776_v42 }
 0x251   : > { %v1435_v45 = vpop.f32.mrb[132].mxu0 }
 0x252   : > { %v1884_v11 = vmax.f32 %v1816_v50, %v1850_v23  ;;  %v1851_v21 = vmul.f32 0.2, %v1817_v47  ;;  %v1474_v27 = vadd.f32 %v1435_v45, %v3630_v24  ;;  %v2651_v49 = vpop.f32.mrb[133].mxu0 }
 0x253   : > { %v1438_v51 = vpop.f32.mrb[134].mxu0 }
 0x254   : > { %v2367_v13 = vpack.c.bf16 %v1884_v11, %v1884_v11  ;;  %v1885_v25 = vmax.f32 %v1817_v47, %v1851_v21  ;;  %v1777_v53 = vadd.f32 %v1738_v40, %v1474_v27  ;;  %v1475_v52 = vadd.f32 %v1438_v51, %v3632_v30  ;;  %v2652_v55 = vpop.f32.mrb[135].mxu0 }
 0x256   : > { %2055 = vst.msk [vmem:[%s3643_s22 + $0x78] sm:$0xf] %vm2024_vm4, %v2367_v13  ;;  %v2368_v56 = vpack.c.bf16 %v1885_v25, %v1885_v25  ;;  %v1818_v61 = vadd.f32 %v3635_v48, %v1777_v53  ;;  %v1778_v20 = vadd.f32 %v1741_v44, %v1475_v52 }
 0x258   : > { %2056 = vst.msk [vmem:[%s3643_s22 + $0x7c] sm:$0xf] %vm2024_vm4, %v2368_v56  ;;  %v1852_v24 = vmul.f32 0.2, %v1818_v61  ;;  %v1819_v59 = vadd.f32 %v3635_v48, %v1778_v20 }
 0x25a   : > { %v1886_v60 = vmax.f32 %v1818_v61, %v1852_v24  ;;  %v1853_v62 = vmul.f32 0.2, %v1819_v59 }
 0x25c   : > { %v2369_v30 = vpack.c.bf16 %v1886_v60, %v1886_v60  ;;  %v1887_v1 = vmax.f32 %v1819_v59, %v1853_v62 }
 0x25e   : > { %2057 = vst.msk [vmem:[%s3643_s22 + $0x80] sm:$0xf] %vm2024_vm4, %v2369_v30  ;;  %v2370_v63 = vpack.c.bf16 %v1887_v1, %v1887_v1 }
 0x260   : > { %2058 = vst.msk [vmem:[%s3643_s22 + $0x84] sm:$0xf] %vm2024_vm4, %v2370_v63 }
 0x261   : > { %2957 = shalt.err (!%p2954_p2)
}
 0x262   : > { %s2958_s28 = scalar_lea.hbm %s3776_s26, 2176  ;;  %s2962_s8 = scalar_lea.hbm %s3834_s3, 4352 }
 0x263   : > { %p2959_p0 = scmp.ne.s32.totalorder %s3776_s26, %s2958_s28  ;;  %p2963_p6 = scmp.lt.u32.totalorder %s3776_s26, %s3834_s3 }
 0x264   : > { %p2964_p7 = scmp.lt.u32.totalorder %s2962_s8, %s2958_s28  ;;  %p2966_p8 = scmp.lt.u32.totalorder %s2958_s28, %s3776_s26 }
 0x265   : > { %p2960_p4 = pnand %p2959_p0, %p3849_p12 }
 0x266   : > { %p2965_p11 = por %p2964_p7, %p2963_p6 }
 0x267   : > { %p2961_p13 = pneg %p2960_p4 }
 0x268   : > { %p2967_p1 = por %p2966_p8, %p2965_p11 }
 0x26a   : > { %p2968_p10 = pnand %p2967_p1, %p2961_p13 }
 0x26c   : > { %2971 = shalt.err (!%p2968_p10)
}
 0x26d   : > { %s3040_s22 = smov 64   ;;  %s3041_s24 = smov 4  }
 0x26e   : > { %2738 = dma.vmem_to_hbm [thread:$0]  (%p3849_p12), %s3778_s11, 2176, %s3776_s26, %s2060_s15, %s3040_s22, %s3040_s22, %s3041_s24  }
 0x26f PF: > { %s2089_s18 = sand.u32 1, %s3010_s12   ;;  %p3850_p3 = scmp.ne.s32.totalorder %s3842_s23, 0 }
 0x270   : > { %p3851_p5 = scmp.ge.s32.totalorder %s3030_s17, 2  ;;  %s2090_s5 = scalar_lea.sflag [#allocation4], %s2089_s18 }
 0x272   : > { %p2752_p9 = pnand %p3851_p5, %p3850_p3 }
 0x274   : > { %3005 = dma.done.wait (!%p2752_p9), %s2090_s5, 2176  }
 0x275   : > { %3007 = vsyncadd (!%p2752_p9), %s2090_s5, 4294965120  ;;  %s20_s17 = sadd.s32 1, %s3030_s17   ;;  %s3852_s12 = smov %s3014_s13 }
 0x276   : > { %p17_p2 = scmp.ge.s32.totalorder %s20_s17, 4   ;;  %s3853_s13 = smov %s3018_s14 }
 0x277   : > { %s3854_s14 = smov %s3211_s6  ;;  %s3855_s15 = smov %s3026_s16 }
 0x278   : > { %s3856_s16 = smov %s3858_s25  ;;  %19 = sbr.rel (!%p17_p2) target bundleno = 7 (0x7), region = 90 }
 0x27f   :  { %2095 = vsyncpa [#allocation3], 1 }
 0x280   :  { %2097 = vsyncpa [#allocation3 + $0x1], 1 }
 0x281   :  { %2098 = vsyncpa [#allocation6], 1 }
 0x282   :  { %2099 = vsyncpa [#allocation4], 1 }
 0x283   :  { %2101 = vsyncpa [#allocation4 + $0x1], 1 }

// kernel: _lambda_.5
= control target key start
LH: loop header
LB: loop body
LE: loop exit
PB: predicated region body
PF: predicated region fallthrough
CT: control target
= control target key end

     0   :  { %8 = vsyncpa [#allocation3], 0  ;;  %s2199_s0 = inlined_call_operand.hbm [shape: bf16[2,88,32], index: 0, kind: input, shape index: {}]   ;;  %s2200_s1 = inlined_call_operand.hbm [shape: bf16[4,32,16], index: 1, kind: input, shape index: {}]   ;;  %s2201_s2 = inlined_call_operand.hbm [shape: f32[72,1], index: 2, kind: input, shape index: {}]   ;;  %s2202_s3 = inlined_call_operand.hbm [shape: bf16[2,72,16], index: 3, kind: output, shape index: {}]  }
   0x1   :  { %10 = vsyncpa [#allocation3 + $0x1], 0 }
   0x2   :  { %11 = vsyncpa [#allocation6], 0 }
   0x3   :  { %12 = vsyncpa [#allocation4], 0 }
   0x4   :  { %14 = vsyncpa [#allocation4 + $0x1], 0  ;;  %s1734_s12 = smov 0   ;;  %s1736_s13 = smov 0  }
   0x5   :  { %s1738_s14 = smov 0   ;;  %s1740_s15 = smov 0  }
   0x6   :  { %s1742_s16 = smov 0   ;;  %s1744_s17 = smov 0  }
   0x7 LB: > { %s1162_s18 = sadd.s32 4294967295, %s1699_s17   ;;  %s1163_s19 = sadd.s32 4294967294, %s1699_s17   ;;  %s1699_s17 = sphi %s1744_s17, %s20_s17   ;;  %s1695_s16 = sphi %s1742_s16, %s2224_s16   ;;  %s1691_s15 = sphi %s1740_s15, %s2223_s15   ;;  %s1687_s14 = sphi %s1738_s14, %s2222_s14   ;;  %s1683_s13 = sphi %s1736_s13, %s2221_s13   ;;  %s1679_s12 = sphi %s1734_s12, %s2220_s12  }
   0x8   : > { %p52_p0 = scmp.ne.s32.totalorder %s1683_s13, %s1679_s12  ;;  %p1768_p1 = scmp.eq.s32.totalorder %s1162_s18, 0 }
   0x9   : > { %p1772_p2 = scmp.eq.s32.totalorder %s1162_s18, 1  ;;  %p131_p3 = scmp.eq.s32.totalorder %s1163_s19, 1 }
   0xa   : > { %s2207_s20 = scalar_select %p1768_p1, 1, 0 }
   0xb   : > { %p1778_p4 = por %p1768_p1, %p52_p0  ;;  %p1164_p5 = scmp.ge.s32.totalorder %s1699_s17, 1 }
   0xc   : > { %p1783_p6 = por %p131_p3, %p52_p0  ;;  %p138_p7 = scmp.lt.s32.totalorder %s1699_s17, 3 }
   0xd   : > { %s2209_s22 = scalar_select %p1778_p4, 1, 0 }
   0xe   : > { %s2210_s23 = scalar_select %p1783_p6, 1, 0 }
   0xf   : > { %p1788_p8 = pnand %p1164_p5, %p138_p7  ;;  %s1701_s25 = smov [#allocation5]  }
  0x10   : > { %s152_s26 = sshll.u32 %s1701_s25, 4  ;;  %s1702_s28 = smov [#allocation7]   ;;  %s1792_s26 = int_to_ptr.vmem [resolvable:$true] %s152_s26 }
  0x11   : > { %p1423_p9 = pneg %p1788_p8  ;;  %s165_s29 = sshll.u32 %s1702_s28, 4  ;;  %s1803_s29 = int_to_ptr.vmem [resolvable:$true] %s165_s29 }
  0x12   : > { %s1527_s5 = scalar_lea.hbm %s2200_s1, 1024 }
  0x13   : > { %p1799_p11 = pnand %p1423_p9, %p1768_p1  ;;  %p1528_p12 = scmp.ne.s32.totalorder %s2200_s1, %s1527_s5 }
  0x14   : > { %p1534_p5 = scmp.lt.u32.totalorder %s1527_s5, %s2200_s1 }
  0x15   : > { %p1529_p13 = pneg %p1799_p11 }
  0x17   : > { %p1530_p0 = pnand %p1529_p13, %p1528_p12 }
  0x19   : > { %p1531_p3 = pneg %p1530_p0 }
  0x1b   : > { %p1536_p7 = pnand %p1534_p5, %p1531_p3 }
  0x1d   : > { %1539 = shalt.err (!%p1536_p7)
}
  0x1e   : > { %s1540_s10 = scalar_lea.vmem %s1792_s26, 1024  ;;  %p1548_p1 = scmp.lt.s32.totalorder %s1792_s26, %s1792_s26 }
  0x1f   : > { %p1541_p9 = scmp.ne.s32.totalorder %s1792_s26, %s1540_s10  ;;  %p1549_p12 = scmp.lt.s32.totalorder %s1540_s10, %s1540_s10 }
  0x21   : > { %p1543_p10 = pnand %p1541_p9, %p1529_p13  ;;  %p1550_p0 = por %p1549_p12, %p1548_p1 }
  0x23   : > { %p1544_p6 = pneg %p1543_p10 }
  0x25   : > { %p1551_p4 = pnand %p1550_p0, %p1544_p6 }
  0x27   : > { %1554 = shalt.err (!%p1551_p4)
}
  0x28   : > { %s1703_s11 = smov 64   ;;  %s1704_s18 = smov 4  }
  0x29   : > { %1426 = dma.hbm_to_vmem [thread:$0]  (!%p1799_p11), %s2200_s1, 1024, %s1792_s26, [#allocation6], %s1703_s11, %s1703_s11, %s1704_s18  }
  0x2a   : > { %s1555_s4 = scalar_lea.hbm %s2201_s2, 1152 }
  0x2b   : > { %p1556_p1 = scmp.ne.s32.totalorder %s2201_s2, %s1555_s4  ;;  %p1562_p10 = scmp.lt.u32.totalorder %s1555_s4, %s2201_s2 }
  0x2d   : > { %p1558_p4 = pnand %p1556_p1, %p1529_p13 }
  0x2f   : > { %p1559_p6 = pneg %p1558_p4 }
  0x31   : > { %p1564_p3 = pnand %p1562_p10, %p1559_p6 }
  0x33   : > { %1567 = shalt.err (!%p1564_p3)
}
  0x34   : > { %s1568_s26 = scalar_lea.vmem %s1803_s29, 1152  ;;  %p1576_p12 = scmp.lt.s32.totalorder %s1803_s29, %s1803_s29 }
  0x35   : > { %p1569_p5 = scmp.ne.s32.totalorder %s1803_s29, %s1568_s26  ;;  %p1577_p0 = scmp.lt.s32.totalorder %s1568_s26, %s1568_s26 }
  0x37   : > { %p1571_p7 = pnand %p1569_p5, %p1529_p13  ;;  %p1578_p1 = por %p1577_p0, %p1576_p12 }
  0x39   : > { %p1572_p9 = pneg %p1571_p7 }
  0x3b   : > { %p1579_p4 = pnand %p1578_p1, %p1572_p9 }
  0x3d   : > { %1582 = shalt.err (!%p1579_p4)
}
  0x3e   : > { %s1705_s9 = smov 128   ;;  %s1706_s10 = smov 8  }
  0x3f   : > { %1429 = dma.hbm_to_vmem [thread:$0]  (!%p1799_p11), %s2201_s2, 1152, %s1803_s29, [#allocation6], %s1705_s9, %s1705_s9, %s1706_s10  }
  0x40   : > { %s32_s28 = sadd.s32 1, %s1695_s16  ;;  %s39_s30 = sadd.s32 1, %s1687_s14 }
  0x41   : > { %p34_p13 = scmp.ge.s32.totalorder %s32_s28, 2  ;;  %p46_p6 = scmp.ne.s32.totalorder %s1687_s14, %s1683_s13 }
  0x42   : > { %p47_p10 = scmp.eq.s32.totalorder %s1699_s17, 0  ;;  %p1440_p3 = scmp.lt.s32.totalorder %s1699_s17, 2 }
  0x43   : > { %s2226_s28 = smov (%p34_p13, %s32_s28), 0  ;;  %p1870_p7 = por %p1772_p2, %p46_p6 }
  0x44   : > { %p48_p5 = por %p47_p10, %p46_p6  ;;  %s36_s27 = ssub.s32 %s1695_s16, %s2226_s28 }
  0x45   : > { %s2213_s4 = scalar_select %p1870_p7, 1, 0 }
  0x46   : > { %s179_s5 = sand.u32 1, %s1687_s14   ;;  %p37_p9 = scmp.eq.s32.totalorder %s36_s27, 0 }
  0x47   : > { %s1406_s29 = smul.u32 44, %s179_s5  ;;  %p1877_p11 = pnand %p1440_p3, %p48_p5 }
  0x48   : > { %s1882_s7 = scalar_select %p37_p9, %s1687_s14, %s39_s30  }
  0x49   : > { %s1407_s8 = smul.u32 704, %s1695_s16  ;;  %s183_s26 = scalar_lea.vmem [#allocation2], %s1406_s29 }
  0x4a   : > { %s190_s9 = sshll.u32 %s183_s26, 4  ;;  %s1892_s25 = scalar_lea.sflag [#allocation3], %s179_s5  ;;  %s1890_s9 = int_to_ptr.vmem [resolvable:$true] %s190_s9 }
  0x4b   : > { %s1888_s19 = scalar_lea.hbm %s2199_s0, %s1407_s8  ;;  %p1585_p12 = pneg %p1877_p11 }
  0x4c   : > { %s1583_s27 = scalar_lea.hbm %s1888_s19, 704  ;;  %s1588_s8 = scalar_lea.hbm %s2199_s0, 1408 }
  0x4d   : > { %p1584_p2 = scmp.ne.s32.totalorder %s1888_s19, %s1583_s27  ;;  %p1589_p4 = scmp.lt.u32.totalorder %s1888_s19, %s2199_s0 }
  0x4e   : > { %p1590_p13 = scmp.lt.u32.totalorder %s1588_s8, %s1583_s27  ;;  %p1592_p10 = scmp.lt.u32.totalorder %s1583_s27, %s1888_s19 }
  0x4f   : > { %p1586_p0 = pnand %p1585_p12, %p1584_p2 }
  0x50   : > { %p1591_p6 = por %p1590_p13, %p1589_p4 }
  0x51   : > { %p1587_p1 = pneg %p1586_p0 }
  0x52   : > { %p1593_p3 = por %p1592_p10, %p1591_p6 }
  0x54   : > { %p1594_p5 = pnand %p1593_p3, %p1587_p1 }
  0x56   : > { %1597 = shalt.err (!%p1594_p5)
}
  0x57   : > { %s1598_s5 = scalar_lea.vmem %s1890_s9, 704  ;;  %s1707_s10 = smov [#allocation2]  }
  0x58   : > { %p1599_p9 = scmp.ne.s32.totalorder %s1890_s9, %s1598_s5  ;;  %s1603_s30 = sshll.u32 %s1707_s10, 4  ;;  %s1604_s30 = int_to_ptr.vmem [resolvable:$false] %s1603_s30 }
  0x59   : > { %s1605_s29 = scalar_lea.vmem %s1604_s30, 1408  ;;  %p1606_p7 = scmp.lt.s32.totalorder %s1890_s9, %s1604_s30 }
  0x5a   : > { %p1601_p2 = pnand %p1599_p9, %p1585_p12  ;;  %p1607_p4 = scmp.lt.s32.totalorder %s1605_s29, %s1598_s5 }
  0x5c   : > { %p1602_p0 = pneg %p1601_p2  ;;  %p1608_p13 = por %p1607_p4, %p1606_p7 }
  0x5e   : > { %p1609_p6 = pnand %p1608_p13, %p1602_p0 }
  0x60   : > { %1612 = shalt.err (!%p1609_p6)
}
  0x61   : > { %1433 = dma.hbm_to_vmem [thread:$0]  (!%p1877_p11), %s1888_s19, 704, %s1890_s9, %s1892_s25, %s1703_s11, %s1703_s11, %s1704_s18  }
  0x62   : > { %202 = sbr.rel (%p1788_p8) target bundleno = 474 (0x1da), region = 32  ;;  %s1926_s27 = sand.u32 (!%p1788_p8), 1, %s1683_s13  }
  0x63   : > { %s1408_s8 = smul.u32 (!%p1788_p8), 44, %s1926_s27  ;;  %s205_s26 = scalar_lea.sflag (!%p1788_p8), [#allocation3], %s1926_s27 }
  0x64   : > { %p2215_p7 = scmp.ne.s32.totalorder (!%p1788_p8), %s2209_s22, 0 }
  0x65   : > { %s1930_s21 = scalar_lea.vmem (!%p1788_p8), [#allocation2], %s1408_s8 }
  0x69   : > { %1666 = dma.done.wait (%p2215_p7), %s205_s26, 704  }
  0x6a   : > { %1668 = vsyncadd (%p2215_p7), %s205_s26, 4294966592  ;;  %p2216_p11 = scmp.ne.s32.totalorder %s2207_s20, 0 }
  0x6c   : > { %1670 = dma.done.wait (%p2216_p11), [#allocation6], 2176  }
  0x6d   : > { %1672 = vsyncadd (%p2216_p11), [#allocation6], 4294965120  ;;  %v1708_v0 = vmov 0.0   ;;  %vm1709_vm0 = vmmov 0   ;;  %v1710_v1 = vmov 0   ;;  %v1505_v2 = vld [vmem:[#allocation5 + $0x10] sm:$0xff]  }
  0x6e   : > { %1261 = vmatprep.subr.bf16.mxu1 %v1708_v0  ;;  %1309 = vmatprep.subr.bf16.mxu0 %v1708_v0  ;;  %v1506_v3 = vld [vmem:[#allocation5 + $0x20] sm:$0xff]   ;;  %v1507_v4 = vld [vmem:[#allocation5 + $0x18] sm:$0xff]   ;;  %v1508_v5 = vld [vmem:[#allocation5 + $0x28] sm:$0xff]   ;;  %vm284_vm1 = vsmask.f32 7424  ;;  %vm336_vm2 = vcmask 261120  }
  0x6f   : > { %1265 = vmatprep.mubr.msk.bf16.mxu1 %vm1709_vm0, %v1708_v0  ;;  %1313 = vmatprep.mubr.msk.bf16.mxu0 %vm1709_vm0, %v1708_v0  ;;  %v1949_v6 = vld [vmem:[%s1930_s21] sm:$0xff]   ;;  %v1952_v7 = vld [vmem:[%s1930_s21 + $0x8] sm:$0xff]   ;;  %v1970_v24 = vld [vmem:[%s1930_s21 + $0x10] sm:$0xff]   ;;  %vm716_vm3 = vcmask 1046528   ;;  %vm897_vm4 = vcmask 130048   ;;  %s1409_s20 = smul.u32 36, %s1926_s27 }
  0x70   : > { %1503 = vset.pattern.permute.xlu0 %v1710_v1  ;;  %1504 = vset.pattern.permute.xlu1 %v1710_v1  ;;  %v520_v8 = vld [vmem:[%s1930_s21 + $0x4] sm:$0xf]  ;;  %v1956_v9 = vld [vmem:[%s1930_s21 + $0x8] sm:$0xf]  ;;  %v286_v10 = vshrl.u32 %v1949_v6, 16  ;;  %v288_v11 = vshll.u32 %v1949_v6, 16 }
  0x71   : > { %1262 = vmatpush3.bf16.msra.mxu1 %v1505_v2  ;;  %1310 = vmatpush3.bf16.msra.mxu0 %v1506_v3  ;;  %v293_v12 = vshll.u32 %v1952_v7, 16  ;;  %v1192_v13 = vcombine.low %v520_v8, %v1956_v9  ;;  %v1964_v14 = vld [vmem:[%s1930_s21 + $0xc] sm:$0xff]   ;;  %v297_v21 = vshrl.u32 %v1952_v7, 16  ;;  %v1973_v27 = vld [vmem:[%s1930_s21 + $0x14] sm:$0xff]   ;;  %v301_v30 = vshll.u32 %v1970_v24, 16  ;;  %v1991_v40 = vld [vmem:[%s1930_s21 + $0x1c] sm:$0xff]  }
  0x72   : > { %1263 = vmatprep.subr.bf16.mxu1 %v1708_v0  ;;  %1311 = vmatprep.subr.bf16.mxu0 %v1708_v0  ;;  %v290_v15 = vrot.slane %v288_v11, 1  ;;  %v1513_v19 = vld [vmem:[#allocation5] sm:$0xff]   ;;  %v568_v20 = vshll.u32 %v1964_v14, 16  ;;  %v1514_v26 = vld [vmem:[#allocation5 + $0x30] sm:$0xff]   ;;  %v572_v31 = vshrl.u32 %v1964_v14, 16  ;;  %v576_v32 = vshll.u32 %v1973_v27, 16 }
  0x73   : > { %v295_v16 = vrot.slane %v293_v12, 1  ;;  %v561_v17 = vshrl.u32 %v1192_v13, 16  ;;  %v563_v18 = vshll.u32 %v1192_v13, 16  ;;  %v303_v35 = vrot.slane %v301_v30, 1  ;;  %v1984_v36 = vld [vmem:[%s1930_s21 + $0x18] sm:$0xff]   ;;  %v1520_v41 = vld [vmem:[#allocation5 + $0x38] sm:$0xff]  }
  0x74   : > { %v291_v22 = vor.u32 %v290_v15, %v286_v10  ;;  %v570_v25 = vrot.slane %v568_v20, 1  ;;  %v1519_v37 = vld [vmem:[#allocation5 + $0x8] sm:$0xff]   ;;  %v578_v39 = vrot.slane %v576_v32, 1  ;;  %v305_v43 = vshrl.u32 %v1970_v24, 16  ;;  %v834_v47 = vld [vmem:[#allocation7] sm:$0xff]  ;;  %v836_v51 = vld [vmem:[#allocation7 + $0x10] sm:$0xff] }
  0x75   : > { %1264 = vmatpush3.bf16.msra.mxu1 %v1507_v4  ;;  %1312 = vmatpush3.bf16.msra.mxu0 %v1508_v5  ;;  %v565_v23 = vrot.slane %v563_v18, 1  ;;  %v299_v34 = vor.u32 %v297_v21, %v295_v16  ;;  %v309_v44 = vshll.u32 %v1984_v36, 16  ;;  %v1998_v45 = vld [vmem:[%s1930_s21 + $0x20] sm:$0xf]  ;;  %v253_v46 = vld [vmem:[%s1930_s21 + $0x24] sm:$0x1] }
  0x76   : > { %1285 = vmatprep.subr.bf16.mxu1 %v1708_v0  ;;  %1333 = vmatprep.subr.bf16.mxu0 %v1708_v0  ;;  %v296_v28 = vsel %vm284_vm1, %v291_v22, %v295_v16  ;;  %v574_v38 = vor.u32 %v572_v31, %v570_v25  ;;  %v580_v49 = vshrl.u32 %v1973_v27, 16  ;;  %v584_v50 = vshll.u32 %v1991_v40, 16  ;;  %v835_v55 = vld [vmem:[#allocation7 + $0x8] sm:$0xff]  ;;  %v837_v56 = vld [vmem:[#allocation7 + $0x18] sm:$0xff]  ;;  %v838_v63 = vld [vmem:[#allocation7 + $0x20] sm:$0xff]  ;;  %s1410_s22 = smul.u32 576, %s1691_s15 }
  0x77   : > { %v566_v29 = vor.u32 %v565_v23, %v561_v17  ;;  %v304_v42 = vsel %vm284_vm1, %v299_v34, %v303_v35  ;;  %845 = vperm.xlu0 %1503, %v834_v47   ;;  %855 = vperm.xlu1 %1504, %v836_v51   ;;  %v307_v52 = vor.u32 %v305_v43, %v303_v35  ;;  %v311_v53 = vrot.slane %v309_v44, 1  ;;  %v2012_v59 = vld [vmem:[%s1930_s21 + $0x24] sm:$0x1f]   ;;  %v842_v16 = vld [vmem:[#allocation7 + $0x40] sm:$0xff]  ;;  %s238_s24 = scalar_lea.vmem [#allocation8], %s1409_s20  ;;  %s1044_s15 = scalar_lea.sflag [#allocation4], %s1926_s27 }
  0x78   : > { %1266 = vmatmul.mubr.msk.bf16.vlgmr.msra.gmra.mrb[0].mxu1 %vm336_vm2, %v296_v28  ;;  %v579_v48 = vsel %vm284_vm1, %v574_v38, %v578_v39  ;;  %v1176_v54 = vcombine.low %v1998_v45, %v253_v46  ;;  %v582_v57 = vor.u32 %v580_v49, %v578_v39  ;;  %v586_v58 = vrot.slane %v584_v50, 1  ;;  %v839_v1 = vld [vmem:[#allocation7 + $0x28] sm:$0xff]  ;;  %v840_v10 = vld [vmem:[#allocation7 + $0x30] sm:$0xff]  ;;  %v841_v11 = vld [vmem:[#allocation7 + $0x38] sm:$0xff]  ;;  %s1058_s11 = sshll.u32 %s238_s24, 4  ;;  %s2139_s9 = scalar_lea.hbm %s2202_s3, %s1410_s22  ;;  %s2141_s11 = int_to_ptr.vmem [resolvable:$true] %s1058_s11 }
  0x79   : > { %v571_v33 = vsel %vm284_vm1, %v566_v29, %v570_v25  ;;  %1286 = vmatpush3.bf16.msra.mxu1 %v1513_v19  ;;  %1269 = vmatprep.mubr.msk.bf16.mxu1 %vm1709_vm0, %v1708_v0  ;;  %v312_v60 = vsel %vm284_vm1, %v307_v52, %v311_v53  ;;  %v313_v61 = vshrl.u32 %v1984_v36, 16  ;;  %v588_v3 = vshrl.u32 %v1991_v40, 16  ;;  %v707_v21 = vld [vmem:[%s1930_s21 + $0x4] sm:$0xe]  ;;  %s1613_s19 = scalar_lea.vmem %s2141_s11, 576  ;;  %p2217_p12 = scmp.ne.s32.totalorder %s2213_s4, 0 }
  0x7a   : > { %1314 = vmatmul.mubr.msk.bf16.vlgmr.msra.gmra.mrb[0].mxu0 %vm336_vm2, %v571_v33  ;;  %1287 = vmatprep.subr.bf16.mxu1 %v1708_v0  ;;  %v317_v62 = vshll.u32 %v1176_v54, 16  ;;  %v587_v2 = vsel %vm284_vm1, %v582_v57, %v586_v58  ;;  %v592_v4 = vshll.u32 %v2012_v59, 16  ;;  %v321_v18 = vshrl.u32 %v1176_v54, 16  ;;  %p1614_p8 = scmp.ne.s32.totalorder %s2141_s11, %s1613_s19  ;;  %s1711_s25 = smov [#allocation8]  }
  0x7b   : > { %1334 = vmatpush3.bf16.msra.mxu0 %v1514_v26  ;;  %1317 = vmatprep.mubr.msk.bf16.mxu0 %vm1709_vm0, %v1708_v0  ;;  %v315_v5 = vor.u32 %v313_v61, %v311_v53  ;;  %v590_v12 = vor.u32 %v588_v3, %v586_v58  ;;  %v596_v19 = vshrl.u32 %v2012_v59, 16  ;;  %v1204_v23 = vcombine.low %v707_v21, %v1956_v9  ;;  %s1617_s5 = sshll.u32 %s1711_s25, 4  ;;  %s1618_s5 = int_to_ptr.vmem [resolvable:$false] %s1617_s5 }
  0x7c   : > { %1335 = vmatprep.subr.bf16.mxu0 %v1708_v0  ;;  %850 = vperm.xlu0 %1503, %v835_v55   ;;  %v319_v8 = vrot.slane %v317_v62, 1  ;;  %v594_v13 = vrot.slane %v592_v4, 1  ;;  %v718_v26 = vrot.slane %v1964_v14, 1  ;;  %v720_v9 = vrot.slane %v1973_v27, 1  ;;  %p1615_p1 = pnand %p1614_p8, %p2217_p12  ;;  %s1619_s10 = scalar_lea.vmem %s1618_s5, 1152 }
  0x7d   : > { %1288 = vmatpush3.bf16.msra.mxu1 %v1519_v37  ;;  %860 = vperm.xlu1 %1504, %v837_v56   ;;  %v717_v25 = vrot.slane %v1204_v23, 1  ;;  %vm1033_vm5 = vcmask 125952   ;;  %p1620_p3 = scmp.lt.s32.totalorder %s2141_s11, %s1618_s5  ;;  %p1621_p5 = scmp.lt.s32.totalorder %s1619_s10, %s1613_s19 }
  0x7e   : > { %v320_v15 = vsel %vm284_vm1, %v315_v5, %v319_v8  ;;  %v595_v17 = vsel %vm284_vm1, %v590_v12, %v594_v13  ;;  %v323_v20 = vor.u32 %v321_v18, %v319_v8  ;;  %v598_v22 = vor.u32 %v596_v19, %v594_v13  ;;  %p1616_p10 = pneg %p1615_p1 }
  0x7f   : > { %1336 = vmatpush3.bf16.msra.mxu0 %v1520_v41  ;;  %v719_v28 = vsel %vm716_vm3, %v717_v25, %v718_v26  ;;  %v721_v29 = vsel %vm716_vm3, %v718_v26, %v720_v9  ;;  %p1622_p9 = por %p1621_p5, %p1620_p3 }
  0x80   : > { %1270 = vmatmul.mubr.msk.bf16.gmra.mrb[4].mxu1 %vm336_vm2, %v304_v42  ;;  %865 = vperm.xlu0 %1503, %v838_v63  }
  0x81   : > { %1273 = vmatprep.mubr.msk.bf16.mxu1 %vm1709_vm0, %v1708_v0  ;;  %870 = vperm.xlu1 %1504, %v839_v1   ;;  %p1623_p2 = pnand %p1622_p9, %p1616_p10 }
  0x82   : > { %1318 = vmatmul.mubr.msk.bf16.gmra.mrb[4].mxu0 %vm336_vm2, %v579_v48 }
  0x83   : > { %1321 = vmatprep.mubr.msk.bf16.mxu0 %vm1709_vm0, %v1708_v0 }
  0x84   : > { %875 = vperm.xlu0 %1503, %v840_v10  }
  0x85   : > { %880 = vperm.xlu1 %1504, %v841_v11  }
  0x88   : > { %1274 = vmatmul.mubr.msk.bf16.gmra.mrb[8].mxu1 %vm336_vm2, %v312_v60  ;;  %885 = vperm.xlu0 %1503, %v842_v16  }
  0x89   : > { %1277 = vmatprep.mubr.msk.bf16.mxu1 %vm1709_vm0, %v1708_v0 }
  0x8a   : > { %1322 = vmatmul.mubr.msk.bf16.gmra.mrb[8].mxu0 %vm336_vm2, %v587_v2 }
  0x8b   : > { %1325 = vmatprep.mubr.msk.bf16.mxu0 %vm1709_vm0, %v1708_v0 }
  0x90   : > { %1278 = vmatmul.mubr.msk.bf16.gmra.mrb[12].mxu1 %vm336_vm2, %v320_v15 }
  0x91   : > { %1281 = vmatprep.mubr.msk.bf16.mxu1 %vm1709_vm0, %v1708_v0 }
  0x92   : > { %1326 = vmatmul.mubr.msk.bf16.gmra.mrb[12].mxu0 %vm336_vm2, %v595_v17 }
  0x93   : > { %1329 = vmatprep.mubr.msk.bf16.mxu0 %vm1709_vm0, %v1708_v0 }
  0x98   : > { %1282 = vmatmul.mubr.msk.bf16.gmra.mrb[16].mxu1 %vm336_vm2, %v323_v20 }
  0x99   : > { %1289 = vmatprep.mubr.msk.bf16.mxu1 %vm1709_vm0, %v1708_v0 }
  0x9a   : > { %1330 = vmatmul.mubr.msk.bf16.gmra.mrb[16].mxu0 %vm336_vm2, %v598_v22 }
  0x9b   : > { %1337 = vmatprep.mubr.msk.bf16.mxu0 %vm1709_vm0, %v1708_v0 }
  0xa0   : > { %1290 = vmatmul.mubr.msk.bf16.vlgmr.msra.gmra.mrb[0].mxu1 %vm336_vm2, %v1949_v6  ;;  %v722_v6 = vrot.slane %v1991_v40, 1 }
  0xa1   : > { %1293 = vmatprep.mubr.msk.bf16.mxu1 %vm1709_vm0, %v1708_v0 }
  0xa2   : > { %1338 = vmatmul.mubr.msk.bf16.vlgmr.msra.gmra.mrb[0].mxu0 %vm336_vm2, %v719_v28  ;;  %v723_v14 = vsel %vm716_vm3, %v720_v9, %v722_v6 }
  0xa3   : > { %1341 = vmatprep.mubr.msk.bf16.mxu0 %vm1709_vm0, %v1708_v0 }
  0xa8   : > { %1294 = vmatmul.mubr.msk.bf16.gmra.mrb[4].mxu1 %vm336_vm2, %v1952_v7  ;;  %v724_v7 = vrot.slane %v2012_v59, 1 }
  0xa9   : > { %1297 = vmatprep.mubr.msk.bf16.mxu1 %vm1709_vm0, %v1708_v0 }
  0xaa   : > { %1342 = vmatmul.mubr.msk.bf16.gmra.mrb[4].mxu0 %vm336_vm2, %v721_v29  ;;  %v725_v27 = vsel %vm716_vm3, %v722_v6, %v724_v7 }
  0xab   : > { %1345 = vmatprep.mubr.msk.bf16.mxu0 %vm1709_vm0, %v1708_v0 }
  0xb0   : > { %1298 = vmatmul.mubr.msk.bf16.gmra.mrb[8].mxu1 %vm336_vm2, %v1970_v24  ;;  %v1184_v24 = vcombine.low %v1998_v45, %v1998_v45 }
  0xb1   : > { %1301 = vmatprep.mubr.msk.bf16.mxu1 %vm1709_vm0, %v1708_v0 }
  0xb2   : > { %1346 = vmatmul.mubr.msk.bf16.gmra.mrb[8].mxu0 %vm336_vm2, %v723_v14 }
  0xb3   : > { %1349 = vmatprep.mubr.msk.bf16.mxu0 %vm1709_vm0, %v1708_v0 }
  0xb8   : > { %1302 = vmatmul.mubr.msk.bf16.gmra.mrb[12].mxu1 %vm336_vm2, %v1984_v36 }
  0xb9   : > { %1305 = vmatprep.mubr.msk.bf16.mxu1 %vm1709_vm0, %v1708_v0 }
  0xba   : > { %1350 = vmatmul.mubr.msk.bf16.gmra.mrb[12].mxu0 %vm336_vm2, %v725_v27 }
  0xbb   : > { %1353 = vmatprep.mubr.msk.bf16.mxu0 %vm1709_vm0, %v1708_v0 }
  0xc0   : > { %1306 = vmatmul.mubr.msk.bf16.gmra.mrb[16].mxu1 %vm336_vm2, %v1184_v24 }
  0xc2   : > { %1354 = vmatmul.mubr.msk.bf16.gmra.mrb[16].mxu0 %vm336_vm2, %v724_v7 }
  0xf6   : > { %v846_v30 = vpop.permute.xlu0 %845  ;;  %v856_v42 = vpop.permute.xlu1 %855 }
  0xfb   : > { %v851_v39 = vpop.permute.xlu0 %850 }
  0xfc   : > { %v861_v60 = vpop.permute.xlu1 %860 }
  0xff   : > { %v866_v22 = vpop.permute.xlu0 %865 }
 0x100   : > { %v871_v29 = vpop.permute.xlu1 %870 }
 0x173   : > { %v482_v31 = vpop.f32.mrb[0].mxu1 }
 0x174   : > { %v1291_v32 = vpop.f32.mrb[1].mxu1 }
 0x175   : > { %v787_v33 = vpop.f32.mrb[0].mxu0  ;;  %v485_v34 = vpop.f32.mrb[2].mxu1 }
 0x176   : > { %v2082_v35 = vadd.f32 %v787_v33, %v482_v31  ;;  %v1339_v36 = vpop.f32.mrb[1].mxu0  ;;  %v1292_v37 = vpop.f32.mrb[3].mxu1 }
 0x177   : > { %v790_v38 = vpop.f32.mrb[2].mxu0 }
 0x178   : > { %v888_v0 = vmul.f32 %v2082_v35, %v846_v30  ;;  %v2085_v40 = vadd.f32 %v790_v38, %v485_v34  ;;  %v1340_v41 = vpop.f32.mrb[3].mxu0 }
 0x17a   : > { %v922_v43 = vmul.f32 %v888_v0, %v888_v0  ;;  %v889_v44 = vmul.f32 %v2085_v40, %v851_v39  ;;  %v898_v46 = vsel %vm897_vm4, %v888_v0, 0.0 }
 0x17b   : > { %v490_v45 = vpop.f32.mrb[4].mxu1 }
 0x17c   : > { %v899_v47 = vsel %vm897_vm4, %v889_v44, 0.0  ;;  %v923_v48 = vmul.f32 %v889_v44, %v889_v44  ;;  %v1295_v49 = vpop.f32.mrb[5].mxu1  ;;  %v931_v53 = vsel %vm897_vm4, %v922_v43, 0.0  ;;  %v876_v43 = vpop.permute.xlu0 %875 }
 0x17d   : > { %v900_v50 = vadd.f32 %v899_v47, %v898_v46  ;;  %v795_v51 = vpop.f32.mrb[4].mxu0  ;;  %v493_v52 = vpop.f32.mrb[6].mxu1 }
 0x17e   : > { %v932_v54 = vsel %vm897_vm4, %v923_v48, 0.0  ;;  %v2092_v55 = vadd.f32 %v795_v51, %v490_v45  ;;  %v1343_v56 = vpop.f32.mrb[5].mxu0  ;;  %v1296_v57 = vpop.f32.mrb[7].mxu1 }
 0x17f   : > { %v933_v58 = vadd.f32 %v932_v54, %v931_v53  ;;  %v798_v59 = vpop.f32.mrb[6].mxu0  ;;  %v881_v49 = vpop.permute.xlu1 %880 }
 0x180   : > { %v890_v61 = vmul.f32 %v2092_v55, %v856_v42  ;;  %v2095_v62 = vadd.f32 %v798_v59, %v493_v52  ;;  %v1344_v63 = vpop.f32.mrb[7].mxu0 }
 0x182   : > { %v901_v1 = vsel %vm897_vm4, %v890_v61, 0.0  ;;  %v924_v2 = vmul.f32 %v890_v61, %v890_v61  ;;  %v891_v3 = vmul.f32 %v2095_v62, %v861_v60 }
 0x183   : > { %v902_v4 = vadd.f32 %v901_v1, %v900_v50  ;;  %v498_v5 = vpop.f32.mrb[8].mxu1 }
 0x184   : > { %v934_v8 = vsel %vm897_vm4, %v924_v2, 0.0  ;;  %v903_v10 = vsel %vm897_vm4, %v891_v3, 0.0  ;;  %v925_v11 = vmul.f32 %v891_v3, %v891_v3  ;;  %v1299_v12 = vpop.f32.mrb[9].mxu1 }
 0x185   : > { %v904_v13 = vadd.f32 %v903_v10, %v902_v4  ;;  %v935_v15 = vadd.f32 %v934_v8, %v933_v58  ;;  %v803_v16 = vpop.f32.mrb[8].mxu0  ;;  %v501_v17 = vpop.f32.mrb[10].mxu1 }
 0x186   : > { %v936_v18 = vsel %vm897_vm4, %v925_v11, 0.0  ;;  %v2102_v19 = vadd.f32 %v803_v16, %v498_v5  ;;  %v1347_v20 = vpop.f32.mrb[9].mxu0  ;;  %v1300_v21 = vpop.f32.mrb[11].mxu1 }
 0x187   : > { %v937_v23 = vadd.f32 %v936_v18, %v935_v15  ;;  %v806_v25 = vpop.f32.mrb[10].mxu0  ;;  %v886_v8 = vpop.permute.xlu0 %885 }
 0x188   : > { %v892_v26 = vmul.f32 %v2102_v19, %v866_v22  ;;  %v2105_v28 = vadd.f32 %v806_v25, %v501_v17  ;;  %v1348_v9 = vpop.f32.mrb[11].mxu0 }
 0x18a   : > { %v905_v6 = vsel %vm897_vm4, %v892_v26, 0.0  ;;  %v926_v14 = vmul.f32 %v892_v26, %v892_v26  ;;  %v893_v7 = vmul.f32 %v2105_v28, %v871_v29 }
 0x18b   : > { %v906_v27 = vadd.f32 %v905_v6, %v904_v13  ;;  %v506_v24 = vpop.f32.mrb[12].mxu1 }
 0x18c   : > { %v938_v30 = vsel %vm897_vm4, %v926_v14, 0.0  ;;  %v907_v31 = vsel %vm897_vm4, %v893_v7, 0.0  ;;  %v927_v32 = vmul.f32 %v893_v7, %v893_v7  ;;  %v1303_v33 = vpop.f32.mrb[13].mxu1 }
 0x18d   : > { %v939_v34 = vadd.f32 %v938_v30, %v937_v23  ;;  %v908_v36 = vadd.f32 %v907_v31, %v906_v27  ;;  %v811_v37 = vpop.f32.mrb[12].mxu0  ;;  %v509_v38 = vpop.f32.mrb[14].mxu1 }
 0x18e   : > { %v940_v39 = vsel %vm897_vm4, %v927_v32, 0.0  ;;  %v2112_v0 = vadd.f32 %v811_v37, %v506_v24  ;;  %v1351_v41 = vpop.f32.mrb[13].mxu0  ;;  %v1304_v42 = vpop.f32.mrb[15].mxu1 }
 0x18f   : > { %v941_v44 = vadd.f32 %v940_v39, %v939_v34  ;;  %v814_v45 = vpop.f32.mrb[14].mxu0 }
 0x190   : > { %v894_v46 = vmul.f32 %v2112_v0, %v876_v43  ;;  %v2115_v47 = vadd.f32 %v814_v45, %v509_v38  ;;  %v1352_v48 = vpop.f32.mrb[15].mxu0 }
 0x192   : > { %v909_v50 = vsel %vm897_vm4, %v894_v46, 0.0  ;;  %v928_v51 = vmul.f32 %v894_v46, %v894_v46  ;;  %v895_v52 = vmul.f32 %v2115_v47, %v881_v49 }
 0x193   : > { %v910_v53 = vadd.f32 %v909_v50, %v908_v36  ;;  %v514_v54 = vpop.f32.mrb[16].mxu1 }
 0x194   : > { %v942_v56 = vsel %vm897_vm4, %v928_v51, 0.0  ;;  %v911_v57 = vsel %vm897_vm4, %v895_v52, 0.0  ;;  %v929_v58 = vmul.f32 %v895_v52, %v895_v52  ;;  %v1307_v59 = vpop.f32.mrb[17].mxu1 }
 0x195   : > { %v943_v60 = vadd.f32 %v942_v56, %v941_v44  ;;  %v912_v61 = vadd.f32 %v911_v57, %v910_v53  ;;  %v819_v63 = vpop.f32.mrb[16].mxu0  ;;  %v517_v1 = vpop.f32.mrb[18].mxu1 }
 0x196   : > { %v944_v2 = vsel %vm897_vm4, %v929_v58, 0.0  ;;  %v1365_v3 = vadd.f32 %v819_v63, %v514_v54  ;;  %v1355_v4 = vpop.f32.mrb[17].mxu0  ;;  %v1308_v5 = vpop.f32.mrb[19].mxu1 }
 0x197   : > { %v945_v10 = vadd.f32 %v944_v2, %v943_v60  ;;  %v822_v11 = vpop.f32.mrb[18].mxu0 }
 0x198   : > { %v896_v12 = vmul.f32 %v1365_v3, %v886_v8  ;;  %v1356_v13 = vpop.f32.mrb[19].mxu0 }
 0x19a   : > { %v913_v15 = vsel %vm897_vm4, %v896_v12, 0.0  ;;  %v930_v16 = vmul.f32 %v896_v12, %v896_v12 }
 0x19b   : > { %v914_v17 = vadd.f32 %v913_v15, %v912_v61 }
 0x19c   : > { %v946_v18 = vsel %vm897_vm4, %v930_v16, 0.0 }
 0x19d   : > { %v915_v20 = vrot.slane %v914_v17, 4  ;;  %v947_v21 = vadd.f32 %v946_v18, %v945_v10 }
 0x19f   : > { %v916_v22 = vadd.f32 %v915_v20, %v914_v17  ;;  %v948_v23 = vrot.slane %v947_v21, 4 }
 0x1a1   : > { %v917_v25 = vrot.slane %v916_v22, 2  ;;  %v949_v26 = vadd.f32 %v948_v23, %v947_v21 }
 0x1a3   : > { %v918_v9 = vadd.f32 %v917_v25, %v916_v22  ;;  %v950_v29 = vrot.slane %v949_v26, 2 }
 0x1a5   : > { %v919_v6 = vrot.slane %v918_v9, 1  ;;  %v951_v14 = vadd.f32 %v950_v29, %v949_v26 }
 0x1a7   : > { %v920_v7 = vadd.f32 %v919_v6, %v918_v9  ;;  %v952_v27 = vrot.slane %v951_v14, 1 }
 0x1a9   : > { %v921_v24 = vmul.f32 0.015625, %v920_v7  ;;  %v953_v30 = vadd.f32 %v952_v27, %v951_v14 }
 0x1ab   : > { %v954_v31 = vmul.f32 0.015625, %v953_v30  ;;  %v955_v32 = vmul.f32 %v921_v24, %v921_v24  ;;  %v958_v33 = vsub.f32 %v2082_v35, %v921_v24  ;;  %v959_v34 = vsub.f32 %v2085_v40, %v921_v24 }
 0x1ac   : > { %v960_v36 = vsub.f32 %v2092_v55, %v921_v24  ;;  %v961_v37 = vsub.f32 %v2095_v62, %v921_v24  ;;  %v962_v38 = vsub.f32 %v2102_v19, %v921_v24  ;;  %v963_v39 = vsub.f32 %v2105_v28, %v921_v24 }
 0x1ad   : > { %v956_v41 = vsub.f32 %v954_v31, %v955_v32  ;;  %v964_v42 = vsub.f32 %v2112_v0, %v921_v24  ;;  %v965_v43 = vsub.f32 %v2115_v47, %v921_v24  ;;  %v966_v44 = vsub.f32 %v1365_v3, %v921_v24 }
 0x1af   : > { %v957_v45 = vmax.f32 %v956_v41, 0.0 }
 0x1b1   : > { %v967_v46 = vadd.f32 1e-05, %v957_v45 }
 0x1b3   : > { %1525 = vrsqrt.f32 %v967_v46 }
 0x1bd   : > { %v1526_v35 = vpop.eup %1525 }
 0x1be   : > { %v969_v40 = vmul.f32 %v1526_v35, %v958_v33  ;;  %v970_v55 = vmul.f32 %v1526_v35, %v959_v34  ;;  %v971_v62 = vmul.f32 %v1526_v35, %v960_v36  ;;  %v972_v48 = vmul.f32 %v1526_v35, %v961_v37 }
 0x1bf   : > { %v973_v19 = vmul.f32 %v1526_v35, %v962_v38  ;;  %v974_v49 = vmul.f32 %v1526_v35, %v963_v39  ;;  %v975_v28 = vmul.f32 %v1526_v35, %v964_v42  ;;  %v976_v50 = vmul.f32 %v1526_v35, %v965_v43 }
 0x1c0   : > { %v977_v0 = vmul.f32 %v1526_v35, %v966_v44  ;;  %v978_v51 = vmul.f32 0.2, %v969_v40  ;;  %v979_v47 = vmul.f32 0.2, %v970_v55  ;;  %v980_v52 = vmul.f32 0.2, %v971_v62 }
 0x1c1   : > { %v981_v53 = vmul.f32 0.2, %v972_v48  ;;  %v982_v54 = vmul.f32 0.2, %v973_v19  ;;  %v983_v56 = vmul.f32 0.2, %v974_v49 }
 0x1c2   : > { %v984_v57 = vmul.f32 0.2, %v975_v28  ;;  %v985_v58 = vmul.f32 0.2, %v976_v50  ;;  %v986_v59 = vmul.f32 0.2, %v977_v0  ;;  %v987_v60 = vmax.f32 %v969_v40, %v978_v51 }
 0x1c3   : > { %v988_v61 = vmax.f32 %v970_v55, %v979_v47  ;;  %v989_v63 = vmax.f32 %v971_v62, %v980_v52  ;;  %v990_v1 = vmax.f32 %v972_v48, %v981_v53  ;;  %v991_v2 = vmax.f32 %v973_v19, %v982_v54 }
 0x1c4   : > { %v992_v3 = vmax.f32 %v974_v49, %v983_v56  ;;  %v993_v4 = vmax.f32 %v975_v28, %v984_v57  ;;  %v994_v5 = vmax.f32 %v976_v50, %v985_v58  ;;  %v995_v8 = vmax.f32 %v977_v0, %v986_v59 }
 0x1c5   : > { %v1224_v10 = vpack.c.bf16 %v987_v60, %v987_v60  ;;  %v1225_v11 = vpack.c.bf16 %v988_v61, %v988_v61  ;;  %v1226_v12 = vpack.c.bf16 %v989_v63, %v989_v63  ;;  %v1227_v13 = vpack.c.bf16 %v990_v1, %v990_v1 }
 0x1c6   : > { %v1228_v15 = vpack.c.bf16 %v991_v2, %v991_v2  ;;  %v1229_v16 = vpack.c.bf16 %v992_v3, %v992_v3  ;;  %v1230_v17 = vpack.c.bf16 %v993_v4, %v993_v4  ;;  %v1231_v18 = vpack.c.bf16 %v994_v5, %v994_v5 }
 0x1c7   : > { %v1232_v20 = vpack.c.bf16 %v995_v8, %v995_v8  ;;  %1034 = vst.msk [vmem:[%s238_s24] sm:$0xf] %vm1033_vm5, %v1224_v10  ;;  %1035 = vst.msk [vmem:[%s238_s24 + $0x4] sm:$0xf] %vm1033_vm5, %v1225_v11 }
 0x1c8   : > { %1036 = vst.msk [vmem:[%s238_s24 + $0x8] sm:$0xf] %vm1033_vm5, %v1226_v12  ;;  %1037 = vst.msk [vmem:[%s238_s24 + $0xc] sm:$0xf] %vm1033_vm5, %v1227_v13 }
 0x1c9   : > { %1038 = vst.msk [vmem:[%s238_s24 + $0x10] sm:$0xf] %vm1033_vm5, %v1228_v15  ;;  %1039 = vst.msk [vmem:[%s238_s24 + $0x14] sm:$0xf] %vm1033_vm5, %v1229_v16 }
 0x1ca   : > { %1040 = vst.msk [vmem:[%s238_s24 + $0x18] sm:$0xf] %vm1033_vm5, %v1230_v17  ;;  %1041 = vst.msk [vmem:[%s238_s24 + $0x1c] sm:$0xf] %vm1033_vm5, %v1231_v18 }
 0x1cb   : > { %1042 = vst.msk [vmem:[%s238_s24 + $0x20] sm:$0xf] %vm1033_vm5, %v1232_v20 }
 0x1cc   : > { %1626 = shalt.err (!%p1623_p2)
}
 0x1cd   : > { %s1627_s30 = scalar_lea.hbm %s2139_s9, 576  ;;  %s1631_s26 = scalar_lea.hbm %s2202_s3, 1152 }
 0x1ce   : > { %p1628_p0 = scmp.ne.s32.totalorder %s2139_s9, %s1627_s30  ;;  %p1632_p6 = scmp.lt.u32.totalorder %s2139_s9, %s2202_s3 }
 0x1cf   : > { %p1633_p7 = scmp.lt.u32.totalorder %s1631_s26, %s1627_s30  ;;  %p1635_p8 = scmp.lt.u32.totalorder %s1627_s30, %s2139_s9 }
 0x1d0   : > { %p1629_p4 = pnand %p1628_p0, %p2217_p12 }
 0x1d1   : > { %p1634_p11 = por %p1633_p7, %p1632_p6 }
 0x1d2   : > { %p1630_p13 = pneg %p1629_p4 }
 0x1d3   : > { %p1636_p1 = por %p1635_p8, %p1634_p11 }
 0x1d5   : > { %p1637_p10 = pnand %p1636_p1, %p1630_p13 }
 0x1d7   : > { %1640 = shalt.err (!%p1637_p10)
}
 0x1d8   : > { %s1712_s22 = smov 64   ;;  %s1713_s24 = smov 4  }
 0x1d9   : > { %1421 = dma.vmem_to_hbm [thread:$0]  (%p2217_p12), %s2141_s11, 576, %s2139_s9, %s1044_s15, %s1712_s22, %s1712_s22, %s1713_s24  }
 0x1da PF: > { %s1073_s18 = sand.u32 1, %s1679_s12   ;;  %p2218_p3 = scmp.ne.s32.totalorder %s2210_s23, 0 }
 0x1db   : > { %p2219_p5 = scmp.ge.s32.totalorder %s1699_s17, 2  ;;  %s1074_s6 = scalar_lea.sflag [#allocation4], %s1073_s18 }
 0x1dd   : > { %p1435_p9 = pnand %p2219_p5, %p2218_p3 }
 0x1df   : > { %1674 = dma.done.wait (!%p1435_p9), %s1074_s6, 576  }
 0x1e0   : > { %1676 = vsyncadd (!%p1435_p9), %s1074_s6, 4294966720  ;;  %s20_s17 = sadd.s32 1, %s1699_s17   ;;  %s2220_s12 = smov %s1683_s13 }
 0x1e1   : > { %p17_p2 = scmp.ge.s32.totalorder %s20_s17, 4   ;;  %s2221_s13 = smov %s1687_s14 }
 0x1e2   : > { %s2222_s14 = smov %s1882_s7  ;;  %s2223_s15 = smov %s1695_s16 }
 0x1e3   : > { %s2224_s16 = smov %s2226_s28  ;;  %19 = sbr.rel (!%p17_p2) target bundleno = 7 (0x7), region = 89 }
 0x1ea   :  { %1079 = vsyncpa [#allocation3], 1 }
 0x1eb   :  { %1081 = vsyncpa [#allocation3 + $0x1], 1 }
 0x1ec   :  { %1082 = vsyncpa [#allocation6], 1 }
 0x1ed   :  { %1083 = vsyncpa [#allocation4], 1 }
 0x1ee   :  { %1085 = vsyncpa [#allocation4 + $0x1], 1 }

// kernel: _lambda_.6
= control target key start
LH: loop header
LB: loop body
LE: loop exit
PB: predicated region body
PF: predicated region fallthrough
CT: control target
= control target key end

     0   :  { %8 = vsyncpa [#allocation3], 0  ;;  %s1616_s0 = inlined_call_operand.hbm [shape: bf16[2,32,64], index: 0, kind: input, shape index: {}]   ;;  %s1617_s1 = inlined_call_operand.hbm [shape: bf16[4,64,32], index: 1, kind: input, shape index: {}]   ;;  %s1618_s2 = inlined_call_operand.hbm [shape: f32[20,1], index: 2, kind: input, shape index: {}]   ;;  %s1619_s3 = inlined_call_operand.hbm [shape: bf16[2,20,32], index: 3, kind: output, shape index: {}]  }
   0x1   :  { %10 = vsyncpa [#allocation3 + $0x1], 0 }
   0x2   :  { %11 = vsyncpa [#allocation6], 0 }
   0x3   :  { %12 = vsyncpa [#allocation4], 0 }
   0x4   :  { %14 = vsyncpa [#allocation4 + $0x1], 0  ;;  %s1326_s12 = smov 0   ;;  %s1328_s13 = smov 0  }
   0x5   :  { %s1330_s14 = smov 0   ;;  %s1332_s15 = smov 0  }
   0x6   :  { %s1334_s16 = smov 0   ;;  %s1336_s17 = smov 0  }
   0x7 LB: > { %s867_s18 = sadd.s32 4294967295, %s1293_s17   ;;  %s868_s19 = sadd.s32 4294967294, %s1293_s17   ;;  %s1293_s17 = sphi %s1336_s17, %s20_s17   ;;  %s1289_s16 = sphi %s1334_s16, %s1641_s16   ;;  %s1285_s15 = sphi %s1332_s15, %s1640_s15   ;;  %s1281_s14 = sphi %s1330_s14, %s1639_s14   ;;  %s1277_s13 = sphi %s1328_s13, %s1638_s13   ;;  %s1273_s12 = sphi %s1326_s12, %s1637_s12  }
   0x8   : > { %p52_p0 = scmp.ne.s32.totalorder %s1277_s13, %s1273_s12  ;;  %p1360_p1 = scmp.eq.s32.totalorder %s867_s18, 0 }
   0x9   : > { %p1364_p2 = scmp.eq.s32.totalorder %s867_s18, 1  ;;  %p131_p3 = scmp.eq.s32.totalorder %s868_s19, 1 }
   0xa   : > { %s1624_s20 = scalar_select %p1360_p1, 1, 0 }
   0xb   : > { %p1370_p4 = por %p1360_p1, %p52_p0  ;;  %p869_p5 = scmp.ge.s32.totalorder %s1293_s17, 1 }
   0xc   : > { %p1375_p6 = por %p131_p3, %p52_p0  ;;  %p138_p7 = scmp.lt.s32.totalorder %s1293_s17, 3 }
   0xd   : > { %s1626_s22 = scalar_select %p1370_p4, 1, 0 }
   0xe   : > { %s1627_s23 = scalar_select %p1375_p6, 1, 0 }
   0xf   : > { %p1380_p8 = pnand %p869_p5, %p138_p7  ;;  %s1295_s25 = smov [#allocation5]  }
  0x10   : > { %s152_s26 = sshll.u32 %s1295_s25, 4  ;;  %s1296_s28 = smov [#allocation7]   ;;  %s1384_s26 = int_to_ptr.vmem [resolvable:$true] %s152_s26 }
  0x11   : > { %p1017_p9 = pneg %p1380_p8  ;;  %s165_s29 = sshll.u32 %s1296_s28, 4  ;;  %s1395_s29 = int_to_ptr.vmem [resolvable:$true] %s165_s29 }
  0x12   : > { %s1121_s5 = scalar_lea.hbm %s1617_s1, 2048 }
  0x13   : > { %p1391_p11 = pnand %p1017_p9, %p1360_p1  ;;  %p1122_p12 = scmp.ne.s32.totalorder %s1617_s1, %s1121_s5 }
  0x14   : > { %p1128_p5 = scmp.lt.u32.totalorder %s1121_s5, %s1617_s1 }
  0x15   : > { %p1123_p13 = pneg %p1391_p11 }
  0x17   : > { %p1124_p0 = pnand %p1123_p13, %p1122_p12 }
  0x19   : > { %p1125_p3 = pneg %p1124_p0 }
  0x1b   : > { %p1130_p7 = pnand %p1128_p5, %p1125_p3 }
  0x1d   : > { %1133 = shalt.err (!%p1130_p7)
}
  0x1e   : > { %s1134_s10 = scalar_lea.vmem %s1384_s26, 2048  ;;  %p1142_p1 = scmp.lt.s32.totalorder %s1384_s26, %s1384_s26 }
  0x1f   : > { %p1135_p9 = scmp.ne.s32.totalorder %s1384_s26, %s1134_s10  ;;  %p1143_p12 = scmp.lt.s32.totalorder %s1134_s10, %s1134_s10 }
  0x21   : > { %p1137_p10 = pnand %p1135_p9, %p1123_p13  ;;  %p1144_p0 = por %p1143_p12, %p1142_p1 }
  0x23   : > { %p1138_p6 = pneg %p1137_p10 }
  0x25   : > { %p1145_p4 = pnand %p1144_p0, %p1138_p6 }
  0x27   : > { %1148 = shalt.err (!%p1145_p4)
}
  0x28   : > { %s1297_s11 = smov 64   ;;  %s1298_s18 = smov 4  }
  0x29   : > { %1020 = dma.hbm_to_vmem [thread:$0]  (!%p1391_p11), %s1617_s1, 2048, %s1384_s26, [#allocation6], %s1297_s11, %s1297_s11, %s1298_s18  }
  0x2a   : > { %s1149_s4 = scalar_lea.hbm %s1618_s2, 384 }
  0x2b   : > { %p1150_p1 = scmp.ne.s32.totalorder %s1618_s2, %s1149_s4  ;;  %p1156_p10 = scmp.lt.u32.totalorder %s1149_s4, %s1618_s2 }
  0x2d   : > { %p1152_p4 = pnand %p1150_p1, %p1123_p13 }
  0x2f   : > { %p1153_p6 = pneg %p1152_p4 }
  0x31   : > { %p1158_p3 = pnand %p1156_p10, %p1153_p6 }
  0x33   : > { %1161 = shalt.err (!%p1158_p3)
}
  0x34   : > { %s1162_s26 = scalar_lea.vmem %s1395_s29, 384  ;;  %p1170_p12 = scmp.lt.s32.totalorder %s1395_s29, %s1395_s29 }
  0x35   : > { %p1163_p5 = scmp.ne.s32.totalorder %s1395_s29, %s1162_s26  ;;  %p1171_p0 = scmp.lt.s32.totalorder %s1162_s26, %s1162_s26 }
  0x37   : > { %p1165_p7 = pnand %p1163_p5, %p1123_p13  ;;  %p1172_p1 = por %p1171_p0, %p1170_p12 }
  0x39   : > { %p1166_p9 = pneg %p1165_p7 }
  0x3b   : > { %p1173_p4 = pnand %p1172_p1, %p1166_p9 }
  0x3d   : > { %1176 = shalt.err (!%p1173_p4)
}
  0x3e   : > { %s1299_s9 = smov 128   ;;  %s1300_s10 = smov 8  }
  0x3f   : > { %1023 = dma.hbm_to_vmem [thread:$0]  (!%p1391_p11), %s1618_s2, 384, %s1395_s29, [#allocation6], %s1299_s9, %s1299_s9, %s1300_s10  }
  0x40   : > { %s32_s28 = sadd.s32 1, %s1289_s16  ;;  %s39_s30 = sadd.s32 1, %s1281_s14 }
  0x41   : > { %p34_p13 = scmp.ge.s32.totalorder %s32_s28, 2  ;;  %p46_p6 = scmp.ne.s32.totalorder %s1281_s14, %s1277_s13 }
  0x42   : > { %p47_p10 = scmp.eq.s32.totalorder %s1293_s17, 0  ;;  %p1034_p3 = scmp.lt.s32.totalorder %s1293_s17, 2 }
  0x43   : > { %s1643_s28 = smov (%p34_p13, %s32_s28), 0  ;;  %p1462_p7 = por %p1364_p2, %p46_p6 }
  0x44   : > { %p48_p5 = por %p47_p10, %p46_p6  ;;  %s36_s27 = ssub.s32 %s1289_s16, %s1643_s28 }
  0x45   : > { %s1630_s4 = scalar_select %p1462_p7, 1, 0 }
  0x46   : > { %s179_s5 = sand.u32 1, %s1281_s14   ;;  %p37_p9 = scmp.eq.s32.totalorder %s36_s27, 0 }
  0x47   : > { %s873_s29 = sshll.u32 %s179_s5, 4  ;;  %s916_s6 = sshll.u32 %s1289_s16, 8 }
  0x48   : > { %s1471_s7 = scalar_select %p37_p9, %s1281_s14, %s39_s30  }
  0x49   : > { %s1476_s9 = scalar_lea.hbm %s1616_s0, %s916_s6  ;;  %s183_s21 = scalar_lea.vmem [#allocation2], %s873_s29 }
  0x4a   : > { %s190_s10 = sshll.u32 %s183_s21, 4  ;;  %p1480_p2 = pnand %p1034_p3, %p48_p5  ;;  %s1484_s10 = int_to_ptr.vmem [resolvable:$true] %s190_s10 }
  0x4b   : > { %s1486_s25 = scalar_lea.sflag [#allocation3], %s179_s5  ;;  %s1177_s30 = scalar_lea.hbm %s1476_s9, 256 }
  0x4c   : > { %p1178_p11 = scmp.ne.s32.totalorder %s1476_s9, %s1177_s30  ;;  %p1179_p12 = pneg %p1480_p2 }
  0x4d   : > { %s1182_s6 = scalar_lea.hbm %s1616_s0, 512  ;;  %p1183_p4 = scmp.lt.u32.totalorder %s1476_s9, %s1616_s0 }
  0x4e   : > { %p1180_p0 = pnand %p1179_p12, %p1178_p11  ;;  %p1184_p13 = scmp.lt.u32.totalorder %s1182_s6, %s1177_s30 }
  0x4f   : > { %p1186_p10 = scmp.lt.u32.totalorder %s1177_s30, %s1476_s9 }
  0x50   : > { %p1181_p1 = pneg %p1180_p0  ;;  %p1185_p6 = por %p1184_p13, %p1183_p4 }
  0x52   : > { %p1187_p3 = por %p1186_p10, %p1185_p6 }
  0x54   : > { %p1188_p5 = pnand %p1187_p3, %p1181_p1 }
  0x56   : > { %1191 = shalt.err (!%p1188_p5)
}
  0x57   : > { %s1192_s5 = scalar_lea.vmem %s1484_s10, 256  ;;  %s1301_s21 = smov [#allocation2]  }
  0x58   : > { %p1193_p9 = scmp.ne.s32.totalorder %s1484_s10, %s1192_s5  ;;  %s1197_s27 = sshll.u32 %s1301_s21, 4  ;;  %s1198_s27 = int_to_ptr.vmem [resolvable:$false] %s1197_s27 }
  0x59   : > { %s1199_s29 = scalar_lea.vmem %s1198_s27, 512  ;;  %p1200_p7 = scmp.lt.s32.totalorder %s1484_s10, %s1198_s27 }
  0x5a   : > { %p1195_p11 = pnand %p1193_p9, %p1179_p12  ;;  %p1201_p4 = scmp.lt.s32.totalorder %s1199_s29, %s1192_s5 }
  0x5c   : > { %p1196_p0 = pneg %p1195_p11  ;;  %p1202_p13 = por %p1201_p4, %p1200_p7 }
  0x5e   : > { %p1203_p6 = pnand %p1202_p13, %p1196_p0 }
  0x60   : > { %1206 = shalt.err (!%p1203_p6)
}
  0x61   : > { %1027 = dma.hbm_to_vmem [thread:$0]  (!%p1480_p2), %s1476_s9, 256, %s1484_s10, %s1486_s25, %s1297_s11, %s1297_s11, %s1298_s18  }
  0x62   : > { %202 = sbr.rel (%p1380_p8) target bundleno = 425 (0x1a9), region = 32  ;;  %s1520_s30 = sand.u32 (!%p1380_p8), 1, %s1277_s13  }
  0x63   : > { %s877_s6 = sshll.u32 (!%p1380_p8), %s1520_s30, 4  ;;  %s205_s8 = scalar_lea.sflag (!%p1380_p8), [#allocation3], %s1520_s30 }
  0x64   : > { %s1524_s26 = scalar_lea.vmem (!%p1380_p8), [#allocation2], %s877_s6  ;;  %p1632_p7 = scmp.ne.s32.totalorder (!%p1380_p8), %s1626_s22, 0 }
  0x69   : > { %1260 = dma.done.wait (%p1632_p7), %s205_s8, 256  }
  0x6a   : > { %1262 = vsyncadd (%p1632_p7), %s205_s8, 4294967040  ;;  %p1633_p2 = scmp.ne.s32.totalorder %s1624_s20, 0 }
  0x6c   : > { %1264 = dma.done.wait (%p1633_p2), [#allocation6], 2432  }
  0x6d   : > { %1266 = vsyncadd (%p1633_p2), [#allocation6], 4294964864  ;;  %v1302_v0 = vmov 0   ;;  %v1097_v1 = vld [vmem:[#allocation5 + $0x20] sm:$0xff]   ;;  %v1099_v3 = vld [vmem:[#allocation5 + $0x28] sm:$0xff]   ;;  %vm309_vm2 = vcmask 523264  }
  0x6e   : > { %1095 = vset.pattern.permute.xlu0 %v1302_v0  ;;  %1096 = vset.pattern.permute.xlu1 %v1302_v0  ;;  %v1098_v2 = vld [vmem:[#allocation5 + $0x40] sm:$0xff]   ;;  %v1100_v4 = vld [vmem:[#allocation5 + $0x48] sm:$0xff]   ;;  %v1101_v5 = vld [vmem:[#allocation5 + $0x30] sm:$0xff]   ;;  %vm269_vm0 = vsmask.f32 7424  ;;  %vm579_vm3 = vcmask 1044480  }
  0x6f   : > { %944 = vmatprep.subr.bf16.mxu1 %v1097_v1  ;;  %968 = vmatprep.subr.bf16.mxu0 %v1098_v2  ;;  %v1102_v6 = vld [vmem:[#allocation5 + $0x50] sm:$0xff]   ;;  %v1103_v7 = vld [vmem:[#allocation5 + $0x38] sm:$0xff]   ;;  %vm467_vm1 = vsmask.f32 5376  ;;  %v1107_v11 = vld [vmem:[#allocation5] sm:$0xff]   ;;  %vm685_vm4 = vcmask 261120  }
  0x70   : > { %945 = vmatpush3.bf16.msra.mxu1 %v1097_v1  ;;  %969 = vmatpush3.bf16.msra.mxu0 %v1098_v2  ;;  %v1104_v8 = vld [vmem:[#allocation5 + $0x58] sm:$0xff]   ;;  %v1105_v9 = vld [vmem:[%s1524_s26] sm:$0xff]   ;;  %v1111_v34 = vld [vmem:[#allocation5 + $0x8] sm:$0xff]   ;;  %vm689_vm5 = vcmask 257024   ;;  %s1003_s20 = smul.u32 12, %s1520_s30  ;;  %vm746_vm6 = vcmask 254976  }
  0x71   : > { %946 = vmatprep.subr.bf16.mxu1 %v1099_v3  ;;  %970 = vmatprep.subr.bf16.mxu0 %v1100_v4  ;;  %v1106_v10 = vld [vmem:[%s1524_s26 + $0x8] ss:$0 sps:$4 sm:$0x77]   ;;  %v444_v12 = vld [vmem:[%s1524_s26] sm:$0xc]  ;;  %v271_v13 = vshrl.u32 %v1105_v9, 16 }
  0x72   : > { %v273_v14 = vshll.u32 %v1105_v9, 16  ;;  %v278_v15 = vshll.u32 %v1106_v10, 16  ;;  %v282_v16 = vshrl.u32 %v1106_v10, 16  ;;  %v445_v17 = vld [vmem:[%s1524_s26 + $0x4] sm:$0xf]  ;;  %v1112_v38 = vld [vmem:[#allocation5 + $0x68] sm:$0xff]  }
  0x73   : > { %v895_v18 = vcombine.low %v444_v12, %v445_v17  ;;  %v1539_v19 = vld [vmem:[%s1524_s26 + $0x8] sm:$0x1f]   ;;  %v1110_v26 = vld [vmem:[#allocation5 + $0x60] sm:$0xff]   ;;  %v1113_v39 = vld [vmem:[#allocation5 + $0x10] sm:$0xff]   ;;  %s1004_s22 = smul.u32 192, %s1285_s15  ;;  %s238_s24 = scalar_lea.vmem [#allocation8], %s1003_s20 }
  0x74   : > { %947 = vmatpush3.bf16.msra.mxu1 %v1099_v3  ;;  %971 = vmatpush3.bf16.msra.mxu0 %v1100_v4  ;;  %v275_v20 = vrot.slane %v273_v14, 1  ;;  %v280_v21 = vrot.slane %v278_v15, 1  ;;  %v477_v24 = vshrl.u32 %v1539_v19, 16  ;;  %v480_v25 = vshll.u32 %v1539_v19, 16  ;;  %v566_v40 = vld [vmem:[%s1524_s26] sm:$0x8] }
  0x75   : > { %948 = vmatprep.subr.bf16.mxu1 %v1101_v5  ;;  %972 = vmatprep.subr.bf16.mxu0 %v1102_v6  ;;  %v469_v22 = vshrl.u32 %v895_v18, 16  ;;  %v472_v23 = vshll.u32 %v895_v18, 16  ;;  %v903_v41 = vcombine.low %v566_v40, %v445_v17  ;;  %v581_v42 = vrot.slane %v1539_v19, 3  ;;  %v664_v43 = vld [vmem:[#allocation7] sm:$0xff]  ;;  %v666_v44 = vld [vmem:[#allocation7 + $0x10] sm:$0xf]  ;;  %s1563_s10 = scalar_lea.hbm %s1619_s3, %s1004_s22 }
  0x76   : > { %v276_v27 = vor.u32 %v275_v20, %v271_v13  ;;  %v284_v28 = vor.u32 %v282_v16, %v280_v21  ;;  %v479_v31 = vrot.slane %v477_v24, 2  ;;  %v482_v32 = vrot.slane %v480_v25, 3  ;;  %669 = vperm.xlu0 %1095, %v664_v43   ;;  %v1114_v45 = vld [vmem:[#allocation5 + $0x70] sm:$0xff]   ;;  %v1115_v47 = vld [vmem:[#allocation5 + $0x18] sm:$0xff]   ;;  %679 = vperm.xlu1 %1096, %v666_v44   ;;  %v665_v49 = vld [vmem:[#allocation7 + $0x8] sm:$0xff]  ;;  %s763_s11 = sshll.u32 %s238_s24, 4  ;;  %s1565_s11 = int_to_ptr.vmem [resolvable:$true] %s763_s11 }
  0x77   : > { %v471_v29 = vrot.slane %v469_v22, 2  ;;  %v474_v30 = vrot.slane %v472_v23, 3  ;;  %v580_v46 = vrot.slane %v903_v41, 3  ;;  %v1116_v50 = vld [vmem:[#allocation5 + $0x78] sm:$0xff]   ;;  %s749_s15 = scalar_lea.sflag [#allocation4], %s1520_s30  ;;  %s1207_s19 = scalar_lea.vmem %s1565_s11, 192 }
  0x78   : > { %949 = vmatpush3.bf16.msra.mxu1 %v1101_v5  ;;  %973 = vmatpush3.bf16.msra.mxu0 %v1102_v6  ;;  %v281_v33 = vsel %vm269_vm0, %v276_v27, %v280_v21  ;;  %v483_v36 = vor.u32 %v482_v32, %v479_v31  ;;  %v1118_v51 = vld [vmem:[%s1524_s26 + $0x8] ss:$0 sps:$4 sm:$0x33]   ;;  %p1208_p8 = scmp.ne.s32.totalorder %s1565_s11, %s1207_s19  ;;  %p1634_p12 = scmp.ne.s32.totalorder %s1630_s4, 0 }
  0x79   : > { %950 = vmatprep.subr.bf16.mxu1 %v1103_v7  ;;  %974 = vmatprep.subr.bf16.mxu0 %v1104_v8  ;;  %v475_v35 = vor.u32 %v474_v30, %v471_v29  ;;  %v582_v48 = vsel %vm579_vm3, %v580_v46, %v581_v42  ;;  %s1303_s25 = smov [#allocation8]  }
  0x7a   : > { %952 = vmatprep.mubr.msk.bf16.mxu1 %vm309_vm2, %v281_v33  ;;  %674 = vperm.xlu0 %1095, %v665_v49   ;;  %p1209_p1 = pnand %p1208_p8, %p1634_p12  ;;  %s1211_s5 = sshll.u32 %s1303_s25, 4  ;;  %s1212_s5 = int_to_ptr.vmem [resolvable:$false] %s1211_s5 }
  0x7b   : > { %v484_v37 = vsel %vm467_vm1, %v475_v35, %v483_v36  ;;  %s1213_s21 = scalar_lea.vmem %s1212_s5, 384  ;;  %p1214_p3 = scmp.lt.s32.totalorder %s1565_s11, %s1212_s5 }
  0x7c   : > { %951 = vmatpush3.bf16.msra.mxu1 %v1103_v7  ;;  %975 = vmatpush3.bf16.msra.mxu0 %v1104_v8  ;;  %p1210_p10 = pneg %p1209_p1  ;;  %p1215_p5 = scmp.lt.s32.totalorder %s1213_s21, %s1207_s19 }
  0x7d   : > { %956 = vmatprep.subr.bf16.mxu1 %v1107_v11  ;;  %980 = vmatprep.subr.bf16.mxu0 %v1110_v26 }
  0x7e   : > { %976 = vmatprep.mubr.msk.bf16.mxu0 %vm309_vm2, %v484_v37  ;;  %p1216_p9 = por %p1215_p5, %p1214_p3 }
  0x7f   : > { %953 = vmatmul.mubr.msk.bf16.vlgmr.msra.gmra.mrb[0].mxu1 %vm309_vm2, %v284_v28  ;;  %977 = vmatmul.mubr.msk.bf16.vlgmr.msra.gmra.mrb[0].mxu0 %vm309_vm2, %v483_v36 }
  0x80   : > { %957 = vmatpush3.bf16.msra.mxu1 %v1107_v11  ;;  %964 = vmatprep.mubr.msk.bf16.mxu1 %vm309_vm2, %v1105_v9  ;;  %p1217_p11 = pnand %p1216_p9, %p1210_p10 }
  0x81   : > { %958 = vmatprep.subr.bf16.mxu1 %v1111_v34  ;;  %981 = vmatpush3.bf16.msra.mxu0 %v1110_v26 }
  0x82   : > { %982 = vmatprep.subr.bf16.mxu0 %v1112_v38  ;;  %988 = vmatprep.mubr.msk.bf16.mxu0 %vm309_vm2, %v582_v48 }
  0x84   : > { %959 = vmatpush3.bf16.msra.mxu1 %v1111_v34 }
  0x85   : > { %960 = vmatprep.subr.bf16.mxu1 %v1113_v39  ;;  %983 = vmatpush3.bf16.msra.mxu0 %v1112_v38 }
  0x86   : > { %984 = vmatprep.subr.bf16.mxu0 %v1114_v45 }
  0x88   : > { %961 = vmatpush3.bf16.msra.mxu1 %v1113_v39 }
  0x89   : > { %962 = vmatprep.subr.bf16.mxu1 %v1115_v47  ;;  %985 = vmatpush3.bf16.msra.mxu0 %v1114_v45 }
  0x8a   : > { %986 = vmatprep.subr.bf16.mxu0 %v1116_v50 }
  0x8c   : > { %963 = vmatpush3.bf16.msra.mxu1 %v1115_v47 }
  0x8d   : > { %987 = vmatpush3.bf16.msra.mxu0 %v1116_v50 }
  0x8f   : > { %965 = vmatmul.mubr.msk.bf16.vlgmr.msra.gmra.mrb[0].mxu1 %vm309_vm2, %v1118_v51 }
  0x90   : > { %989 = vmatmul.mubr.msk.bf16.vlgmr.msra.gmra.mrb[0].mxu0 %vm309_vm2, %v581_v42 }
  0xf5   : > { %v670_v54 = vpop.permute.xlu0 %669  ;;  %v680_v60 = vpop.permute.xlu1 %679 }
  0xf9   : > { %v675_v3 = vpop.permute.xlu0 %674 }
 0x162   : > { %v966_v52 = vpop.f32.mrb[0].mxu1 }
 0x163   : > { %v430_v53 = vpop.f32.mrb[1].mxu1  ;;  %v990_v56 = vpop.f32.mrb[0].mxu0 }
 0x164   : > { %v967_v55 = vpop.f32.mrb[2].mxu1  ;;  %v992_v58 = vadd.f32 %v990_v56, %v966_v52  ;;  %v647_v59 = vpop.f32.mrb[1].mxu0 }
 0x165   : > { %v433_v57 = vpop.f32.mrb[3].mxu1  ;;  %v993_v61 = vadd.f32 %v647_v59, %v430_v53  ;;  %v991_v62 = vpop.f32.mrb[2].mxu0 }
 0x166   : > { %v650_v63 = vpop.f32.mrb[3].mxu0  ;;  %v684_v1 = vmul.f32 %v992_v58, %v680_v60 }
 0x167   : > { %v682_v0 = vmul.f32 %v993_v61, %v670_v54  ;;  %v994_v2 = vadd.f32 %v650_v63, %v433_v57 }
 0x168   : > { %v701_v7 = vmul.f32 %v684_v1, %v684_v1  ;;  %v690_v12 = vsel %vm689_vm5, %v684_v1, 0.0 }
 0x169   : > { %v699_v4 = vmul.f32 %v682_v0, %v682_v0  ;;  %v683_v5 = vmul.f32 %v994_v2, %v675_v3  ;;  %v686_v6 = vsel %vm685_vm4, %v682_v0, 0.0 }
 0x16a   : > { %v705_v16 = vsel %vm689_vm5, %v701_v7, 0.0 }
 0x16b   : > { %v687_v8 = vsel %vm685_vm4, %v683_v5, 0.0  ;;  %v700_v9 = vmul.f32 %v683_v5, %v683_v5  ;;  %v702_v11 = vsel %vm685_vm4, %v699_v4, 0.0 }
 0x16c   : > { %v688_v10 = vadd.f32 %v687_v8, %v686_v6 }
 0x16d   : > { %v703_v13 = vsel %vm685_vm4, %v700_v9, 0.0 }
 0x16e   : > { %v691_v14 = vadd.f32 %v690_v12, %v688_v10  ;;  %v704_v15 = vadd.f32 %v703_v13, %v702_v11 }
 0x170   : > { %v692_v17 = vrot.slane %v691_v14, 4  ;;  %v706_v18 = vadd.f32 %v705_v16, %v704_v15 }
 0x172   : > { %v693_v19 = vadd.f32 %v692_v17, %v691_v14  ;;  %v707_v20 = vrot.slane %v706_v18, 4 }
 0x174   : > { %v694_v21 = vrot.slane %v693_v19, 2  ;;  %v708_v22 = vadd.f32 %v707_v20, %v706_v18 }
 0x176   : > { %v695_v23 = vadd.f32 %v694_v21, %v693_v19  ;;  %v709_v24 = vrot.slane %v708_v22, 2 }
 0x178   : > { %v696_v25 = vrot.slane %v695_v23, 1  ;;  %v710_v26 = vadd.f32 %v709_v24, %v708_v22 }
 0x17a   : > { %v697_v27 = vadd.f32 %v696_v25, %v695_v23  ;;  %v711_v28 = vrot.slane %v710_v26, 1 }
 0x17c   : > { %v698_v29 = vmul.f32 0.0625, %v697_v27  ;;  %v712_v30 = vadd.f32 %v711_v28, %v710_v26 }
 0x17e   : > { %v713_v31 = vmul.f32 0.0625, %v712_v30  ;;  %v714_v32 = vmul.f32 %v698_v29, %v698_v29  ;;  %v717_v33 = vsub.f32 %v993_v61, %v698_v29  ;;  %v718_v34 = vsub.f32 %v994_v2, %v698_v29 }
 0x17f   : > { %v719_v35 = vsub.f32 %v992_v58, %v698_v29 }
 0x180   : > { %v715_v36 = vsub.f32 %v713_v31, %v714_v32 }
 0x182   : > { %v716_v37 = vmax.f32 %v715_v36, 0.0 }
 0x184   : > { %v720_v38 = vadd.f32 1e-05, %v716_v37 }
 0x186   : > { %1119 = vrsqrt.f32 %v720_v38 }
 0x190   : > { %v1120_v39 = vpop.eup %1119 }
 0x191   : > { %v722_v40 = vmul.f32 %v1120_v39, %v717_v33  ;;  %v723_v41 = vmul.f32 %v1120_v39, %v718_v34  ;;  %v724_v42 = vmul.f32 %v1120_v39, %v719_v35 }
 0x193   : > { %v725_v43 = vmul.f32 0.2, %v722_v40  ;;  %v726_v44 = vmul.f32 0.2, %v723_v41  ;;  %v727_v45 = vmul.f32 0.2, %v724_v42 }
 0x195   : > { %v728_v46 = vmax.f32 %v722_v40, %v725_v43  ;;  %v729_v47 = vmax.f32 %v723_v41, %v726_v44  ;;  %v730_v48 = vmax.f32 %v724_v42, %v727_v45 }
 0x197   : > { %v917_v49 = vpack.c.bf16 %v728_v46, %v728_v46  ;;  %v918_v50 = vpack.c.bf16 %v729_v47, %v729_v47  ;;  %v919_v51 = vpack.c.bf16 %v730_v48, %v730_v48 }
 0x199   : > { %745 = vst.msk [vmem:[%s238_s24 + $0x4] sm:$0xf] %vm689_vm5, %v918_v50  ;;  %744 = vst.msk [vmem:[%s238_s24] sm:$0xf] %vm689_vm5, %v917_v49 }
 0x19a   : > { %747 = vst.msk [vmem:[%s238_s24 + $0x8] sm:$0x3] %vm746_vm6, %v919_v51 }
 0x19b   : > { %1220 = shalt.err (!%p1217_p11)
}
 0x19c   : > { %s1221_s27 = scalar_lea.hbm %s1563_s10, 192  ;;  %s1225_s8 = scalar_lea.hbm %s1619_s3, 384 }
 0x19d   : > { %p1222_p0 = scmp.ne.s32.totalorder %s1563_s10, %s1221_s27  ;;  %p1226_p6 = scmp.lt.u32.totalorder %s1563_s10, %s1619_s3 }
 0x19e   : > { %p1227_p7 = scmp.lt.u32.totalorder %s1225_s8, %s1221_s27  ;;  %p1229_p8 = scmp.lt.u32.totalorder %s1221_s27, %s1563_s10 }
 0x19f   : > { %p1223_p4 = pnand %p1222_p0, %p1634_p12 }
 0x1a0   : > { %p1228_p2 = por %p1227_p7, %p1226_p6 }
 0x1a1   : > { %p1224_p13 = pneg %p1223_p4 }
 0x1a2   : > { %p1230_p1 = por %p1229_p8, %p1228_p2 }
 0x1a4   : > { %p1231_p10 = pnand %p1230_p1, %p1224_p13 }
 0x1a6   : > { %1234 = shalt.err (!%p1231_p10)
}
 0x1a7   : > { %s1304_s22 = smov 64   ;;  %s1305_s24 = smov 4  }
 0x1a8   : > { %1015 = dma.vmem_to_hbm [thread:$0]  (%p1634_p12), %s1565_s11, 192, %s1563_s10, %s749_s15, %s1304_s22, %s1304_s22, %s1305_s24  }
 0x1a9 PF: > { %s778_s18 = sand.u32 1, %s1273_s12   ;;  %p1635_p3 = scmp.ne.s32.totalorder %s1627_s23, 0 }
 0x1aa   : > { %p1636_p5 = scmp.ge.s32.totalorder %s1293_s17, 2  ;;  %s779_s9 = scalar_lea.sflag [#allocation4], %s778_s18 }
 0x1ac   : > { %p1029_p9 = pnand %p1636_p5, %p1635_p3 }
 0x1ae   : > { %1268 = dma.done.wait (!%p1029_p9), %s779_s9, 192  }
 0x1af   : > { %1270 = vsyncadd (!%p1029_p9), %s779_s9, 4294967104  ;;  %s20_s17 = sadd.s32 1, %s1293_s17   ;;  %s1637_s12 = smov %s1277_s13 }
 0x1b0   : > { %p17_p11 = scmp.ge.s32.totalorder %s20_s17, 4   ;;  %s1638_s13 = smov %s1281_s14 }
 0x1b1   : > { %s1639_s14 = smov %s1471_s7  ;;  %s1640_s15 = smov %s1289_s16 }
 0x1b2   : > { %s1641_s16 = smov %s1643_s28  ;;  %19 = sbr.rel (!%p17_p11) target bundleno = 7 (0x7), region = 89 }
 0x1b9   :  { %784 = vsyncpa [#allocation3], 1 }
 0x1ba   :  { %786 = vsyncpa [#allocation3 + $0x1], 1 }
 0x1bb   :  { %787 = vsyncpa [#allocation6], 1 }
 0x1bc   :  { %788 = vsyncpa [#allocation4], 1 }
 0x1bd   :  { %790 = vsyncpa [#allocation4 + $0x1], 1 }

// kernel: _lambda_.7
= control target key start
LH: loop header
LB: loop body
LE: loop exit
PB: predicated region body
PF: predicated region fallthrough
CT: control target
= control target key end

     0   :  { %8 = vsyncpa [#allocation3], 0  ;;  %s2989_s0 = inlined_call_operand.hbm [shape: bf16[2,40,32], index: 0, kind: input, shape index: {}]   ;;  %s2990_s1 = inlined_call_operand.hbm [shape: bf16[16,32,64], index: 1, kind: input, shape index: {}]   ;;  %s2991_s2 = inlined_call_operand.hbm [shape: f32[18,1], index: 2, kind: input, shape index: {}]   ;;  %s2992_s3 = inlined_call_operand.hbm [shape: bf16[2,18,64], index: 3, kind: output, shape index: {}]  }
   0x1   :  { %10 = vsyncpa [#allocation3 + $0x1], 0 }
   0x2   :  { %11 = vsyncpa [#allocation6], 0 }
   0x3   :  { %12 = vsyncpa [#allocation4], 0 }
   0x4   :  { %14 = vsyncpa [#allocation4 + $0x1], 0  ;;  %s2594_s12 = smov 0   ;;  %s2596_s13 = smov 0  }
   0x5   :  { %s2598_s14 = smov 0   ;;  %s2600_s15 = smov 0  }
   0x6   :  { %s2602_s16 = smov 0   ;;  %s2604_s17 = smov 0  }
   0x7 LB: > { %s1878_s18 = sadd.s32 4294967295, %s2561_s17   ;;  %s1879_s19 = sadd.s32 4294967294, %s2561_s17   ;;  %s2561_s17 = sphi %s2604_s17, %s20_s17   ;;  %s2557_s16 = sphi %s2602_s16, %s3014_s16   ;;  %s2553_s15 = sphi %s2600_s15, %s3013_s15   ;;  %s2549_s14 = sphi %s2598_s14, %s3012_s14   ;;  %s2545_s13 = sphi %s2596_s13, %s3011_s13   ;;  %s2541_s12 = sphi %s2594_s12, %s3010_s12  }
   0x8   : > { %p52_p0 = scmp.ne.s32.totalorder %s2545_s13, %s2541_s12  ;;  %p2628_p1 = scmp.eq.s32.totalorder %s1878_s18, 0 }
   0x9   : > { %p2632_p2 = scmp.eq.s32.totalorder %s1878_s18, 1  ;;  %p131_p3 = scmp.eq.s32.totalorder %s1879_s19, 1 }
   0xa   : > { %s2997_s20 = scalar_select %p2628_p1, 1, 0 }
   0xb   : > { %p2638_p4 = por %p2628_p1, %p52_p0  ;;  %p1880_p5 = scmp.ge.s32.totalorder %s2561_s17, 1 }
   0xc   : > { %p2643_p6 = por %p131_p3, %p52_p0  ;;  %p138_p7 = scmp.lt.s32.totalorder %s2561_s17, 3 }
   0xd   : > { %s2999_s22 = scalar_select %p2638_p4, 1, 0 }
   0xe   : > { %s3000_s23 = scalar_select %p2643_p6, 1, 0 }
   0xf   : > { %p2648_p8 = pnand %p1880_p5, %p138_p7  ;;  %s2563_s25 = smov [#allocation5]  }
  0x10   : > { %s152_s26 = sshll.u32 %s2563_s25, 4  ;;  %s2564_s28 = smov [#allocation7]   ;;  %s2652_s26 = int_to_ptr.vmem [resolvable:$true] %s152_s26 }
  0x11   : > { %p2252_p9 = pneg %p2648_p8  ;;  %s165_s29 = sshll.u32 %s2564_s28, 4  ;;  %s2663_s29 = int_to_ptr.vmem [resolvable:$true] %s165_s29 }
  0x12   : > { %s2389_s5 = scalar_lea.hbm %s2990_s1, 4096 }
  0x13   : > { %p2659_p11 = pnand %p2252_p9, %p2628_p1  ;;  %p2390_p12 = scmp.ne.s32.totalorder %s2990_s1, %s2389_s5 }
  0x14   : > { %p2396_p5 = scmp.lt.u32.totalorder %s2389_s5, %s2990_s1 }
  0x15   : > { %p2391_p13 = pneg %p2659_p11 }
  0x17   : > { %p2392_p0 = pnand %p2391_p13, %p2390_p12 }
  0x19   : > { %p2393_p3 = pneg %p2392_p0 }
  0x1b   : > { %p2398_p7 = pnand %p2396_p5, %p2393_p3 }
  0x1d   : > { %2401 = shalt.err (!%p2398_p7)
}
  0x1e   : > { %s2402_s10 = scalar_lea.vmem %s2652_s26, 4096  ;;  %p2410_p1 = scmp.lt.s32.totalorder %s2652_s26, %s2652_s26 }
  0x1f   : > { %p2403_p9 = scmp.ne.s32.totalorder %s2652_s26, %s2402_s10  ;;  %p2411_p12 = scmp.lt.s32.totalorder %s2402_s10, %s2402_s10 }
  0x21   : > { %p2405_p10 = pnand %p2403_p9, %p2391_p13  ;;  %p2412_p0 = por %p2411_p12, %p2410_p1 }
  0x23   : > { %p2406_p6 = pneg %p2405_p10 }
  0x25   : > { %p2413_p4 = pnand %p2412_p0, %p2406_p6 }
  0x27   : > { %2416 = shalt.err (!%p2413_p4)
}
  0x28   : > { %s2565_s11 = smov 64   ;;  %s2566_s18 = smov 4  }
  0x29   : > { %2255 = dma.hbm_to_vmem [thread:$0]  (!%p2659_p11), %s2990_s1, 4096, %s2652_s26, [#allocation6], %s2565_s11, %s2565_s11, %s2566_s18  }
  0x2a   : > { %s2417_s4 = scalar_lea.hbm %s2991_s2, 384 }
  0x2b   : > { %p2418_p1 = scmp.ne.s32.totalorder %s2991_s2, %s2417_s4  ;;  %p2424_p10 = scmp.lt.u32.totalorder %s2417_s4, %s2991_s2 }
  0x2d   : > { %p2420_p4 = pnand %p2418_p1, %p2391_p13 }
  0x2f   : > { %p2421_p6 = pneg %p2420_p4 }
  0x31   : > { %p2426_p3 = pnand %p2424_p10, %p2421_p6 }
  0x33   : > { %2429 = shalt.err (!%p2426_p3)
}
  0x34   : > { %s2430_s26 = scalar_lea.vmem %s2663_s29, 384  ;;  %p2438_p12 = scmp.lt.s32.totalorder %s2663_s29, %s2663_s29 }
  0x35   : > { %p2431_p5 = scmp.ne.s32.totalorder %s2663_s29, %s2430_s26  ;;  %p2439_p0 = scmp.lt.s32.totalorder %s2430_s26, %s2430_s26 }
  0x37   : > { %p2433_p7 = pnand %p2431_p5, %p2391_p13  ;;  %p2440_p1 = por %p2439_p0, %p2438_p12 }
  0x39   : > { %p2434_p9 = pneg %p2433_p7 }
  0x3b   : > { %p2441_p4 = pnand %p2440_p1, %p2434_p9 }
  0x3d   : > { %2444 = shalt.err (!%p2441_p4)
}
  0x3e   : > { %s2567_s9 = smov 128   ;;  %s2568_s10 = smov 8  }
  0x3f   : > { %2258 = dma.hbm_to_vmem [thread:$0]  (!%p2659_p11), %s2991_s2, 384, %s2663_s29, [#allocation6], %s2567_s9, %s2567_s9, %s2568_s10  }
  0x40   : > { %s32_s28 = sadd.s32 1, %s2557_s16  ;;  %s39_s30 = sadd.s32 1, %s2549_s14 }
  0x41   : > { %p34_p13 = scmp.ge.s32.totalorder %s32_s28, 2  ;;  %p46_p6 = scmp.ne.s32.totalorder %s2549_s14, %s2545_s13 }
  0x42   : > { %p47_p10 = scmp.eq.s32.totalorder %s2561_s17, 0  ;;  %p2269_p3 = scmp.lt.s32.totalorder %s2561_s17, 2 }
  0x43   : > { %s3016_s28 = smov (%p34_p13, %s32_s28), 0  ;;  %p2730_p7 = por %p2632_p2, %p46_p6 }
  0x44   : > { %p48_p5 = por %p47_p10, %p46_p6  ;;  %s36_s27 = ssub.s32 %s2557_s16, %s3016_s28 }
  0x45   : > { %s3003_s4 = scalar_select %p2730_p7, 1, 0 }
  0x46   : > { %s179_s5 = sand.u32 1, %s2549_s14   ;;  %p37_p9 = scmp.eq.s32.totalorder %s36_s27, 0 }
  0x47   : > { %s2235_s29 = smul.u32 20, %s179_s5  ;;  %p2737_p11 = pnand %p2269_p3, %p48_p5 }
  0x48   : > { %s2742_s7 = scalar_select %p37_p9, %s2549_s14, %s39_s30  }
  0x49   : > { %s2236_s8 = smul.u32 320, %s2557_s16  ;;  %s183_s26 = scalar_lea.vmem [#allocation2], %s2235_s29 }
  0x4a   : > { %s190_s9 = sshll.u32 %s183_s26, 4  ;;  %s2752_s25 = scalar_lea.sflag [#allocation3], %s179_s5  ;;  %s2750_s9 = int_to_ptr.vmem [resolvable:$true] %s190_s9 }
  0x4b   : > { %s2748_s19 = scalar_lea.hbm %s2989_s0, %s2236_s8  ;;  %p2447_p12 = pneg %p2737_p11 }
  0x4c   : > { %s2445_s27 = scalar_lea.hbm %s2748_s19, 320  ;;  %s2450_s8 = scalar_lea.hbm %s2989_s0, 640 }
  0x4d   : > { %p2446_p2 = scmp.ne.s32.totalorder %s2748_s19, %s2445_s27  ;;  %p2451_p4 = scmp.lt.u32.totalorder %s2748_s19, %s2989_s0 }
  0x4e   : > { %p2452_p13 = scmp.lt.u32.totalorder %s2450_s8, %s2445_s27  ;;  %p2454_p10 = scmp.lt.u32.totalorder %s2445_s27, %s2748_s19 }
  0x4f   : > { %p2448_p0 = pnand %p2447_p12, %p2446_p2 }
  0x50   : > { %p2453_p6 = por %p2452_p13, %p2451_p4 }
  0x51   : > { %p2449_p1 = pneg %p2448_p0 }
  0x52   : > { %p2455_p3 = por %p2454_p10, %p2453_p6 }
  0x54   : > { %p2456_p5 = pnand %p2455_p3, %p2449_p1 }
  0x56   : > { %2459 = shalt.err (!%p2456_p5)
}
  0x57   : > { %s2460_s5 = scalar_lea.vmem %s2750_s9, 320  ;;  %s2569_s10 = smov [#allocation2]  }
  0x58   : > { %p2461_p9 = scmp.ne.s32.totalorder %s2750_s9, %s2460_s5  ;;  %s2465_s30 = sshll.u32 %s2569_s10, 4  ;;  %s2466_s30 = int_to_ptr.vmem [resolvable:$false] %s2465_s30 }
  0x59   : > { %s2467_s29 = scalar_lea.vmem %s2466_s30, 640  ;;  %p2468_p7 = scmp.lt.s32.totalorder %s2750_s9, %s2466_s30 }
  0x5a   : > { %p2463_p2 = pnand %p2461_p9, %p2447_p12  ;;  %p2469_p4 = scmp.lt.s32.totalorder %s2467_s29, %s2460_s5 }
  0x5c   : > { %p2464_p0 = pneg %p2463_p2  ;;  %p2470_p13 = por %p2469_p4, %p2468_p7 }
  0x5e   : > { %p2471_p6 = pnand %p2470_p13, %p2464_p0 }
  0x60   : > { %2474 = shalt.err (!%p2471_p6)
}
  0x61   : > { %2262 = dma.hbm_to_vmem [thread:$0]  (!%p2737_p11), %s2748_s19, 320, %s2750_s9, %s2752_s25, %s2565_s11, %s2565_s11, %s2566_s18  }
  0x62   : > { %202 = sbr.rel (%p2648_p8) target bundleno = 487 (0x1e7), region = 32  ;;  %s2786_s27 = sand.u32 (!%p2648_p8), 1, %s2545_s13  }
  0x63   : > { %s2237_s8 = smul.u32 (!%p2648_p8), 20, %s2786_s27  ;;  %s205_s26 = scalar_lea.sflag (!%p2648_p8), [#allocation3], %s2786_s27 }
  0x64   : > { %p3005_p7 = scmp.ne.s32.totalorder (!%p2648_p8), %s2999_s22, 0 }
  0x65   : > { %s2790_s21 = scalar_lea.vmem (!%p2648_p8), [#allocation2], %s2237_s8 }
  0x69   : > { %2528 = dma.done.wait (%p3005_p7), %s205_s26, 320  }
  0x6a   : > { %2530 = vsyncadd (%p3005_p7), %s205_s26, 4294966976  ;;  %p3006_p11 = scmp.ne.s32.totalorder %s2997_s20, 0 }
  0x6c   : > { %2532 = dma.done.wait (%p3006_p11), [#allocation6], 4480  }
  0x6d   : > { %2534 = vsyncadd (%p3006_p11), [#allocation6], 4294962816  ;;  %v2570_v0 = vmov 0   ;;  %v2332_v1 = vld [vmem:[#allocation5 + $0x10] sm:$0xff]   ;;  %v2333_v2 = vld [vmem:[#allocation5 + $0x80] sm:$0xff]   ;;  %vm963_vm1 = vcmask 1045504  }
  0x6e   : > { %2330 = vset.pattern.permute.xlu0 %v2570_v0  ;;  %2331 = vset.pattern.permute.xlu1 %v2570_v0  ;;  %v2334_v3 = vld [vmem:[#allocation5 + $0x18] sm:$0xff]   ;;  %vm261_vm0 = vsmask.f32 7424  ;;  %v2335_v4 = vld [vmem:[#allocation5 + $0x88] sm:$0xff]   ;;  %v2809_v9 = vld [vmem:[%s2790_s21 + $0x8] sm:$0xf] }
  0x6f   : > { %2048 = vmatprep.subr.bf16.mxu1 %v2332_v1  ;;  %2112 = vmatprep.subr.bf16.mxu0 %v2333_v2  ;;  %v240_v5 = vld [vmem:[%s2790_s21] sm:$0xf]  ;;  %v2802_v6 = vld [vmem:[%s2790_s21 + $0x4] sm:$0xf]  ;;  %v2340_v10 = vld [vmem:[#allocation5] sm:$0xff]   ;;  %vm289_vm2 = vcmask 261120  }
  0x70   : > { %2049 = vmatpush3.bf16.msra.mxu1 %v2332_v1  ;;  %2113 = vmatpush3.bf16.msra.mxu0 %v2333_v2  ;;  %v1888_v7 = vcombine.low %v240_v5, %v2802_v6  ;;  %v2806_v8 = vld [vmem:[%s2790_s21 + $0x8] ss:$0 sps:$4 sm:$0x33]   ;;  %v950_v11 = vld [vmem:[%s2790_s21 + $0x4] sm:$0xc]  ;;  %v2342_v31 = vld [vmem:[#allocation5 + $0x8] sm:$0xff]  }
  0x71   : > { %2050 = vmatprep.subr.bf16.mxu1 %v2334_v3  ;;  %2114 = vmatprep.subr.bf16.mxu0 %v2335_v4  ;;  %v270_v14 = vshll.u32 %v2806_v8, 16  ;;  %v274_v15 = vshrl.u32 %v2806_v8, 16  ;;  %v1932_v16 = vcombine.low %v950_v11, %v2809_v9  ;;  %v2339_v17 = vld [vmem:[%s2790_s21 + $0xc] ss:$0 sps:$4 sm:$0x77]   ;;  %v2341_v18 = vld [vmem:[#allocation5 + $0x90] sm:$0xff]  }
  0x72   : > { %v263_v12 = vshrl.u32 %v1888_v7, 16  ;;  %v265_v13 = vshll.u32 %v1888_v7, 16  ;;  %v965_v22 = vrot.slane %v2339_v17, 2  ;;  %v2343_v23 = vld [vmem:[#allocation5 + $0x98] sm:$0xff]   ;;  %vm1045_vm3 = vsmask.f32 5376 }
  0x73   : > { %v272_v20 = vrot.slane %v270_v14, 1  ;;  %v964_v21 = vrot.slane %v1932_v16, 2  ;;  %v2818_v27 = vld [vmem:[%s2790_s21 + $0xc] ss:$0 sps:$4 sm:$0xff]   ;;  %v1047_v28 = vshrl.u32 %v1932_v16, 16  ;;  %v1050_v29 = vshll.u32 %v1932_v16, 16 }
  0x74   : > { %2051 = vmatpush3.bf16.msra.mxu1 %v2334_v3  ;;  %2115 = vmatpush3.bf16.msra.mxu0 %v2335_v4  ;;  %v267_v19 = vrot.slane %v265_v13, 1  ;;  %v1055_v34 = vshrl.u32 %v2818_v27, 16  ;;  %v1058_v35 = vshll.u32 %v2818_v27, 16  ;;  %v2347_v36 = vld [vmem:[#allocation5 + $0xa0] sm:$0xff]   ;;  %v412_v42 = vld [vmem:[%s2790_s21] sm:$0xe] }
  0x75   : > { %2056 = vmatprep.subr.bf16.mxu1 %v2340_v10  ;;  %2120 = vmatprep.subr.bf16.mxu0 %v2341_v18  ;;  %v276_v25 = vor.u32 %v274_v15, %v272_v20  ;;  %v966_v26 = vsel %vm963_vm1, %v964_v21, %v965_v22  ;;  %v1049_v32 = vrot.slane %v1047_v28, 2  ;;  %v1052_v33 = vrot.slane %v1050_v29, 3  ;;  %v2346_v40 = vld [vmem:[#allocation5 + $0x20] sm:$0xff]   ;;  %v1132_v43 = vld [vmem:[%s2790_s21 + $0x4] sm:$0x8]  ;;  %v2348_v51 = vld [vmem:[#allocation5 + $0x28] sm:$0xff]  }
  0x76   : > { %v268_v24 = vor.u32 %v267_v19, %v263_v12  ;;  %2116 = vmatprep.mubr.msk.bf16.mxu0 %vm289_vm2, %v966_v26  ;;  %v1057_v38 = vrot.slane %v1055_v34, 2  ;;  %v1060_v39 = vrot.slane %v1058_v35, 3  ;;  %v1899_v44 = vcombine.low %v412_v42, %v2802_v6  ;;  %v2345_v47 = vld [vmem:[%s2790_s21 + $0x8] ss:$0 sps:$4 sm:$0x11]   ;;  %v2349_v54 = vld [vmem:[#allocation5 + $0xa8] sm:$0xff]  }
  0x77   : > { %2117 = vmatmul.mubr.msk.bf16.vlgmr.msra.gmra.mrb[0].mxu0 %vm289_vm2, %v965_v22  ;;  %v1053_v37 = vor.u32 %v1052_v33, %v1049_v32  ;;  %v1943_v45 = vcombine.low %v1132_v43, %v2809_v9  ;;  %vm421_vm4 = vcmask 1046528   ;;  %v423_v48 = vrot.slane %v2806_v8, 1  ;;  %v2356_v53 = vld [vmem:[%s2790_s21 + $0x8] ss:$0 sps:$4 sm:$0x77]   ;;  %v2354_v19 = vld [vmem:[#allocation5 + $0x38] sm:$0xff]  }
  0x78   : > { %v273_v30 = vsel %vm261_vm0, %v268_v24, %v272_v20  ;;  %2121 = vmatpush3.bf16.msra.mxu0 %v2341_v18  ;;  %v1061_v41 = vor.u32 %v1060_v39, %v1057_v38  ;;  %v422_v49 = vrot.slane %v1899_v44, 1  ;;  %v1142_v50 = vrot.slane %v2818_v27, 3  ;;  %v2839_v57 = vld [vmem:[%s2790_s21 + $0xc] sm:$0xf]  ;;  %v1216_v58 = vld [vmem:[%s2790_s21 + $0x10] sm:$0x1] }
  0x79   : > { %2052 = vmatprep.mubr.msk.bf16.mxu1 %vm289_vm2, %v273_v30  ;;  %2122 = vmatprep.subr.bf16.mxu0 %v2343_v23  ;;  %v1141_v52 = vrot.slane %v1943_v45, 3  ;;  %vm603_vm5 = vcmask 1044480   ;;  %v505_v55 = vshrl.u32 %v1899_v44, 16  ;;  %v508_v56 = vshll.u32 %v1899_v44, 16  ;;  %v2357_v62 = vld [vmem:[%s2790_s21 + $0x4] sm:$0xf8]  }
  0x7a   : > { %2053 = vmatmul.mubr.msk.bf16.vlgmr.msra.gmra.mrb[0].mxu1 %vm289_vm2, %v276_v25  ;;  %v1062_v46 = vsel %vm1045_vm3, %v1053_v37, %v1061_v41  ;;  %v424_v59 = vsel %vm421_vm4, %v422_v49, %v423_v48  ;;  %v513_v60 = vshrl.u32 %v2356_v53, 16  ;;  %v516_v61 = vshll.u32 %v2356_v53, 16  ;;  %v2353_v1 = vld [vmem:[#allocation5 + $0xb0] sm:$0xff]   ;;  %v2355_v22 = vld [vmem:[#allocation5 + $0xb8] sm:$0xff]   ;;  %v2360_v25 = vld [vmem:[#allocation5 + $0xc0] sm:$0xff]   ;;  %s2238_s20 = smul.u32 12, %s2786_s27 }
  0x7b   : > { %2057 = vmatpush3.bf16.msra.mxu1 %v2340_v10  ;;  %2060 = vmatprep.mubr.msk.bf16.mxu1 %vm289_vm2, %v1888_v7  ;;  %v1949_v63 = vcombine.low %v2839_v57, %v1216_v58  ;;  %v1143_v0 = vsel %vm603_vm5, %v1141_v52, %v1142_v50  ;;  %v1233_v2 = vshrl.u32 %v2357_v62, 16  ;;  %v1236_v3 = vshll.u32 %v2357_v62, 16  ;;  %v2352_v5 = vld [vmem:[#allocation5 + $0x30] sm:$0xff]   ;;  %v676_v29 = vld [vmem:[%s2790_s21] sm:$0x8]  ;;  %v2359_v32 = vld [vmem:[#allocation5 + $0x40] sm:$0xff]  }
  0x7c   : > { %2058 = vmatprep.subr.bf16.mxu1 %v2342_v31  ;;  %2123 = vmatpush3.bf16.msra.mxu0 %v2343_v23  ;;  %v507_v8 = vrot.slane %v505_v55, 1  ;;  %v510_v10 = vrot.slane %v508_v56, 2  ;;  %v515_v11 = vrot.slane %v513_v60, 1  ;;  %v518_v12 = vrot.slane %v516_v61, 2  ;;  %v590_v23 = vld [vmem:[%s2790_s21] sm:$0x8] }
  0x7d   : > { %2128 = vmatprep.subr.bf16.mxu0 %v2347_v36  ;;  %2124 = vmatprep.mubr.msk.bf16.mxu0 %vm289_vm2, %v1062_v46  ;;  %v1241_v4 = vshrl.u32 %v1949_v63, 16  ;;  %v1244_v7 = vshll.u32 %v1949_v63, 16  ;;  %v1235_v13 = vrot.slane %v1233_v2, 3  ;;  %v1238_v14 = vrot.slane %v1236_v3, 4  ;;  %v1318_v26 = vld [vmem:[%s2790_s21 + $0x8] sm:$0xe] }
  0x7e   : > { %vm503_vm6 = vsmask.f32 6400  ;;  %v511_v17 = vor.u32 %v510_v10, %v507_v8  ;;  %v519_v18 = vor.u32 %v518_v12, %v515_v11  ;;  %vm695_vm7 = vsmask.f32 4352  ;;  %v2857_v28 = vld [vmem:[%s2790_s21 + $0x8] ss:$0 sps:$4 sm:$0xff]  }
  0x7f   : > { %2059 = vmatpush3.bf16.msra.mxu1 %v2342_v31  ;;  %v1243_v15 = vrot.slane %v1241_v4, 3  ;;  %v1246_v16 = vrot.slane %v1244_v7, 4  ;;  %v1239_v20 = vor.u32 %v1238_v14, %v1235_v13  ;;  %v1909_v30 = vcombine.low %v590_v23, %v2802_v6  ;;  %v677_v31 = vld [vmem:[%s2790_s21 + $0x4] sm:$0xf]  ;;  %v2869_v35 = vld [vmem:[%s2790_s21 + $0xc] sm:$0x1] }
  0x80   : > { %2064 = vmatprep.subr.bf16.mxu1 %v2346_v40  ;;  %v520_v24 = vsel %vm503_vm6, %v511_v17, %v519_v18  ;;  %v1954_v33 = vcombine.low %v1318_v26, %v2839_v57  ;;  %v2865_v34 = vld [vmem:[%s2790_s21 + $0x10] ss:$0 sps:$4 sm:$0x33]   ;;  %v605_v6 = vrot.slane %v2857_v28, 3  ;;  %v1916_v39 = vcombine.low %v2809_v9, %v2869_v35  ;;  %v2368_v60 = vld [vmem:[#allocation5 + $0xd0] sm:$0xff]   ;;  %v2375_v23 = vld [vmem:[#allocation5 + $0xe0] sm:$0xff]  }
  0x81   : > { %v1247_v21 = vor.u32 %v1246_v16, %v1243_v15  ;;  %v604_v37 = vrot.slane %v1909_v30, 3  ;;  %v2362_v42 = vld [vmem:[#allocation5 + $0xc8] sm:$0xff]   ;;  %v1332_v43 = vrot.slane %v2865_v34, 1  ;;  %v2888_v53 = vld [vmem:[%s2790_s21 + $0xc] ss:$0 sps:$4 sm:$0x33]  }
  0x82   : > { %v1331_v38 = vrot.slane %v1954_v33, 1  ;;  %v1413_v44 = vshrl.u32 %v1954_v33, 16  ;;  %v2361_v45 = vld [vmem:[#allocation5 + $0x48] sm:$0xff]   ;;  %v708_v52 = vshll.u32 %v1916_v39, 16  ;;  %v1416_v55 = vshll.u32 %v1954_v33, 16  ;;  %s2239_s22 = smul.u32 192, %s2553_s15 }
  0x83   : > { %2125 = vmatmul.mubr.msk.bf16.vlgmr.msra.gmra.mrb[0].mxu0 %vm289_vm2, %v1061_v41  ;;  %v1248_v27 = vsel %vm695_vm7, %v1239_v20, %v1247_v21  ;;  %v2878_v41 = vcombine.low %v677_v31, %v2809_v9  ;;  %v606_v9 = vsel %vm603_vm5, %v604_v37, %v605_v6  ;;  %v874_v62 = vshll.u32 %v2888_v53, 16  ;;  %v1676_v63 = vld [vmem:[#allocation7 + $0x10] sm:$0x3]  ;;  %v1675_v12 = vld [vmem:[#allocation7 + $0x8] sm:$0xff]  ;;  %s238_s24 = scalar_lea.vmem [#allocation8], %s2238_s20  ;;  %s1760_s15 = scalar_lea.sflag [#allocation4], %s2786_s27 }
  0x84   : > { %2129 = vmatpush3.bf16.msra.mxu0 %v2347_v36  ;;  %2132 = vmatprep.mubr.msk.bf16.mxu0 %vm289_vm2, %v1143_v0  ;;  %v1915_v36 = vcombine.low %v676_v29, %v677_v31  ;;  %v2367_v0 = vld [vmem:[#allocation5 + $0x50] sm:$0xff]   ;;  %v710_v4 = vrot.slane %v708_v52, 4  ;;  %v1415_v7 = vrot.slane %v1413_v44, 1  ;;  %v1418_v8 = vrot.slane %v1416_v55, 2  ;;  %v2386_v28 = vld [vmem:[%s2790_s21 + $0x10] ss:$0 sps:$4 sm:$0xff]   ;;  %s2938_s9 = scalar_lea.hbm %s2992_s3, %s2239_s22 }
  0x85   : > { %2130 = vmatprep.subr.bf16.mxu0 %v2349_v54  ;;  %v867_v49 = vshrl.u32 %v2878_v41, 16  ;;  %1689 = vperm.xlu1 %2331, %v1676_v63   ;;  %v2377_v29 = vld [vmem:[#allocation5 + $0xe8] sm:$0xff]   ;;  %v1600_v34 = vshll.u32 %v2386_v28, 16  ;;  %v2381_v37 = vld [vmem:[#allocation5 + $0x70] sm:$0xff]   ;;  %vm1695_vm8 = vcmask 523264   ;;  %vm1699_vm9 = vcmask 517120  }
  0x86   : > { %2061 = vmatmul.mubr.msk.bf16.vlgmr.msra.gmra.mrb[0].mxu1 %vm289_vm2, %v2345_v47  ;;  %v697_v46 = vshrl.u32 %v1915_v36, 16  ;;  %v869_v47 = vshll.u32 %v2878_v41, 16  ;;  %v1419_v16 = vor.u32 %v1418_v8, %v1415_v7  ;;  %v2376_v30 = vld [vmem:[#allocation5 + $0x68] sm:$0xff]   ;;  %s1774_s11 = sshll.u32 %s238_s24, 4  ;;  %vm1754_vm10 = vcmask 519168   ;;  %p3007_p12 = scmp.ne.s32.totalorder %s3003_s4, 0  ;;  %s2940_s11 = int_to_ptr.vmem [resolvable:$true] %s1774_s11 }
  0x87   : > { %2065 = vmatpush3.bf16.msra.mxu1 %v2346_v40  ;;  %2068 = vmatprep.mubr.msk.bf16.mxu1 %vm289_vm2, %v424_v59  ;;  %v2875_v40 = vld [vmem:[%s2790_s21 + $0x10] ss:$0 sps:$4 sm:$0x77]   ;;  %v1674_v59 = vld [vmem:[#allocation7] sm:$0xff]  ;;  %vm1757_vm11 = vcmask 516096   ;;  %s2475_s19 = scalar_lea.vmem %s2940_s11, 192 }
  0x88   : > { %2066 = vmatprep.subr.bf16.mxu1 %v2348_v51  ;;  %2131 = vmatpush3.bf16.msra.mxu0 %v2349_v54  ;;  %v1333_v54 = vsel %vm421_vm4, %v1331_v38, %v1332_v43  ;;  %v1421_v56 = vshrl.u32 %v2875_v40, 16  ;;  %v1424_v58 = vshll.u32 %v2875_v40, 16  ;;  %p2476_p8 = scmp.ne.s32.totalorder %s2940_s11, %s2475_s19  ;;  %s2571_s25 = smov [#allocation8]  }
  0x89   : > { %2136 = vmatprep.subr.bf16.mxu0 %v2353_v1  ;;  %1679 = vperm.xlu0 %2330, %v1674_v59   ;;  %s2479_s5 = sshll.u32 %s2571_s25, 4  ;;  %s2480_s5 = int_to_ptr.vmem [resolvable:$false] %s2479_s5 }
  0x8a   : > { %v1423_v10 = vrot.slane %v1421_v56, 1  ;;  %v1426_v11 = vrot.slane %v1424_v58, 2  ;;  %p2477_p1 = pnand %p2476_p8, %p3007_p12  ;;  %s2481_s10 = scalar_lea.vmem %s2480_s5, 384 }
  0x8b   : > { %2067 = vmatpush3.bf16.msra.mxu1 %v2348_v51  ;;  %v871_v51 = vrot.slane %v869_v47, 1  ;;  %p2482_p3 = scmp.lt.s32.totalorder %s2940_s11, %s2480_s5  ;;  %p2483_p5 = scmp.lt.s32.totalorder %s2481_s10, %s2475_s19 }
  0x8c   : > { %2072 = vmatprep.subr.bf16.mxu1 %v2352_v5  ;;  %v1427_v17 = vor.u32 %v1426_v11, %v1423_v10  ;;  %p2478_p10 = pneg %p2477_p1 }
  0x8d   : > { %v872_v61 = vor.u32 %v871_v51, %v867_v49  ;;  %1684 = vperm.xlu0 %2330, %v1675_v12   ;;  %p2484_p9 = por %p2483_p5, %p2482_p3 }
  0x8f   : > { %2133 = vmatmul.mubr.msk.bf16.vlgmr.msra.gmra.mrb[0].mxu0 %vm289_vm2, %v1142_v50  ;;  %v705_v50 = vshrl.u32 %v1916_v39, 16  ;;  %p2485_p2 = pnand %p2484_p9, %p2478_p10 }
  0x90   : > { %2137 = vmatpush3.bf16.msra.mxu0 %v2353_v1  ;;  %2140 = vmatprep.mubr.msk.bf16.mxu0 %vm289_vm2, %v1248_v27  ;;  %v699_v1 = vrot.slane %v697_v46, 3  ;;  %v1508_v27 = vrot.slane %v2875_v40, 2  ;;  %v1602_v40 = vrot.slane %v1600_v34, 3  ;;  %v2383_v46 = vld [vmem:[#allocation5 + $0x78] sm:$0xff]  }
  0x91   : > { %2138 = vmatprep.subr.bf16.mxu0 %v2355_v22  ;;  %v707_v3 = vrot.slane %v705_v50, 3 }
  0x92   : > { %2069 = vmatmul.mubr.msk.bf16.vlgmr.msra.gmra.mrb[0].mxu1 %vm289_vm2, %v423_v48  ;;  %v700_v48 = vshll.u32 %v1915_v36, 16  ;;  %v2382_v36 = vld [vmem:[#allocation5 + $0xf0] sm:$0xff]  }
  0x93   : > { %2073 = vmatpush3.bf16.msra.mxu1 %v2352_v5  ;;  %2076 = vmatprep.mubr.msk.bf16.mxu1 %vm289_vm2, %v520_v24  ;;  %v2897_v5 = vrot.slane %v874_v62, 1  ;;  %v711_v15 = vor.u32 %v710_v4, %v707_v3  ;;  %v2374_v24 = vld [vmem:[#allocation5 + $0x60] sm:$0xff]  }
  0x94   : > { %2074 = vmatprep.subr.bf16.mxu1 %v2354_v19  ;;  %2139 = vmatpush3.bf16.msra.mxu0 %v2355_v22  ;;  %v702_v2 = vrot.slane %v700_v48, 4  ;;  %v1498_v22 = vld [vmem:[%s2790_s21 + $0x8] sm:$0xc] }
  0x95   : > { %2144 = vmatprep.subr.bf16.mxu0 %v2360_v25  ;;  %v2901_v13 = vsel %vm261_vm0, %v872_v61, %v2897_v5 }
  0x96   : > { %v703_v14 = vor.u32 %v702_v2, %v699_v1 }
  0x97   : > { %2075 = vmatpush3.bf16.msra.mxu1 %v2354_v19  ;;  %v2369_v19 = vld [vmem:[#allocation5 + $0x58] sm:$0xff]  }
  0x98   : > { %2080 = vmatprep.subr.bf16.mxu1 %v2359_v32  ;;  %v712_v20 = vsel %vm695_vm7, %v703_v14, %v711_v15 }
  0x9b   : > { %2141 = vmatmul.mubr.msk.bf16.vlgmr.msra.gmra.mrb[0].mxu0 %vm289_vm2, %v1247_v21  ;;  %v1428_v21 = vsel %vm503_vm6, %v1419_v16, %v1427_v17 }
  0x9c   : > { %2145 = vmatpush3.bf16.msra.mxu0 %v2360_v25  ;;  %2148 = vmatprep.mubr.msk.bf16.mxu0 %vm289_vm2, %v1333_v54  ;;  %v1965_v25 = vcombine.low %v1498_v22, %v2839_v57  ;;  %v1597_v57 = vshrl.u32 %v2386_v28, 16 }
  0x9d   : > { %2146 = vmatprep.subr.bf16.mxu0 %v2362_v42 }
  0x9e   : > { %2077 = vmatmul.mubr.msk.bf16.vlgmr.msra.gmra.mrb[0].mxu1 %vm289_vm2, %v519_v18  ;;  %v2370_v18 = vld [vmem:[#allocation5 + $0xd8] sm:$0xff]   ;;  %v1507_v26 = vrot.slane %v1965_v25, 2  ;;  %v1592_v33 = vshll.u32 %v1965_v25, 16  ;;  %v1599_v39 = vrot.slane %v1597_v57, 2 }
  0x9f   : > { %2081 = vmatpush3.bf16.msra.mxu1 %v2359_v32  ;;  %2084 = vmatprep.mubr.msk.bf16.mxu1 %vm289_vm2, %v606_v9  ;;  %v1589_v32 = vshrl.u32 %v1965_v25, 16 }
  0xa0   : > { %2082 = vmatprep.subr.bf16.mxu1 %v2361_v45  ;;  %2147 = vmatpush3.bf16.msra.mxu0 %v2362_v42  ;;  %v1509_v31 = vsel %vm963_vm1, %v1507_v26, %v1508_v27  ;;  %v1594_v38 = vrot.slane %v1592_v33, 3  ;;  %v1922_v42 = vcombine.low %v2869_v35, %v2869_v35  ;;  %v1603_v44 = vor.u32 %v1602_v40, %v1599_v39 }
  0xa1   : > { %2152 = vmatprep.subr.bf16.mxu0 %v2368_v60  ;;  %v878_v35 = vshrl.u32 %v2888_v53, 16 }
  0xa3   : > { %2083 = vmatpush3.bf16.msra.mxu1 %v2361_v45  ;;  %v2384_v45 = vld [vmem:[#allocation5 + $0xf8] sm:$0xff]   ;;  %v880_v47 = vor.u32 %v878_v35, %v2897_v5 }
  0xa4   : > { %2088 = vmatprep.subr.bf16.mxu1 %v2367_v0 }
  0xa7   : > { %2149 = vmatmul.mubr.msk.bf16.vlgmr.msra.gmra.mrb[0].mxu0 %vm289_vm2, %v1332_v43 }
  0xa8   : > { %2153 = vmatpush3.bf16.msra.mxu0 %v2368_v60  ;;  %2156 = vmatprep.mubr.msk.bf16.mxu0 %vm289_vm2, %v1428_v21 }
  0xa9   : > { %2154 = vmatprep.subr.bf16.mxu0 %v2370_v18 }
  0xaa   : > { %2085 = vmatmul.mubr.msk.bf16.vlgmr.msra.gmra.mrb[0].mxu1 %vm289_vm2, %v605_v6  ;;  %v1591_v6 = vrot.slane %v1589_v32, 2 }
  0xab   : > { %2089 = vmatpush3.bf16.msra.mxu1 %v2367_v0  ;;  %2092 = vmatprep.mubr.msk.bf16.mxu1 %vm289_vm2, %v712_v20 }
  0xac   : > { %2090 = vmatprep.subr.bf16.mxu1 %v2369_v19  ;;  %2155 = vmatpush3.bf16.msra.mxu0 %v2370_v18  ;;  %v1595_v43 = vor.u32 %v1594_v38, %v1591_v6 }
  0xad   : > { %2160 = vmatprep.subr.bf16.mxu0 %v2375_v23 }
  0xaf   : > { %2091 = vmatpush3.bf16.msra.mxu1 %v2369_v19 }
  0xb0   : > { %2096 = vmatprep.subr.bf16.mxu1 %v2374_v24 }
  0xb3   : > { %2157 = vmatmul.mubr.msk.bf16.vlgmr.msra.gmra.mrb[0].mxu0 %vm289_vm2, %v1427_v17 }
  0xb4   : > { %2161 = vmatpush3.bf16.msra.mxu0 %v2375_v23  ;;  %2164 = vmatprep.mubr.msk.bf16.mxu0 %vm289_vm2, %v1509_v31 }
  0xb5   : > { %2162 = vmatprep.subr.bf16.mxu0 %v2377_v29 }
  0xb6   : > { %2093 = vmatmul.mubr.msk.bf16.vlgmr.msra.gmra.mrb[0].mxu1 %vm289_vm2, %v711_v15 }
  0xb7   : > { %2097 = vmatpush3.bf16.msra.mxu1 %v2374_v24  ;;  %2100 = vmatprep.mubr.msk.bf16.mxu1 %vm289_vm2, %v2878_v41  ;;  %v1604_v41 = vsel %vm1045_vm3, %v1595_v43, %v1603_v44 }
  0xb8   : > { %2098 = vmatprep.subr.bf16.mxu1 %v2376_v30  ;;  %2163 = vmatpush3.bf16.msra.mxu0 %v2377_v29 }
  0xb9   : > { %2168 = vmatprep.subr.bf16.mxu0 %v2382_v36 }
  0xbb   : > { %2099 = vmatpush3.bf16.msra.mxu1 %v2376_v30 }
  0xbc   : > { %2104 = vmatprep.subr.bf16.mxu1 %v2381_v37 }
  0xbf   : > { %2165 = vmatmul.mubr.msk.bf16.vlgmr.msra.gmra.mrb[0].mxu0 %vm289_vm2, %v1508_v27 }
  0xc0   : > { %2169 = vmatpush3.bf16.msra.mxu0 %v2382_v36  ;;  %2172 = vmatprep.mubr.msk.bf16.mxu0 %vm289_vm2, %v1604_v41 }
  0xc1   : > { %2170 = vmatprep.subr.bf16.mxu0 %v2384_v45 }
  0xc2   : > { %2101 = vmatmul.mubr.msk.bf16.vlgmr.msra.gmra.mrb[0].mxu1 %vm289_vm2, %v1922_v42 }
  0xc3   : > { %2105 = vmatpush3.bf16.msra.mxu1 %v2381_v37  ;;  %2108 = vmatprep.mubr.msk.bf16.mxu1 %vm289_vm2, %v2901_v13 }
  0xc4   : > { %2106 = vmatprep.subr.bf16.mxu1 %v2383_v46  ;;  %2171 = vmatpush3.bf16.msra.mxu0 %v2384_v45 }
  0xc7   : > { %2107 = vmatpush3.bf16.msra.mxu1 %v2383_v46 }
  0xcb   : > { %2173 = vmatmul.mubr.msk.bf16.vlgmr.msra.gmra.mrb[0].mxu0 %vm289_vm2, %v1603_v44 }
  0xce   : > { %2109 = vmatmul.mubr.msk.bf16.vlgmr.msra.gmra.mrb[0].mxu1 %vm289_vm2, %v880_v47 }
 0x104   : > { %v1690_v50 = vpop.permute.xlu1 %1689 }
 0x108   : > { %v1680_v48 = vpop.permute.xlu0 %1679 }
 0x10c   : > { %v1685_v63 = vpop.permute.xlu0 %1684 }
 0x19e   : > { %v2174_v49 = vpop.f32.mrb[0].mxu0 }
 0x19f   : > { %v1657_v9 = vpop.f32.mrb[1].mxu0 }
 0x1a0   : > { %v2175_v55 = vpop.f32.mrb[2].mxu0 }
 0x1a1   : > { %v2110_v51 = vpop.f32.mrb[0].mxu1  ;;  %v1660_v59 = vpop.f32.mrb[3].mxu0 }
 0x1a2   : > { %v2176_v52 = vadd.f32 %v2174_v49, %v2110_v51  ;;  %v933_v54 = vpop.f32.mrb[1].mxu1 }
 0x1a3   : > { %v2177_v56 = vadd.f32 %v1657_v9, %v933_v54  ;;  %v2111_v58 = vpop.f32.mrb[2].mxu1 }
 0x1a4   : > { %v936_v60 = vpop.f32.mrb[3].mxu1  ;;  %v1694_v61 = vmul.f32 %v2176_v52, %v1690_v50 }
 0x1a5   : > { %v1692_v53 = vmul.f32 %v2177_v56, %v1680_v48  ;;  %v2178_v62 = vadd.f32 %v1660_v59, %v936_v60 }
 0x1a6   : > { %v1711_v3 = vmul.f32 %v1694_v61, %v1694_v61  ;;  %v1700_v10 = vsel %vm1699_vm9, %v1694_v61, 0.0 }
 0x1a7   : > { %v1709_v0 = vmul.f32 %v1692_v53, %v1692_v53  ;;  %v1693_v1 = vmul.f32 %v2178_v62, %v1685_v63  ;;  %v1696_v2 = vsel %vm1695_vm8, %v1692_v53, 0.0 }
 0x1a8   : > { %v1715_v14 = vsel %vm1699_vm9, %v1711_v3, 0.0 }
 0x1a9   : > { %v1697_v4 = vsel %vm1695_vm8, %v1693_v1, 0.0  ;;  %v1710_v5 = vmul.f32 %v1693_v1, %v1693_v1  ;;  %v1712_v8 = vsel %vm1695_vm8, %v1709_v0, 0.0 }
 0x1aa   : > { %v1698_v7 = vadd.f32 %v1697_v4, %v1696_v2 }
 0x1ab   : > { %v1713_v11 = vsel %vm1695_vm8, %v1710_v5, 0.0 }
 0x1ac   : > { %v1701_v12 = vadd.f32 %v1700_v10, %v1698_v7  ;;  %v1714_v13 = vadd.f32 %v1713_v11, %v1712_v8 }
 0x1ae   : > { %v1702_v15 = vrot.slane %v1701_v12, 4  ;;  %v1716_v16 = vadd.f32 %v1715_v14, %v1714_v13 }
 0x1b0   : > { %v1703_v17 = vadd.f32 %v1702_v15, %v1701_v12  ;;  %v1717_v18 = vrot.slane %v1716_v16, 4 }
 0x1b2   : > { %v1704_v19 = vrot.slane %v1703_v17, 2  ;;  %v1718_v20 = vadd.f32 %v1717_v18, %v1716_v16 }
 0x1b4   : > { %v1705_v21 = vadd.f32 %v1704_v19, %v1703_v17  ;;  %v1719_v22 = vrot.slane %v1718_v20, 2 }
 0x1b6   : > { %v1706_v23 = vrot.slane %v1705_v21, 1  ;;  %v1720_v24 = vadd.f32 %v1719_v22, %v1718_v20 }
 0x1b8   : > { %v1707_v25 = vadd.f32 %v1706_v23, %v1705_v21  ;;  %v1721_v26 = vrot.slane %v1720_v24, 1 }
 0x1ba   : > { %v1708_v27 = vmul.f32 0.11111111, %v1707_v25  ;;  %v1722_v28 = vadd.f32 %v1721_v26, %v1720_v24 }
 0x1bc   : > { %v1723_v29 = vmul.f32 0.11111111, %v1722_v28  ;;  %v1724_v30 = vmul.f32 %v1708_v27, %v1708_v27  ;;  %v1727_v31 = vsub.f32 %v2177_v56, %v1708_v27  ;;  %v1728_v32 = vsub.f32 %v2178_v62, %v1708_v27 }
 0x1bd   : > { %v1729_v33 = vsub.f32 %v2176_v52, %v1708_v27 }
 0x1be   : > { %v1725_v57 = vsub.f32 %v1723_v29, %v1724_v30 }
 0x1c0   : > { %v1726_v34 = vmax.f32 %v1725_v57, 0.0 }
 0x1c2   : > { %v1730_v36 = vadd.f32 1e-05, %v1726_v34 }
 0x1c4   : > { %2387 = vrsqrt.f32 %v1730_v36 }
 0x1ce   : > { %v2388_v37 = vpop.eup %2387 }
 0x1cf   : > { %v1732_v6 = vmul.f32 %v2388_v37, %v1727_v31  ;;  %v1733_v38 = vmul.f32 %v2388_v37, %v1728_v32  ;;  %v1734_v39 = vmul.f32 %v2388_v37, %v1729_v33 }
 0x1d1   : > { %v1735_v40 = vmul.f32 0.2, %v1732_v6  ;;  %v1736_v42 = vmul.f32 0.2, %v1733_v38  ;;  %v1737_v43 = vmul.f32 0.2, %v1734_v39 }
 0x1d3   : > { %v1738_v44 = vmax.f32 %v1732_v6, %v1735_v40  ;;  %v1739_v45 = vmax.f32 %v1733_v38, %v1736_v42  ;;  %v1740_v46 = vmax.f32 %v1734_v39, %v1737_v43 }
 0x1d5   : > { %v1981_v41 = vpack.c.bf16 %v1738_v44, %v1738_v44  ;;  %v1982_v35 = vpack.c.bf16 %v1739_v45, %v1739_v45  ;;  %v1983_v47 = vpack.c.bf16 %v1740_v46, %v1740_v46 }
 0x1d7   : > { %1756 = vst.msk [vmem:[%s238_s24 + $0x4] sm:$0xf] %vm1754_vm10, %v1982_v35  ;;  %1755 = vst.msk [vmem:[%s238_s24] sm:$0xf] %vm1754_vm10, %v1981_v41 }
 0x1d8   : > { %1758 = vst.msk [vmem:[%s238_s24 + $0x8] sm:$0x1] %vm1757_vm11, %v1983_v47 }
 0x1d9   : > { %2488 = shalt.err (!%p2485_p2)
}
 0x1da   : > { %s2489_s30 = scalar_lea.hbm %s2938_s9, 192  ;;  %s2493_s26 = scalar_lea.hbm %s2992_s3, 384 }
 0x1db   : > { %p2490_p0 = scmp.ne.s32.totalorder %s2938_s9, %s2489_s30  ;;  %p2494_p6 = scmp.lt.u32.totalorder %s2938_s9, %s2992_s3 }
 0x1dc   : > { %p2495_p7 = scmp.lt.u32.totalorder %s2493_s26, %s2489_s30  ;;  %p2497_p8 = scmp.lt.u32.totalorder %s2489_s30, %s2938_s9 }
 0x1dd   : > { %p2491_p4 = pnand %p2490_p0, %p3007_p12 }
 0x1de   : > { %p2496_p11 = por %p2495_p7, %p2494_p6 }
 0x1df   : > { %p2492_p13 = pneg %p2491_p4 }
 0x1e0   : > { %p2498_p1 = por %p2497_p8, %p2496_p11 }
 0x1e2   : > { %p2499_p10 = pnand %p2498_p1, %p2492_p13 }
 0x1e4   : > { %2502 = shalt.err (!%p2499_p10)
}
 0x1e5   : > { %s2572_s22 = smov 64   ;;  %s2573_s24 = smov 4  }
 0x1e6   : > { %2250 = dma.vmem_to_hbm [thread:$0]  (%p3007_p12), %s2940_s11, 192, %s2938_s9, %s1760_s15, %s2572_s22, %s2572_s22, %s2573_s24  }
 0x1e7 PF: > { %s1789_s18 = sand.u32 1, %s2541_s12   ;;  %p3008_p3 = scmp.ne.s32.totalorder %s3000_s23, 0 }
 0x1e8   : > { %p3009_p5 = scmp.ge.s32.totalorder %s2561_s17, 2  ;;  %s1790_s6 = scalar_lea.sflag [#allocation4], %s1789_s18 }
 0x1ea   : > { %p2264_p9 = pnand %p3009_p5, %p3008_p3 }
 0x1ec   : > { %2536 = dma.done.wait (!%p2264_p9), %s1790_s6, 192  }
 0x1ed   : > { %2538 = vsyncadd (!%p2264_p9), %s1790_s6, 4294967104  ;;  %s20_s17 = sadd.s32 1, %s2561_s17   ;;  %s3010_s12 = smov %s2545_s13 }
 0x1ee   : > { %p17_p2 = scmp.ge.s32.totalorder %s20_s17, 4   ;;  %s3011_s13 = smov %s2549_s14 }
 0x1ef   : > { %s3012_s14 = smov %s2742_s7  ;;  %s3013_s15 = smov %s2557_s16 }
 0x1f0   : > { %s3014_s16 = smov %s3016_s28  ;;  %19 = sbr.rel (!%p17_p2) target bundleno = 7 (0x7), region = 101 }
 0x1f7   :  { %1795 = vsyncpa [#allocation3], 1 }
 0x1f8   :  { %1797 = vsyncpa [#allocation3 + $0x1], 1 }
 0x1f9   :  { %1798 = vsyncpa [#allocation6], 1 }
 0x1fa   :  { %1799 = vsyncpa [#allocation4], 1 }
 0x1fb   :  { %1801 = vsyncpa [#allocation4 + $0x1], 1 }

</bundles_post_ra>
